<compile_context>
chip_gen: v7x
topology: tpu7x:2x2x1
jax: 0.10.0
libtpu: 0.0.40
codegen_flags: <defaults>
</compile_context>

<pallas_src>
import jax
import jax.numpy as jnp
from jax.experimental import pallas as pl
from jax.experimental.pallas import tpu as pltpu


# --------------------------- hardware introspection ------------------------ #
def _tpu_params():
    """Best-effort (vmem_capacity_bytes, is_v5e, multi_tensorcore) for tuning."""
    kind = ""
    try:
        kind = jax.devices()[0].device_kind.lower()
    except Exception:
        pass
    multi_tc = "v7" in kind
    vmem_cap = 64 * 1024 * 1024 if multi_tc else 128 * 1024 * 1024
    try:
        vmem_cap = int(pltpu.get_tpu_info().vmem_capacity_bytes)
    except Exception:
        pass
    is_v5e = ("v5e" in kind) or ("v5 lite" in kind) or ("v5lite" in kind)
    return vmem_cap, is_v5e, multi_tc


# ------------------------------ Pallas kernels ------------------------------ #
def _make_folded_kernel(kh, kw, dilation, toh, ow):
    """stride == 1, small C: one (TOH*OW, KH*KW*C) x (KH*KW*C, TOC) matmul."""

    def kernel(x_ref, w_ref, b_ref, o_ref):
        # x_ref: (1, Hp, Wp, C)     zero-padded NHWC slab of one batch
        # w_ref: (KH*KW*C, TOC)     im2col-ordered weights
        # b_ref: (1, TOC)           bias (f32)
        # o_ref: (1, TOH*OW, TOC)   lane-dense, sublane-aligned output block
        rb = pl.program_id(2)
        row0 = rb * toh                                    # stride == 1
        strips = []
        for i in range(kh):                                # <= KH*KW, small
            for j in range(kw):
                strips.append(
                    x_ref[0, pl.ds(row0 + i * dilation, toh),
                          pl.ds(j * dilation, ow), :])     # (TOH, OW, C)
        patch = jnp.concatenate(strips, axis=-1)           # (TOH, OW, KH*KW*C)
        patch = patch.reshape(toh * ow, patch.shape[-1])   # big-M LHS
        out = jnp.dot(patch, w_ref[...],
                      preferred_element_type=jnp.float32)  # (M, TOC) f32
        o_ref[0, :, :] = (out + b_ref[...]).astype(o_ref.dtype)

    return kernel


def _make_pertap_kernel(kh, kw, stride, dilation, toh, ow):
    """General path: weight-stationary tap loop + VMEM f32 accumulator."""

    def kernel(x_ref, w_ref, b_ref, o_ref, acc_ref):
        # x_ref: (1, Hp, Wp, C); w_ref: (KH*KW, C, TOC); b_ref: (1, TOC)
        # o_ref: (1, TOH*OW, TOC); acc_ref: VMEM (TOH*OW, TOC) f32 scratch
        rb = pl.program_id(2)
        row0 = rb * (toh * stride)
        # Initialize the accumulator with the broadcast bias (epilogue add
        # removed; single broadcast per block).
        acc_ref[...] = jnp.broadcast_to(b_ref[...], acc_ref.shape)
        for t in range(kh * kw):                           # <= KH*KW, small
            i, j = divmod(t, kw)
            r0 = row0 + i * dilation
            c0 = j * dilation
            if stride == 1:
                blk = x_ref[0, pl.ds(r0, toh), pl.ds(c0, ow), :]
            else:
                # TODO(synk): stride phases in the wrapper would make these
                # reads contiguous (strided sublane reads are slow).
                blk = x_ref[0, pl.ds(r0, toh, stride), pl.ds(c0, ow, stride), :]
            patch = blk.reshape(toh * ow, blk.shape[-1])   # big-M LHS (M, C)
            acc_ref[...] += jnp.dot(patch, w_ref[t],
                                    preferred_element_type=jnp.float32)
        # Single lane-dense, sublane-aligned store per block.
        o_ref[0, :, :] = acc_ref[...].astype(o_ref.dtype)

    return kernel


# ------------------------------ host wrapper ------------------------------- #
def _fused_conv2d(x_nchw, weight, bias, *, stride, padding, dilation,
                  fold_taps, compute_dtype=jnp.bfloat16):
    """Conv2d + bias (== zero-offset deformable conv) via the fused kernel."""
    N, C, H, W = x_nchw.shape
    OC, _, KH, KW = weight.shape
    OH = (H + 2 * padding - dilation * (KH - 1) - 1) // stride + 1
    OW = (W + 2 * padding - dilation * (KW - 1) - 1) // stride + 1

    fold_taps = fold_taps and stride == 1                  # fold needs stride 1
    vmem_cap, is_v5e, multi_tc = _tpu_params()

    # Lane-dense output channels; TOC generation-aware (v5e MXU is 128 wide).
    LANE = 128
    OC_pad = ((OC + LANE - 1) // LANE) * LANE
    TOC = 256 if (OC_pad % 256 == 0 and not is_v5e) else 128
    num_oc_blocks = OC_pad // TOC

    # Sublane-aligned output width: block stores and in-kernel reshapes stay
    # fully aligned; the extra columns are sliced off in the epilogue.
    OW_blk = ((OW + 7) // 8) * 8

    # Output rows per block: bigger blocks on v5e/v6e (128 MiB VMEM), ~512
    # output pixels on v7x (64 MiB VMEM, 2 TensorCores).
    target_px = 512 if vmem_cap < (96 << 20) else 1024
    TOH = max(1, min(OH, max(1, target_px // OW_blk)))
    if multi_tc:
        # Keep >= 4 sizable parallel grid steps so both TensorCores stay busy.
        while TOH > 1 and N * num_oc_blocks * pl.cdiv(OH, TOH) < 4:
            TOH = max(1, TOH // 2)
    OH_pad = pl.cdiv(OH, TOH) * TOH
    num_row_blocks = OH_pad // TOH

    # Spatial zero padding: top/left = `padding`; bottom/right sized so every
    # receptive-field read of the padded OH_pad x OW_blk grid stays in bounds.
    pad_b = max(padding,
                (OH_pad - 1) * stride + (KH - 1) * dilation + 1 - padding - H)
    pad_r = max(padding,
                (OW_blk - 1) * stride + (KW - 1) * dilation + 1 - padding - W)

    # Wrapper-side layout prep (transpose/pad/cast fuse into one XLA pass).
    x_nhwc = jnp.transpose(x_nchw, (0, 2, 3, 1))
    x_p = jnp.pad(x_nhwc, ((0, 0), (padding, pad_b), (padding, pad_r), (0, 0)))
    x_p = x_p.astype(compute_dtype)
    Hp, Wp = x_p.shape[1], x_p.shape[2]

    # Weights: (OC, C, KH, KW) -> (KH, KW, C, OC); bias -> (1, OC_pad) f32.
    w_hwco = jnp.transpose(weight, (2, 3, 1, 0))
    if fold_taps:
        w_r = w_hwco.reshape(KH * KW * C, OC)
        w_r = jnp.pad(w_r, ((0, 0), (0, OC_pad - OC))).astype(compute_dtype)
        w_spec = pl.BlockSpec((KH * KW * C, TOC), lambda n, ob, rb: (0, ob))
        kernel = _make_folded_kernel(KH, KW, dilation, TOH, OW_blk)
        scratch_shapes = []
    else:
        w_r = w_hwco.reshape(KH * KW, C, OC)
        w_r = jnp.pad(w_r, ((0, 0), (0, 0), (0, OC_pad - OC)))
        w_r = w_r.astype(compute_dtype)
        w_spec = pl.BlockSpec((KH * KW, C, TOC), lambda n, ob, rb: (0, 0, ob))
        kernel = _make_pertap_kernel(KH, KW, stride, dilation, TOH, OW_blk)
        scratch_shapes = [pltpu.VMEM((TOH * OW_blk, TOC), jnp.float32)]
    b_p = jnp.pad(bias, (0, OC_pad - OC)).reshape(1, OC_pad).astype(jnp.float32)

    # Grid: row blocks innermost so the x slab (changes with n only) and the
    # weight/bias blocks (change with ob only) stay resident across it.
    grid = (N, num_oc_blocks, num_row_blocks)

    itemsize = jnp.dtype(compute_dtype).itemsize
    cost = pl.CostEstimate(
        flops=2 * N * OH * OW * KH * KW * C * OC,
        transcendentals=0,
        bytes_accessed=int(x_p.size * itemsize + w_r.size * itemsize
                           + b_p.size * 4 + N * OH * OW * OC * 4),
    )

    # Generation-aware VMEM cap: ~40 MiB on v7x (64 MiB/TC), 96 MiB on v5e/v6e.
    vmem_limit = int(min(max(vmem_cap - (24 << 20), 32 << 20), 96 << 20))

    out_flat = pl.pallas_call(
        kernel,
        out_shape=jax.ShapeDtypeStruct((N, OH_pad * OW_blk, OC_pad),
                                       jnp.float32),
        grid_spec=pltpu.PrefetchScalarGridSpec(
            num_scalar_prefetch=0,
            grid=grid,
            in_specs=[
                pl.BlockSpec((1, Hp, Wp, C), lambda n, ob, rb: (n, 0, 0, 0)),
                w_spec,
                pl.BlockSpec((1, TOC), lambda n, ob, rb: (0, ob)),
            ],
            out_specs=pl.BlockSpec((1, TOH * OW_blk, TOC),
                                   lambda n, ob, rb: (n, rb, ob)),
            scratch_shapes=scratch_shapes,
        ),
        compiler_params=pltpu.CompilerParams(
            dimension_semantics=("parallel", "parallel", "parallel"),
            vmem_limit_bytes=vmem_limit,
        ),
        cost_estimate=cost,
    )(x_p, w_r, b_p)

    out = out_flat.reshape(N, OH_pad, OW_blk, OC_pad)[:, :OH, :OW, :OC]
    return jnp.transpose(out, (0, 3, 1, 2))                # NCHW, f32


# ------------------------------ module wrapper ------------------------------ #
class DeformableConvLayerPallas:
    """Pallas/TPU equivalent of DeformableConvLayer.

    The PyTorch module always passes an all-zero offset to DeformConv2d, so the
    bilinear sampling grid equals the integer conv grid and the forward pass is
    a standard Conv2d + bias, implemented here as a fused Pallas kernel.
    """

    def __init__(self, in_channels, out_channels, kernel_size, stride=1,
                 padding=0, dilation=1, key=None, param_dtype=jnp.float32,
                 compute_dtype=jnp.bfloat16):
        self.in_channels = in_channels
        self.out_channels = out_channels
        self.kh = self.kw = kernel_size
        self.stride = stride
        self.padding = padding
        self.dilation = dilation
        # bf16 operands + f32 accumulation by default; pass
        # compute_dtype=jnp.float32 to track a float32 PyTorch reference more
        # closely (at 2x the HBM/VMEM traffic).
        self.compute_dtype = compute_dtype

        if key is None:
            key = jax.random.PRNGKey(0)
        wkey, bkey = jax.random.split(key)
        fan_in = in_channels * self.kh * self.kw
        bound = 1.0 / (fan_in ** 0.5)
        # Deterministic init mirroring PyTorch conv default (uniform +/- bound).
        self.weight = jax.random.uniform(
            wkey, (out_channels, in_channels, self.kh, self.kw),
            minval=-bound, maxval=bound, dtype=param_dtype)
        self.bias = jax.random.uniform(
            bkey, (out_channels,), minval=-bound, maxval=bound,
            dtype=param_dtype)

        self._cached_fn = None

    def _build(self, fold_taps):
        stride, padding, dilation = self.stride, self.padding, self.dilation
        cdt = self.compute_dtype

        @jax.jit
        def fn(x, w, b):
            return _fused_conv2d(x, w, b, stride=stride, padding=padding,
                                 dilation=dilation, fold_taps=fold_taps,
                                 compute_dtype=cdt)

        return fn

    def __call__(self, x):
        if self._cached_fn is not None:
            return self._cached_fn(x, self.weight, self.bias)
        # Prefer the folded (taps-in-K) kernel for stride==1 / small C; if the
        # minor-dim concatenate is unsupported by the local Mosaic build, fall
        # back to the per-tap weight-stationary kernel.
        variants = []
        if self.stride == 1 and self.in_channels * self.kh * self.kw <= 512:
            variants.append(True)
        variants.append(False)
        err = None
        for fold in variants:
            fn = self._build(fold)
            try:
                out = jax.block_until_ready(fn(x, self.weight, self.bias))
            except Exception as e:          # lowering/compile fallback only
                err = e
                continue
            self._cached_fn = fn
            return out
        raise err


# ----------------------------------- demo ----------------------------------- #
if __name__ == "__main__":
    key = jax.random.PRNGKey(0)
    xkey, pkey = jax.random.split(key)

    N, C, H, W = 2, 4, 16, 16
    out_channels, kernel_size, stride, padding, dilation = 8, 3, 1, 1, 1

    x = jax.random.normal(xkey, (N, C, H, W), dtype=jnp.float32)

    layer = DeformableConvLayerPallas(C, out_channels, kernel_size,
                                      stride=stride, padding=padding,
                                      dilation=dilation, key=pkey)
    out = jax.block_until_ready(layer(x))
    assert out.shape == (N, out_channels, H, W), out.shape

    # Sanity check: zero-offset deformable conv == conv2d.  Compare against a
    # reference computed on the same bf16-quantized operands the kernel uses
    # (f32 accumulation both sides), so the check is tolerance-robust.
    xq = x.astype(jnp.bfloat16).astype(jnp.float32)
    wq = layer.weight.astype(jnp.bfloat16).astype(jnp.float32)
    ref = jax.lax.conv_general_dilated(
        xq, wq,
        window_strides=(stride, stride),
        padding=[(padding, padding), (padding, padding)],
        rhs_dilation=(dilation, dilation),
        dimension_numbers=("NCHW", "OIHW", "NCHW"),
        precision=jax.lax.Precision.HIGHEST,
    ) + layer.bias.reshape(1, out_channels, 1, 1)
    assert jnp.allclose(out, ref, atol=1e-2, rtol=1e-2), \
        float(jnp.max(jnp.abs(out - ref)))

    print("KERNEL_OK")
</pallas_src>

<mosaic_0001>
module attributes {stable_mosaic.version = 11 : i64} {
  func.func @kernel(%arg0: i32, %arg1: i32, %arg2: i32, %arg3: memref<1x18x18x4xbf16, #tpu.memory_space<vmem>>, %arg4: memref<36x128xbf16, #tpu.memory_space<vmem>>, %arg5: memref<1x128xf32, #tpu.memory_space<vmem>>, %arg6: memref<1x256x128xf32, #tpu.memory_space<vmem>>) attributes {dimension_semantics = [#tpu.dimension_semantics<parallel>, #tpu.dimension_semantics<parallel>, #tpu.dimension_semantics<parallel>], iteration_bounds = array<i64: 2, 1, 1>, scalar_prefetch = 0 : i64, scratch_operands = 0 : i64, tpu.core_type = #tpu.core_type<tc>, window_params = [{transform_indices = @transform_0, window_bounds = array<i64: 1, 18, 18, 4>}, {transform_indices = @transform_1, window_bounds = array<i64: 36, 128>}, {transform_indices = @transform_2, window_bounds = array<i64: 1, 128>}, {transform_indices = @transform_3, window_bounds = array<i64: 1, 256, 128>}]} {
    %c16_i32 = arith.constant 16 : i32
    %0 = arith.muli %arg2, %c16_i32 : i32
    %c0_i32 = arith.constant 0 : i32
    %1 = arith.addi %0, %c0_i32 : i32
    %c0 = arith.constant 0 : index
    %2 = arith.index_cast %1 : i32 to index
    %c0_0 = arith.constant 0 : index
    %c0_1 = arith.constant 0 : index
    %3 = vector.load %arg3[%c0, %2, %c0_0, %c0_1] : memref<1x18x18x4xbf16, #tpu.memory_space<vmem>>, vector<1x16x16x4xbf16>
    %4 = vector.shape_cast %3 : vector<1x16x16x4xbf16> to vector<16x16x4xbf16>
    %c0_i32_2 = arith.constant 0 : i32
    %5 = arith.addi %0, %c0_i32_2 : i32
    %c0_3 = arith.constant 0 : index
    %6 = arith.index_cast %5 : i32 to index
    %c1 = arith.constant 1 : index
    %c0_4 = arith.constant 0 : index
    %7 = vector.load %arg3[%c0_3, %6, %c1, %c0_4] : memref<1x18x18x4xbf16, #tpu.memory_space<vmem>>, vector<1x16x16x4xbf16>
    %8 = vector.shape_cast %7 : vector<1x16x16x4xbf16> to vector<16x16x4xbf16>
    %c0_i32_5 = arith.constant 0 : i32
    %9 = arith.addi %0, %c0_i32_5 : i32
    %c0_6 = arith.constant 0 : index
    %10 = arith.index_cast %9 : i32 to index
    %c2 = arith.constant 2 : index
    %c0_7 = arith.constant 0 : index
    %11 = vector.load %arg3[%c0_6, %10, %c2, %c0_7] : memref<1x18x18x4xbf16, #tpu.memory_space<vmem>>, vector<1x16x16x4xbf16>
    %12 = vector.shape_cast %11 : vector<1x16x16x4xbf16> to vector<16x16x4xbf16>
    %c1_i32 = arith.constant 1 : i32
    %13 = arith.addi %0, %c1_i32 : i32
    %c0_8 = arith.constant 0 : index
    %14 = arith.index_cast %13 : i32 to index
    %c0_9 = arith.constant 0 : index
    %c0_10 = arith.constant 0 : index
    %15 = vector.load %arg3[%c0_8, %14, %c0_9, %c0_10] : memref<1x18x18x4xbf16, #tpu.memory_space<vmem>>, vector<1x16x16x4xbf16>
    %16 = vector.shape_cast %15 : vector<1x16x16x4xbf16> to vector<16x16x4xbf16>
    %c1_i32_11 = arith.constant 1 : i32
    %17 = arith.addi %0, %c1_i32_11 : i32
    %c0_12 = arith.constant 0 : index
    %18 = arith.index_cast %17 : i32 to index
    %c1_13 = arith.constant 1 : index
    %c0_14 = arith.constant 0 : index
    %19 = vector.load %arg3[%c0_12, %18, %c1_13, %c0_14] : memref<1x18x18x4xbf16, #tpu.memory_space<vmem>>, vector<1x16x16x4xbf16>
    %20 = vector.shape_cast %19 : vector<1x16x16x4xbf16> to vector<16x16x4xbf16>
    %c1_i32_15 = arith.constant 1 : i32
    %21 = arith.addi %0, %c1_i32_15 : i32
    %c0_16 = arith.constant 0 : index
    %22 = arith.index_cast %21 : i32 to index
    %c2_17 = arith.constant 2 : index
    %c0_18 = arith.constant 0 : index
    %23 = vector.load %arg3[%c0_16, %22, %c2_17, %c0_18] : memref<1x18x18x4xbf16, #tpu.memory_space<vmem>>, vector<1x16x16x4xbf16>
    %24 = vector.shape_cast %23 : vector<1x16x16x4xbf16> to vector<16x16x4xbf16>
    %c2_i32 = arith.constant 2 : i32
    %25 = arith.addi %0, %c2_i32 : i32
    %c0_19 = arith.constant 0 : index
    %26 = arith.index_cast %25 : i32 to index
    %c0_20 = arith.constant 0 : index
    %c0_21 = arith.constant 0 : index
    %27 = vector.load %arg3[%c0_19, %26, %c0_20, %c0_21] : memref<1x18x18x4xbf16, #tpu.memory_space<vmem>>, vector<1x16x16x4xbf16>
    %28 = vector.shape_cast %27 : vector<1x16x16x4xbf16> to vector<16x16x4xbf16>
    %c2_i32_22 = arith.constant 2 : i32
    %29 = arith.addi %0, %c2_i32_22 : i32
    %c0_23 = arith.constant 0 : index
    %30 = arith.index_cast %29 : i32 to index
    %c1_24 = arith.constant 1 : index
    %c0_25 = arith.constant 0 : index
    %31 = vector.load %arg3[%c0_23, %30, %c1_24, %c0_25] : memref<1x18x18x4xbf16, #tpu.memory_space<vmem>>, vector<1x16x16x4xbf16>
    %32 = vector.shape_cast %31 : vector<1x16x16x4xbf16> to vector<16x16x4xbf16>
    %c2_i32_26 = arith.constant 2 : i32
    %33 = arith.addi %0, %c2_i32_26 : i32
    %c0_27 = arith.constant 0 : index
    %34 = arith.index_cast %33 : i32 to index
    %c2_28 = arith.constant 2 : index
    %c0_29 = arith.constant 0 : index
    %35 = vector.load %arg3[%c0_27, %34, %c2_28, %c0_29] : memref<1x18x18x4xbf16, #tpu.memory_space<vmem>>, vector<1x16x16x4xbf16>
    %36 = vector.shape_cast %35 : vector<1x16x16x4xbf16> to vector<16x16x4xbf16>
    %37 = tpu.concatenate %4, %8, %12, %16, %20, %24, %28, %32, %36 in 2 : vector<16x16x4xbf16>, vector<16x16x4xbf16>, vector<16x16x4xbf16>, vector<16x16x4xbf16>, vector<16x16x4xbf16>, vector<16x16x4xbf16>, vector<16x16x4xbf16>, vector<16x16x4xbf16>, vector<16x16x4xbf16> -> vector<16x16x36xbf16>
    %38 = vector.shape_cast %37 : vector<16x16x36xbf16> to vector<256x36xbf16>
    %c0_30 = arith.constant 0 : index
    %c0_31 = arith.constant 0 : index
    %39 = vector.load %arg4[%c0_30, %c0_31] : memref<36x128xbf16, #tpu.memory_space<vmem>>, vector<36x128xbf16>
    %cst = arith.constant dense<0.000000e+00> : vector<256x128xf32>
    %40 = tpu.matmul %38, %39, %cst {dimension_numbers = #tpu.dot_dimension_numbers<[1], [0], [0], [1], [0, 0, 1, 1], [], []>} : vector<256x36xbf16>, vector<36x128xbf16>, vector<256x128xf32> -> vector<256x128xf32>
    %c0_32 = arith.constant 0 : index
    %c0_33 = arith.constant 0 : index
    %41 = vector.load %arg5[%c0_32, %c0_33] : memref<1x128xf32, #tpu.memory_space<vmem>>, vector<1x128xf32>
    %42 = vector.broadcast %41 : vector<1x128xf32> to vector<256x128xf32>
    %43 = arith.addf %40, %42 : vector<256x128xf32>
    %c0_34 = arith.constant 0 : index
    %c0_35 = arith.constant 0 : index
    %c0_36 = arith.constant 0 : index
    %44 = vector.load %arg6[%c0_34, %c0_35, %c0_36] : memref<1x256x128xf32, #tpu.memory_space<vmem>>, vector<1x256x128xf32>
    %45 = vector.shape_cast %44 : vector<1x256x128xf32> to vector<256x128xf32>
    %46 = vector.shape_cast %43 : vector<256x128xf32> to vector<1x256x128xf32>
    tpu.vector_store %arg6[%c0_34, %c0_35, %c0_36], %46 {strides = array<i32>} : memref<1x256x128xf32, #tpu.memory_space<vmem>>, vector<1x256x128xf32>,
    return
  }
  func.func @transform_0(%arg0: i32, %arg1: i32, %arg2: i32) -> (i32, i32, i32, i32) {
    %c0_i32 = arith.constant 0 : i32
    %c0_i32_0 = arith.constant 0 : i32
    %c0_i32_1 = arith.constant 0 : i32
    %c0_i32_2 = arith.constant 0 : i32
    return %arg0, %c0_i32, %c0_i32_0, %c0_i32_1 : i32, i32, i32, i32
  }
  func.func @transform_1(%arg0: i32, %arg1: i32, %arg2: i32) -> (i32, i32) {
    %c0_i32 = arith.constant 0 : i32
    %c0_i32_0 = arith.constant 0 : i32
    return %c0_i32, %arg1 : i32, i32
  }
  func.func @transform_2(%arg0: i32, %arg1: i32, %arg2: i32) -> (i32, i32) {
    %c0_i32 = arith.constant 0 : i32
    %c0_i32_0 = arith.constant 0 : i32
    return %c0_i32, %arg1 : i32, i32
  }
  func.func @transform_3(%arg0: i32, %arg1: i32, %arg2: i32) -> (i32, i32, i32) {
    %c0_i32 = arith.constant 0 : i32
    return %arg0, %arg2, %arg1 : i32, i32, i32
  }
}

module attributes {stable_mosaic.version = 11 : i64} {
  func.func @kernel(%arg0: i32, %arg1: i32, %arg2: i32, %arg3: memref<1x18x18x4xbf16, #tpu.memory_space<vmem>>, %arg4: memref<9x4x128xbf16, #tpu.memory_space<vmem>>, %arg5: memref<1x128xf32, #tpu.memory_space<vmem>>, %arg6: memref<1x256x128xf32, #tpu.memory_space<vmem>>, %arg7: memref<256x128xf32, #tpu.memory_space<vmem>>) attributes {dimension_semantics = [#tpu.dimension_semantics<parallel>, #tpu.dimension_semantics<parallel>, #tpu.dimension_semantics<parallel>], iteration_bounds = array<i64: 2, 1, 1>, scalar_prefetch = 0 : i64, scratch_operands = 1 : i64, tpu.core_type = #tpu.core_type<tc>, window_params = [{transform_indices = @transform_0, window_bounds = array<i64: 1, 18, 18, 4>}, {transform_indices = @transform_1, window_bounds = array<i64: 9, 4, 128>}, {transform_indices = @transform_2, window_bounds = array<i64: 1, 128>}, {transform_indices = @transform_3, window_bounds = array<i64: 1, 256, 128>}]} {
    %c16_i32 = arith.constant 16 : i32
    %0 = arith.muli %arg2, %c16_i32 : i32
    %c0 = arith.constant 0 : index
    %c0_0 = arith.constant 0 : index
    %1 = vector.load %arg5[%c0, %c0_0] : memref<1x128xf32, #tpu.memory_space<vmem>>, vector<1x128xf32>
    %2 = vector.shape_cast %1 : vector<1x128xf32> to vector<1x128xf32>
    %3 = vector.broadcast %2 : vector<1x128xf32> to vector<256x128xf32>
    %c0_1 = arith.constant 0 : index
    %c0_2 = arith.constant 0 : index
    %4 = vector.load %arg7[%c0_1, %c0_2] : memref<256x128xf32, #tpu.memory_space<vmem>>, vector<256x128xf32>
    tpu.vector_store %arg7[%c0_1, %c0_2], %3 {strides = array<i32>} : memref<256x128xf32, #tpu.memory_space<vmem>>, vector<256x128xf32>,
    %c0_i32 = arith.constant 0 : i32
    %5 = arith.addi %0, %c0_i32 : i32
    %c0_3 = arith.constant 0 : index
    %6 = arith.index_cast %5 : i32 to index
    %c0_4 = arith.constant 0 : index
    %c0_5 = arith.constant 0 : index
    %7 = vector.load %arg3[%c0_3, %6, %c0_4, %c0_5] : memref<1x18x18x4xbf16, #tpu.memory_space<vmem>>, vector<1x16x16x4xbf16>
    %8 = vector.shape_cast %7 : vector<1x16x16x4xbf16> to vector<16x16x4xbf16>
    %9 = vector.shape_cast %8 : vector<16x16x4xbf16> to vector<256x4xbf16>
    %c0_6 = arith.constant 0 : index
    %c0_7 = arith.constant 0 : index
    %10 = vector.load %arg7[%c0_6, %c0_7] : memref<256x128xf32, #tpu.memory_space<vmem>>, vector<256x128xf32>
    %c0_8 = arith.constant 0 : index
    %c0_9 = arith.constant 0 : index
    %c0_10 = arith.constant 0 : index
    %11 = vector.load %arg4[%c0_8, %c0_9, %c0_10] : memref<9x4x128xbf16, #tpu.memory_space<vmem>>, vector<1x4x128xbf16>
    %12 = vector.shape_cast %11 : vector<1x4x128xbf16> to vector<4x128xbf16>
    %cst = arith.constant dense<0.000000e+00> : vector<256x128xf32>
    %13 = tpu.matmul %9, %12, %cst {dimension_numbers = #tpu.dot_dimension_numbers<[1], [0], [0], [1], [0, 0, 1, 1], [], []>} : vector<256x4xbf16>, vector<4x128xbf16>, vector<256x128xf32> -> vector<256x128xf32>
    %14 = arith.addf %10, %13 : vector<256x128xf32>
    %c0_11 = arith.constant 0 : index
    %c0_12 = arith.constant 0 : index
    %15 = vector.load %arg7[%c0_11, %c0_12] : memref<256x128xf32, #tpu.memory_space<vmem>>, vector<256x128xf32>
    tpu.vector_store %arg7[%c0_11, %c0_12], %14 {strides = array<i32>} : memref<256x128xf32, #tpu.memory_space<vmem>>, vector<256x128xf32>,
    %c0_i32_13 = arith.constant 0 : i32
    %16 = arith.addi %0, %c0_i32_13 : i32
    %c0_14 = arith.constant 0 : index
    %17 = arith.index_cast %16 : i32 to index
    %c1 = arith.constant 1 : index
    %c0_15 = arith.constant 0 : index
    %18 = vector.load %arg3[%c0_14, %17, %c1, %c0_15] : memref<1x18x18x4xbf16, #tpu.memory_space<vmem>>, vector<1x16x16x4xbf16>
    %19 = vector.shape_cast %18 : vector<1x16x16x4xbf16> to vector<16x16x4xbf16>
    %20 = vector.shape_cast %19 : vector<16x16x4xbf16> to vector<256x4xbf16>
    %c0_16 = arith.constant 0 : index
    %c0_17 = arith.constant 0 : index
    %21 = vector.load %arg7[%c0_16, %c0_17] : memref<256x128xf32, #tpu.memory_space<vmem>>, vector<256x128xf32>
    %c1_18 = arith.constant 1 : index
    %c0_19 = arith.constant 0 : index
    %c0_20 = arith.constant 0 : index
    %22 = vector.load %arg4[%c1_18, %c0_19, %c0_20] : memref<9x4x128xbf16, #tpu.memory_space<vmem>>, vector<1x4x128xbf16>
    %23 = vector.shape_cast %22 : vector<1x4x128xbf16> to vector<4x128xbf16>
    %cst_21 = arith.constant dense<0.000000e+00> : vector<256x128xf32>
    %24 = tpu.matmul %20, %23, %cst_21 {dimension_numbers = #tpu.dot_dimension_numbers<[1], [0], [0], [1], [0, 0, 1, 1], [], []>} : vector<256x4xbf16>, vector<4x128xbf16>, vector<256x128xf32> -> vector<256x128xf32>
    %25 = arith.addf %21, %24 : vector<256x128xf32>
    %c0_22 = arith.constant 0 : index
    %c0_23 = arith.constant 0 : index
    %26 = vector.load %arg7[%c0_22, %c0_23] : memref<256x128xf32, #tpu.memory_space<vmem>>, vector<256x128xf32>
    tpu.vector_store %arg7[%c0_22, %c0_23], %25 {strides = array<i32>} : memref<256x128xf32, #tpu.memory_space<vmem>>, vector<256x128xf32>,
    %c0_i32_24 = arith.constant 0 : i32
    %27 = arith.addi %0, %c0_i32_24 : i32
    %c0_25 = arith.constant 0 : index
    %28 = arith.index_cast %27 : i32 to index
    %c2 = arith.constant 2 : index
    %c0_26 = arith.constant 0 : index
    %29 = vector.load %arg3[%c0_25, %28, %c2, %c0_26] : memref<1x18x18x4xbf16, #tpu.memory_space<vmem>>, vector<1x16x16x4xbf16>
    %30 = vector.shape_cast %29 : vector<1x16x16x4xbf16> to vector<16x16x4xbf16>
    %31 = vector.shape_cast %30 : vector<16x16x4xbf16> to vector<256x4xbf16>
    %c0_27 = arith.constant 0 : index
    %c0_28 = arith.constant 0 : index
    %32 = vector.load %arg7[%c0_27, %c0_28] : memref<256x128xf32, #tpu.memory_space<vmem>>, vector<256x128xf32>
    %c2_29 = arith.constant 2 : index
    %c0_30 = arith.constant 0 : index
    %c0_31 = arith.constant 0 : index
    %33 = vector.load %arg4[%c2_29, %c0_30, %c0_31] : memref<9x4x128xbf16, #tpu.memory_space<vmem>>, vector<1x4x128xbf16>
    %34 = vector.shape_cast %33 : vector<1x4x128xbf16> to vector<4x128xbf16>
    %cst_32 = arith.constant dense<0.000000e+00> : vector<256x128xf32>
    %35 = tpu.matmul %31, %34, %cst_32 {dimension_numbers = #tpu.dot_dimension_numbers<[1], [0], [0], [1], [0, 0, 1, 1], [], []>} : vector<256x4xbf16>, vector<4x128xbf16>, vector<256x128xf32> -> vector<256x128xf32>
    %36 = arith.addf %32, %35 : vector<256x128xf32>
    %c0_33 = arith.constant 0 : index
    %c0_34 = arith.constant 0 : index
    %37 = vector.load %arg7[%c0_33, %c0_34] : memref<256x128xf32, #tpu.memory_space<vmem>>, vector<256x128xf32>
    tpu.vector_store %arg7[%c0_33, %c0_34], %36 {strides = array<i32>} : memref<256x128xf32, #tpu.memory_space<vmem>>, vector<256x128xf32>,
    %c1_i32 = arith.constant 1 : i32
    %38 = arith.addi %0, %c1_i32 : i32
    %c0_35 = arith.constant 0 : index
    %39 = arith.index_cast %38 : i32 to index
    %c0_36 = arith.constant 0 : index
    %c0_37 = arith.constant 0 : index
    %40 = vector.load %arg3[%c0_35, %39, %c0_36, %c0_37] : memref<1x18x18x4xbf16, #tpu.memory_space<vmem>>, vector<1x16x16x4xbf16>
    %41 = vector.shape_cast %40 : vector<1x16x16x4xbf16> to vector<16x16x4xbf16>
    %42 = vector.shape_cast %41 : vector<16x16x4xbf16> to vector<256x4xbf16>
    %c0_38 = arith.constant 0 : index
    %c0_39 = arith.constant 0 : index
    %43 = vector.load %arg7[%c0_38, %c0_39] : memref<256x128xf32, #tpu.memory_space<vmem>>, vector<256x128xf32>
    %c3 = arith.constant 3 : index
    %c0_40 = arith.constant 0 : index
    %c0_41 = arith.constant 0 : index
    %44 = vector.load %arg4[%c3, %c0_40, %c0_41] : memref<9x4x128xbf16, #tpu.memory_space<vmem>>, vector<1x4x128xbf16>
    %45 = vector.shape_cast %44 : vector<1x4x128xbf16> to vector<4x128xbf16>
    %cst_42 = arith.constant dense<0.000000e+00> : vector<256x128xf32>
    %46 = tpu.matmul %42, %45, %cst_42 {dimension_numbers = #tpu.dot_dimension_numbers<[1], [0], [0], [1], [0, 0, 1, 1], [], []>} : vector<256x4xbf16>, vector<4x128xbf16>, vector<256x128xf32> -> vector<256x128xf32>
    %47 = arith.addf %43, %46 : vector<256x128xf32>
    %c0_43 = arith.constant 0 : index
    %c0_44 = arith.constant 0 : index
    %48 = vector.load %arg7[%c0_43, %c0_44] : memref<256x128xf32, #tpu.memory_space<vmem>>, vector<256x128xf32>
    tpu.vector_store %arg7[%c0_43, %c0_44], %47 {strides = array<i32>} : memref<256x128xf32, #tpu.memory_space<vmem>>, vector<256x128xf32>,
    %c1_i32_45 = arith.constant 1 : i32
    %49 = arith.addi %0, %c1_i32_45 : i32
    %c0_46 = arith.constant 0 : index
    %50 = arith.index_cast %49 : i32 to index
    %c1_47 = arith.constant 1 : index
    %c0_48 = arith.constant 0 : index
    %51 = vector.load %arg3[%c0_46, %50, %c1_47, %c0_48] : memref<1x18x18x4xbf16, #tpu.memory_space<vmem>>, vector<1x16x16x4xbf16>
    %52 = vector.shape_cast %51 : vector<1x16x16x4xbf16> to vector<16x16x4xbf16>
    %53 = vector.shape_cast %52 : vector<16x16x4xbf16> to vector<256x4xbf16>
    %c0_49 = arith.constant 0 : index
    %c0_50 = arith.constant 0 : index
    %54 = vector.load %arg7[%c0_49, %c0_50] : memref<256x128xf32, #tpu.memory_space<vmem>>, vector<256x128xf32>
    %c4 = arith.constant 4 : index
    %c0_51 = arith.constant 0 : index
    %c0_52 = arith.constant 0 : index
    %55 = vector.load %arg4[%c4, %c0_51, %c0_52] : memref<9x4x128xbf16, #tpu.memory_space<vmem>>, vector<1x4x128xbf16>
    %56 = vector.shape_cast %55 : vector<1x4x128xbf16> to vector<4x128xbf16>
    %cst_53 = arith.constant dense<0.000000e+00> : vector<256x128xf32>
    %57 = tpu.matmul %53, %56, %cst_53 {dimension_numbers = #tpu.dot_dimension_numbers<[1], [0], [0], [1], [0, 0, 1, 1], [], []>} : vector<256x4xbf16>, vector<4x128xbf16>, vector<256x128xf32> -> vector<256x128xf32>
    %58 = arith.addf %54, %57 : vector<256x128xf32>
    %c0_54 = arith.constant 0 : index
    %c0_55 = arith.constant 0 : index
    %59 = vector.load %arg7[%c0_54, %c0_55] : memref<256x128xf32, #tpu.memory_space<vmem>>, vector<256x128xf32>
    tpu.vector_store %arg7[%c0_54, %c0_55], %58 {strides = array<i32>} : memref<256x128xf32, #tpu.memory_space<vmem>>, vector<256x128xf32>,
    %c1_i32_56 = arith.constant 1 : i32
    %60 = arith.addi %0, %c1_i32_56 : i32
    %c0_57 = arith.constant 0 : index
    %61 = arith.index_cast %60 : i32 to index
    %c2_58 = arith.constant 2 : index
    %c0_59 = arith.constant 0 : index
    %62 = vector.load %arg3[%c0_57, %61, %c2_58, %c0_59] : memref<1x18x18x4xbf16, #tpu.memory_space<vmem>>, vector<1x16x16x4xbf16>
    %63 = vector.shape_cast %62 : vector<1x16x16x4xbf16> to vector<16x16x4xbf16>
    %64 = vector.shape_cast %63 : vector<16x16x4xbf16> to vector<256x4xbf16>
    %c0_60 = arith.constant 0 : index
    %c0_61 = arith.constant 0 : index
    %65 = vector.load %arg7[%c0_60, %c0_61] : memref<256x128xf32, #tpu.memory_space<vmem>>, vector<256x128xf32>
    %c5 = arith.constant 5 : index
    %c0_62 = arith.constant 0 : index
    %c0_63 = arith.constant 0 : index
    %66 = vector.load %arg4[%c5, %c0_62, %c0_63] : memref<9x4x128xbf16, #tpu.memory_space<vmem>>, vector<1x4x128xbf16>
    %67 = vector.shape_cast %66 : vector<1x4x128xbf16> to vector<4x128xbf16>
    %cst_64 = arith.constant dense<0.000000e+00> : vector<256x128xf32>
    %68 = tpu.matmul %64, %67, %cst_64 {dimension_numbers = #tpu.dot_dimension_numbers<[1], [0], [0], [1], [0, 0, 1, 1], [], []>} : vector<256x4xbf16>, vector<4x128xbf16>, vector<256x128xf32> -> vector<256x128xf32>
    %69 = arith.addf %65, %68 : vector<256x128xf32>
    %c0_65 = arith.constant 0 : index
    %c0_66 = arith.constant 0 : index
    %70 = vector.load %arg7[%c0_65, %c0_66] : memref<256x128xf32, #tpu.memory_space<vmem>>, vector<256x128xf32>
    tpu.vector_store %arg7[%c0_65, %c0_66], %69 {strides = array<i32>} : memref<256x128xf32, #tpu.memory_space<vmem>>, vector<256x128xf32>,
    %c2_i32 = arith.constant 2 : i32
    %71 = arith.addi %0, %c2_i32 : i32
    %c0_67 = arith.constant 0 : index
    %72 = arith.index_cast %71 : i32 to index
    %c0_68 = arith.constant 0 : index
    %c0_69 = arith.constant 0 : index
    %73 = vector.load %arg3[%c0_67, %72, %c0_68, %c0_69] : memref<1x18x18x4xbf16, #tpu.memory_space<vmem>>, vector<1x16x16x4xbf16>
    %74 = vector.shape_cast %73 : vector<1x16x16x4xbf16> to vector<16x16x4xbf16>
    %75 = vector.shape_cast %74 : vector<16x16x4xbf16> to vector<256x4xbf16>
    %c0_70 = arith.constant 0 : index
    %c0_71 = arith.constant 0 : index
    %76 = vector.load %arg7[%c0_70, %c0_71] : memref<256x128xf32, #tpu.memory_space<vmem>>, vector<256x128xf32>
    %c6 = arith.constant 6 : index
    %c0_72 = arith.constant 0 : index
    %c0_73 = arith.constant 0 : index
    %77 = vector.load %arg4[%c6, %c0_72, %c0_73] : memref<9x4x128xbf16, #tpu.memory_space<vmem>>, vector<1x4x128xbf16>
    %78 = vector.shape_cast %77 : vector<1x4x128xbf16> to vector<4x128xbf16>
    %cst_74 = arith.constant dense<0.000000e+00> : vector<256x128xf32>
    %79 = tpu.matmul %75, %78, %cst_74 {dimension_numbers = #tpu.dot_dimension_numbers<[1], [0], [0], [1], [0, 0, 1, 1], [], []>} : vector<256x4xbf16>, vector<4x128xbf16>, vector<256x128xf32> -> vector<256x128xf32>
    %80 = arith.addf %76, %79 : vector<256x128xf32>
    %c0_75 = arith.constant 0 : index
    %c0_76 = arith.constant 0 : index
    %81 = vector.load %arg7[%c0_75, %c0_76] : memref<256x128xf32, #tpu.memory_space<vmem>>, vector<256x128xf32>
    tpu.vector_store %arg7[%c0_75, %c0_76], %80 {strides = array<i32>} : memref<256x128xf32, #tpu.memory_space<vmem>>, vector<256x128xf32>,
    %c2_i32_77 = arith.constant 2 : i32
    %82 = arith.addi %0, %c2_i32_77 : i32
    %c0_78 = arith.constant 0 : index
    %83 = arith.index_cast %82 : i32 to index
    %c1_79 = arith.constant 1 : index
    %c0_80 = arith.constant 0 : index
    %84 = vector.load %arg3[%c0_78, %83, %c1_79, %c0_80] : memref<1x18x18x4xbf16, #tpu.memory_space<vmem>>, vector<1x16x16x4xbf16>
    %85 = vector.shape_cast %84 : vector<1x16x16x4xbf16> to vector<16x16x4xbf16>
    %86 = vector.shape_cast %85 : vector<16x16x4xbf16> to vector<256x4xbf16>
    %c0_81 = arith.constant 0 : index
    %c0_82 = arith.constant 0 : index
    %87 = vector.load %arg7[%c0_81, %c0_82] : memref<256x128xf32, #tpu.memory_space<vmem>>, vector<256x128xf32>
    %c7 = arith.constant 7 : index
    %c0_83 = arith.constant 0 : index
    %c0_84 = arith.constant 0 : index
    %88 = vector.load %arg4[%c7, %c0_83, %c0_84] : memref<9x4x128xbf16, #tpu.memory_space<vmem>>, vector<1x4x128xbf16>
    %89 = vector.shape_cast %88 : vector<1x4x128xbf16> to vector<4x128xbf16>
    %cst_85 = arith.constant dense<0.000000e+00> : vector<256x128xf32>
    %90 = tpu.matmul %86, %89, %cst_85 {dimension_numbers = #tpu.dot_dimension_numbers<[1], [0], [0], [1], [0, 0, 1, 1], [], []>} : vector<256x4xbf16>, vector<4x128xbf16>, vector<256x128xf32> -> vector<256x128xf32>
    %91 = arith.addf %87, %90 : vector<256x128xf32>
    %c0_86 = arith.constant 0 : index
    %c0_87 = arith.constant 0 : index
    %92 = vector.load %arg7[%c0_86, %c0_87] : memref<256x128xf32, #tpu.memory_space<vmem>>, vector<256x128xf32>
    tpu.vector_store %arg7[%c0_86, %c0_87], %91 {strides = array<i32>} : memref<256x128xf32, #tpu.memory_space<vmem>>, vector<256x128xf32>,
    %c2_i32_88 = arith.constant 2 : i32
    %93 = arith.addi %0, %c2_i32_88 : i32
    %c0_89 = arith.constant 0 : index
    %94 = arith.index_cast %93 : i32 to index
    %c2_90 = arith.constant 2 : index
    %c0_91 = arith.constant 0 : index
    %95 = vector.load %arg3[%c0_89, %94, %c2_90, %c0_91] : memref<1x18x18x4xbf16, #tpu.memory_space<vmem>>, vector<1x16x16x4xbf16>
    %96 = vector.shape_cast %95 : vector<1x16x16x4xbf16> to vector<16x16x4xbf16>
    %97 = vector.shape_cast %96 : vector<16x16x4xbf16> to vector<256x4xbf16>
    %c0_92 = arith.constant 0 : index
    %c0_93 = arith.constant 0 : index
    %98 = vector.load %arg7[%c0_92, %c0_93] : memref<256x128xf32, #tpu.memory_space<vmem>>, vector<256x128xf32>
    %c8 = arith.constant 8 : index
    %c0_94 = arith.constant 0 : index
    %c0_95 = arith.constant 0 : index
    %99 = vector.load %arg4[%c8, %c0_94, %c0_95] : memref<9x4x128xbf16, #tpu.memory_space<vmem>>, vector<1x4x128xbf16>
    %100 = vector.shape_cast %99 : vector<1x4x128xbf16> to vector<4x128xbf16>
    %cst_96 = arith.constant dense<0.000000e+00> : vector<256x128xf32>
    %101 = tpu.matmul %97, %100, %cst_96 {dimension_numbers = #tpu.dot_dimension_numbers<[1], [0], [0], [1], [0, 0, 1, 1], [], []>} : vector<256x4xbf16>, vector<4x128xbf16>, vector<256x128xf32> -> vector<256x128xf32>
    %102 = arith.addf %98, %101 : vector<256x128xf32>
    %c0_97 = arith.constant 0 : index
    %c0_98 = arith.constant 0 : index
    %103 = vector.load %arg7[%c0_97, %c0_98] : memref<256x128xf32, #tpu.memory_space<vmem>>, vector<256x128xf32>
    tpu.vector_store %arg7[%c0_97, %c0_98], %102 {strides = array<i32>} : memref<256x128xf32, #tpu.memory_space<vmem>>, vector<256x128xf32>,
    %c0_99 = arith.constant 0 : index
    %c0_100 = arith.constant 0 : index
    %104 = vector.load %arg7[%c0_99, %c0_100] : memref<256x128xf32, #tpu.memory_space<vmem>>, vector<256x128xf32>
    %c0_101 = arith.constant 0 : index
    %c0_102 = arith.constant 0 : index
    %c0_103 = arith.constant 0 : index
    %105 = vector.load %arg6[%c0_101, %c0_102, %c0_103] : memref<1x256x128xf32, #tpu.memory_space<vmem>>, vector<1x256x128xf32>
    %106 = vector.shape_cast %105 : vector<1x256x128xf32> to vector<256x128xf32>
    %107 = vector.shape_cast %104 : vector<256x128xf32> to vector<1x256x128xf32>
    tpu.vector_store %arg6[%c0_101, %c0_102, %c0_103], %107 {strides = array<i32>} : memref<1x256x128xf32, #tpu.memory_space<vmem>>, vector<1x256x128xf32>,
    return
  }
  func.func @transform_0(%arg0: i32, %arg1: i32, %arg2: i32) -> (i32, i32, i32, i32) {
    %c0_i32 = arith.constant 0 : i32
    %c0_i32_0 = arith.constant 0 : i32
    %c0_i32_1 = arith.constant 0 : i32
    %c0_i32_2 = arith.constant 0 : i32
    return %arg0, %c0_i32, %c0_i32_0, %c0_i32_1 : i32, i32, i32, i32
  }
  func.func @transform_1(%arg0: i32, %arg1: i32, %arg2: i32) -> (i32, i32, i32) {
    %c0_i32 = arith.constant 0 : i32
    %c0_i32_0 = arith.constant 0 : i32
    %c0_i32_1 = arith.constant 0 : i32
    return %c0_i32, %c0_i32_0, %arg1 : i32, i32, i32
  }
  func.func @transform_2(%arg0: i32, %arg1: i32, %arg2: i32) -> (i32, i32) {
    %c0_i32 = arith.constant 0 : i32
    %c0_i32_0 = arith.constant 0 : i32
    return %c0_i32, %arg1 : i32, i32
  }
  func.func @transform_3(%arg0: i32, %arg1: i32, %arg2: i32) -> (i32, i32, i32) {
    %c0_i32 = arith.constant 0 : i32
    return %arg0, %arg2, %arg1 : i32, i32, i32
  }
}

</mosaic_0001>

<bundles_post_ra>
// kernel: fn.1
= control target key start
LH: loop header
LB: loop body
LE: loop exit
PB: predicated region body
PF: predicated region fallthrough
CT: control target
= control target key end

     0   :  { %8 = vsyncpa [#allocation3], 0  ;;  %s4980_s0 = inlined_call_operand.hbm [shape: bf16[2,18,18,4], index: 0, kind: input, shape index: {}]   ;;  %s4981_s1 = inlined_call_operand.hbm [shape: bf16[36,128], index: 1, kind: input, shape index: {}]   ;;  %s4982_s2 = inlined_call_operand.hbm [shape: f32[1,128], index: 2, kind: input, shape index: {}]   ;;  %s4983_s3 = inlined_call_operand.hbm [shape: f32[2,256,128], index: 3, kind: output, shape index: {}]  }
   0x1   :  { %10 = vsyncpa [#allocation3 + $0x1], 0 }
   0x2   :  { %11 = vsyncpa [#allocation6], 0 }
   0x3   :  { %12 = vsyncpa [#allocation4], 0 }
   0x4   :  { %14 = vsyncpa [#allocation4 + $0x1], 0  ;;  %s3451_s12 = smov 0   ;;  %s3453_s13 = smov 0  }
   0x5   :  { %s3455_s14 = smov 0   ;;  %s3457_s15 = smov 0  }
   0x6   :  { %s3459_s16 = smov 0   ;;  %s3461_s17 = smov 0  }
   0x7 LB: > { %s2624_s18 = sadd.s32 4294967295, %s3414_s17   ;;  %s2625_s19 = sadd.s32 4294967294, %s3414_s17   ;;  %s3414_s17 = sphi %s3461_s17, %s20_s17   ;;  %s3410_s16 = sphi %s3459_s16, %s5023_s16   ;;  %s3406_s15 = sphi %s3457_s15, %s5022_s15   ;;  %s3402_s14 = sphi %s3455_s14, %s5021_s14   ;;  %s3398_s13 = sphi %s3453_s13, %s5020_s13   ;;  %s3394_s12 = sphi %s3451_s12, %s5019_s12  }
   0x8   : > { %p59_p0 = scmp.ne.s32.totalorder %s3398_s13, %s3394_s12  ;;  %p3485_p1 = scmp.eq.s32.totalorder %s2624_s18, 0 }
   0x9   : > { %p3489_p2 = scmp.eq.s32.totalorder %s2624_s18, 1  ;;  %p145_p3 = scmp.eq.s32.totalorder %s2625_s19, 1 }
   0xa   : > { %s4994_s20 = scalar_select %p3485_p1, 1, 0 }
   0xb   : > { %p3495_p4 = por %p3485_p1, %p59_p0  ;;  %p2626_p5 = scmp.ge.s32.totalorder %s3414_s17, 1 }
   0xc   : > { %p3500_p6 = por %p145_p3, %p59_p0  ;;  %p152_p7 = scmp.lt.s32.totalorder %s3414_s17, 3 }
   0xd   : > { %s4996_s22 = scalar_select %p3495_p4, 1, 0 }
   0xe   : > { %s4997_s23 = scalar_select %p3500_p6, 1, 0 }
   0xf   : > { %p3505_p8 = pnand %p2626_p5, %p152_p7  ;;  %s3416_s25 = smov [#allocation5]  }
  0x10   : > { %s166_s26 = sshll.u32 %s3416_s25, 4  ;;  %s3417_s28 = smov [#allocation7]   ;;  %s3509_s26 = int_to_ptr.vmem [resolvable:$true] %s166_s26 }
  0x11   : > { %p3013_p9 = pneg %p3505_p8  ;;  %s182_s29 = sshll.u32 %s3417_s28, 4  ;;  %s3520_s29 = int_to_ptr.vmem [resolvable:$true] %s182_s29 }
  0x12   : > { %s3242_s5 = scalar_lea.hbm %s4981_s1, 320 }
  0x13   : > { %p3516_p11 = pnand %p3013_p9, %p3485_p1  ;;  %p3243_p12 = scmp.ne.s32.totalorder %s4981_s1, %s3242_s5 }
  0x14   : > { %p3249_p5 = scmp.lt.u32.totalorder %s3242_s5, %s4981_s1 }
  0x15   : > { %p3244_p13 = pneg %p3516_p11 }
  0x17   : > { %p3245_p0 = pnand %p3244_p13, %p3243_p12 }
  0x19   : > { %p3246_p3 = pneg %p3245_p0 }
  0x1b   : > { %p3251_p7 = pnand %p3249_p5, %p3246_p3 }
  0x1d   : > { %3254 = shalt.err (!%p3251_p7)
}
  0x1e   : > { %s3255_s10 = scalar_lea.vmem %s3509_s26, 320  ;;  %p3263_p1 = scmp.lt.s32.totalorder %s3509_s26, %s3509_s26 }
  0x1f   : > { %p3256_p9 = scmp.ne.s32.totalorder %s3509_s26, %s3255_s10  ;;  %p3264_p12 = scmp.lt.s32.totalorder %s3255_s10, %s3255_s10 }
  0x21   : > { %p3258_p10 = pnand %p3256_p9, %p3244_p13  ;;  %p3265_p0 = por %p3264_p12, %p3263_p1 }
  0x23   : > { %p3259_p6 = pneg %p3258_p10 }
  0x25   : > { %p3266_p4 = pnand %p3265_p0, %p3259_p6 }
  0x27   : > { %3269 = shalt.err (!%p3266_p4)
}
  0x28   : > { %s3418_s11 = smov 64   ;;  %s3419_s18 = smov 4  }
  0x29   : > { %3016 = dma.hbm_to_vmem [thread:$0]  (!%p3516_p11), %s4981_s1, 320, %s3509_s26, [#allocation6], %s3418_s11, %s3418_s11, %s3419_s18  }
  0x2a   : > { %s3270_s4 = scalar_lea.hbm %s4982_s2, 16 }
  0x2b   : > { %p3271_p1 = scmp.ne.s32.totalorder %s4982_s2, %s3270_s4  ;;  %p3277_p10 = scmp.lt.u32.totalorder %s3270_s4, %s4982_s2 }
  0x2d   : > { %p3273_p4 = pnand %p3271_p1, %p3244_p13 }
  0x2f   : > { %p3274_p6 = pneg %p3273_p4 }
  0x31   : > { %p3279_p3 = pnand %p3277_p10, %p3274_p6 }
  0x33   : > { %3282 = shalt.err (!%p3279_p3)
}
  0x34   : > { %s3283_s26 = scalar_lea.vmem %s3520_s29, 16  ;;  %s3290_s9 = scalar_lea.vmem %s3520_s29, 32 }
  0x35   : > { %p3284_p5 = scmp.ne.s32.totalorder %s3520_s29, %s3283_s26  ;;  %p3291_p12 = scmp.lt.s32.totalorder %s3520_s29, %s3520_s29 }
  0x36   : > { %p3292_p0 = scmp.lt.s32.totalorder %s3290_s9, %s3283_s26 }
  0x37   : > { %p3286_p7 = pnand %p3284_p5, %p3244_p13 }
  0x38   : > { %p3293_p1 = por %p3292_p0, %p3291_p12 }
  0x39   : > { %p3287_p9 = pneg %p3286_p7 }
  0x3b   : > { %p3294_p4 = pnand %p3293_p1, %p3287_p9 }
  0x3d   : > { %3297 = shalt.err (!%p3294_p4)
}
  0x3e   : > { %3019 = dma.hbm_to_vmem [thread:$0]  (!%p3516_p11), %s4982_s2, 16, %s3520_s29, [#allocation6]  }
  0x3f   : > { %s39_s25 = sadd.s32 1, %s3410_s16  ;;  %s46_s28 = sadd.s32 1, %s3402_s14 }
  0x40   : > { %p41_p13 = scmp.ge.s32.totalorder %s39_s25, 2  ;;  %p53_p6 = scmp.ne.s32.totalorder %s3402_s14, %s3398_s13 }
  0x41   : > { %p54_p10 = scmp.eq.s32.totalorder %s3414_s17, 0  ;;  %p3030_p3 = scmp.lt.s32.totalorder %s3414_s17, 2 }
  0x42   : > { %s5025_s25 = smov (%p41_p13, %s39_s25), 0  ;;  %p3588_p7 = por %p3489_p2, %p53_p6 }
  0x43   : > { %p55_p5 = por %p54_p10, %p53_p6  ;;  %s43_s30 = ssub.s32 %s3410_s16, %s5025_s25 }
  0x44   : > { %s5000_s27 = scalar_select %p3588_p7, 1, 0 }
  0x45   : > { %s193_s4 = sand.u32 1, %s3402_s14   ;;  %p44_p9 = scmp.eq.s32.totalorder %s43_s30, 0 }
  0x46   : > { %s2998_s29 = smul.u32 216, %s193_s4  ;;  %p3595_p11 = pnand %p3030_p3, %p55_p5 }
  0x47   : > { %s3600_s6 = scalar_select %p44_p9, %s3402_s14, %s46_s28  }
  0x48   : > { %s2999_s7 = smul.u32 3456, %s3410_s16  ;;  %s197_s8 = scalar_lea.vmem [#allocation2], %s2998_s29 }
  0x49   : > { %s204_s26 = sshll.u32 %s197_s8, 4  ;;  %s3610_s19 = scalar_lea.sflag [#allocation3], %s193_s4  ;;  %s3608_s26 = int_to_ptr.vmem [resolvable:$true] %s204_s26 }
  0x4a   : > { %s3606_s10 = scalar_lea.hbm %s4980_s0, %s2999_s7  ;;  %p3300_p12 = pneg %p3595_p11 }
  0x4b   : > { %s3298_s30 = scalar_lea.hbm %s3606_s10, 3456  ;;  %s3303_s7 = scalar_lea.hbm %s4980_s0, 6912 }
  0x4c   : > { %p3299_p2 = scmp.ne.s32.totalorder %s3606_s10, %s3298_s30  ;;  %p3304_p4 = scmp.lt.u32.totalorder %s3606_s10, %s4980_s0 }
  0x4d   : > { %p3305_p13 = scmp.lt.u32.totalorder %s3303_s7, %s3298_s30  ;;  %p3307_p10 = scmp.lt.u32.totalorder %s3298_s30, %s3606_s10 }
  0x4e   : > { %p3301_p0 = pnand %p3300_p12, %p3299_p2 }
  0x4f   : > { %p3306_p6 = por %p3305_p13, %p3304_p4 }
  0x50   : > { %p3302_p1 = pneg %p3301_p0 }
  0x51   : > { %p3308_p3 = por %p3307_p10, %p3306_p6 }
  0x53   : > { %p3309_p5 = pnand %p3308_p3, %p3302_p1 }
  0x55   : > { %3312 = shalt.err (!%p3309_p5)
}
  0x56   : > { %s3313_s4 = scalar_lea.vmem %s3608_s26, 3456  ;;  %s3420_s9 = smov [#allocation2]  }
  0x57   : > { %p3314_p9 = scmp.ne.s32.totalorder %s3608_s26, %s3313_s4  ;;  %s3318_s28 = sshll.u32 %s3420_s9, 4  ;;  %s3319_s28 = int_to_ptr.vmem [resolvable:$false] %s3318_s28 }
  0x58   : > { %s3320_s29 = scalar_lea.vmem %s3319_s28, 6912  ;;  %p3321_p7 = scmp.lt.s32.totalorder %s3608_s26, %s3319_s28 }
  0x59   : > { %p3316_p2 = pnand %p3314_p9, %p3300_p12  ;;  %p3322_p4 = scmp.lt.s32.totalorder %s3320_s29, %s3313_s4 }
  0x5b   : > { %p3317_p0 = pneg %p3316_p2  ;;  %p3323_p13 = por %p3322_p4, %p3321_p7 }
  0x5d   : > { %p3324_p6 = pnand %p3323_p13, %p3317_p0 }
  0x5f   : > { %3327 = shalt.err (!%p3324_p6)
}
  0x60   : > { %3023 = dma.hbm_to_vmem [thread:$0]  (!%p3595_p11), %s3606_s10, 3456, %s3608_s26, %s3610_s19, %s3418_s11, %s3418_s11, %s3419_s18  }
  0x61   : > { %216 = sbr.rel (%p3505_p8) target bundleno = 719 (0x2cf), region = 32 }
  0x68   : > { %s3644_s30 = sand.u32 1, %s3398_s13   ;;  %p5002_p7 = scmp.ne.s32.totalorder %s4996_s22, 0 }
  0x69   : > { %s3000_s7 = smul.u32 216, %s3644_s30  ;;  %s219_s8 = scalar_lea.sflag [#allocation3], %s3644_s30 }
  0x6b   : > { %s3648_s21 = scalar_lea.vmem [#allocation2], %s3000_s7 }
  0x6c   : > { %3381 = dma.done.wait (%p5002_p7), %s219_s8, 3456  }
  0x6d   : > { %3383 = vsyncadd (%p5002_p7), %s219_s8, 4294963840  ;;  %p5003_p11 = scmp.ne.s32.totalorder %s4994_s20, 0 }
  0x6f   : > { %3385 = dma.done.wait (%p5003_p11), [#allocation6], 336  }
  0x70   : > { %3387 = vsyncadd (%p5003_p11), [#allocation6], 4294966960  ;;  %v2651_v0 = vld [vmem:[%s3648_s21 + $0x6c] sm:$0xf]  ;;  %v3660_v1 = vld [vmem:[%s3648_s21 + $0x70] sm:$0xf] }
  0x71   : > { %v3663_v2 = vcombine.low %v2651_v0, %v3660_v1  ;;  %v2635_v3 = vld [vmem:[%s3648_s21 + $0xc] sm:$0xf]  ;;  %v3667_v4 = vld [vmem:[%s3648_s21 + $0x10] sm:$0xf]  ;;  %v276_v6 = vld [vmem:[%s3648_s21 + $0x64] sm:$0xf] }
  0x72   : > { %v3670_v5 = vcombine.low %v2635_v3, %v3667_v4  ;;  %v315_v7 = vld [vmem:[%s3648_s21 + $0x60] sm:$0xe]  ;;  %s3421_s20 = smov 12   ;;  %v3677_v8 = vld [vmem:[%s3648_s21 + $0x68] ss:$0 sps:$4 sm:$0x11]  }
  0x73   : > { %1037 = vrot.lane.b32.xlu1 %v3663_v2, %s3421_s20  ;;  %v2803_v9 = vcombine.low %v315_v7, %v276_v6  ;;  %vm860_vm0 = vcmask 1046528   ;;  %v275_v10 = vld [vmem:[%s3648_s21 + $0x60] sm:$0xf]  ;;  %v1200_v11 = vshll.u32 %v3663_v2, 16  ;;  %v260_v12 = vld [vmem:[%s3648_s21 + $0x4] sm:$0xf] }
  0x74   : > { %1021 = vrot.lane.b32.xlu0 %v3670_v5, %s3421_s20  ;;  %v886_v14 = vrot.slane %v3677_v8, 1  ;;  %v307_v15 = vld [vmem:[%s3648_s21] sm:$0xe]  ;;  %v1104_v17 = vshll.u32 %v3670_v5, 16  ;;  %v3688_v18 = vcombine.low %v275_v10, %v276_v6  ;;  %v277_v21 = vld [vmem:[%s3648_s21 + $0x6c] sm:$0xf] }
  0x75   : > { %v885_v13 = vrot.slane %v2803_v9, 1  ;;  %v259_v16 = vld [vmem:[%s3648_s21] sm:$0xf]  ;;  %v3102_v19 = vld [vmem:[%s3648_s21 + $0x8] ss:$0 sps:$4 sm:$0x11]   ;;  %v2795_v20 = vcombine.low %v307_v15, %v260_v12 }
  0x76   : > { %vm587_vm1 = vsmask.f32 7424  ;;  %v3693_v23 = vcombine.low %v259_v16, %v260_v12  ;;  %v278_v24 = vld [vmem:[%s3648_s21 + $0x70] sm:$0xf]  ;;  %v316_v25 = vld [vmem:[%s3648_s21 + $0x6c] sm:$0xe] }
  0x77   : > { %v887_v22 = vsel %vm860_vm0, %v885_v13, %v886_v14  ;;  %s3422_s22 = smov 8   ;;  %v861_v26 = vrot.slane %v2795_v20, 1  ;;  %v862_v27 = vrot.slane %v3102_v19, 1  ;;  %v3106_v28 = vld [vmem:[%s3648_s21 + $0x74] ss:$0 sps:$4 sm:$0x11]   ;;  %v2804_v29 = vcombine.low %v316_v25, %v278_v24 }
  0x78   : > { %925 = vrot.lane.b32.xlu1 %v887_v22, %s3422_s22  ;;  %v685_v30 = vshrl.u32 %v3688_v18, 16  ;;  %v3700_v31 = vcombine.low %v277_v21, %v278_v24  ;;  %v261_v32 = vld [vmem:[%s3648_s21 + $0xc] sm:$0xf]  ;;  %v262_v33 = vld [vmem:[%s3648_s21 + $0x10] sm:$0xf]  ;;  %v889_v36 = vrot.slane %v3106_v28, 1 }
  0x79   : > { %v863_v34 = vsel %vm860_vm0, %v861_v26, %v862_v27  ;;  %v888_v35 = vrot.slane %v2804_v29, 1  ;;  %v308_v37 = vld [vmem:[%s3648_s21 + $0xc] sm:$0xe]  ;;  %v3706_v38 = vcombine.low %v261_v32, %v262_v33  ;;  %v3109_v39 = vld [vmem:[%s3648_s21 + $0x14] ss:$0 sps:$4 sm:$0x11]  }
  0x7a   : > { %909 = vrot.lane.b32.xlu0 %v863_v34, %s3422_s22  ;;  %v2796_v40 = vcombine.low %v308_v37, %v262_v33  ;;  %v589_v41 = vshrl.u32 %v3693_v23, 16  ;;  %v591_v42 = vshll.u32 %v3693_v23, 16  ;;  %v596_v43 = vshll.u32 %v3102_v19, 16  ;;  %v2653_v52 = vld [vmem:[%s3648_s21 + $0x78] sm:$0xf]  ;;  %s3423_s24 = smov 4  }
  0x7b   : > { %v890_v44 = vsel %vm860_vm0, %v888_v35, %v889_v36  ;;  %v601_v45 = vshrl.u32 %v3706_v38, 16  ;;  %v603_v46 = vshll.u32 %v3706_v38, 16  ;;  %v697_v47 = vshrl.u32 %v3700_v31, 16  ;;  %v3720_v57 = vld [vmem:[%s3648_s21 + $0x7c] sm:$0xf]  ;;  %s3424_s11 = smov 16  }
  0x7c   : > { %927 = vrot.lane.b32.xlu1 %v890_v44, %s3422_s22  ;;  %v864_v48 = vrot.slane %v2796_v40, 1  ;;  %v865_v49 = vrot.slane %v3109_v39, 1  ;;  %v608_v50 = vshll.u32 %v3109_v39, 16  ;;  %v593_v51 = vrot.slane %v591_v42, 1  ;;  %v2637_v62 = vld [vmem:[%s3648_s21 + $0x18] sm:$0xf] }
  0x7d   : > { %v605_v53 = vrot.slane %v603_v46, 1  ;;  %v598_v54 = vrot.slane %v596_v43, 1  ;;  %v699_v55 = vshll.u32 %v3700_v31, 16  ;;  %v704_v56 = vshll.u32 %v3106_v28, 16  ;;  %v3726_v63 = vld [vmem:[%s3648_s21 + $0x1c] sm:$0xf] }
  0x7e   : > { %v866_v58 = vsel %vm860_vm0, %v864_v48, %v865_v49  ;;  %v610_v59 = vrot.slane %v608_v50, 1  ;;  %v594_v60 = vor.u32 %v593_v51, %v589_v41  ;;  %v687_v61 = vshll.u32 %v3688_v18, 16  ;;  %v3733_v13 = vld [vmem:[%s3648_s21 + $0x74] ss:$0 sps:$4 sm:$0x11]   ;;  %s3425_s18 = smov 20  }
  0x7f   : > { %911 = vrot.lane.b32.xlu0 %v866_v58, %s3422_s22  ;;  %v606_v0 = vor.u32 %v605_v53, %v601_v45  ;;  %v701_v3 = vrot.slane %v699_v55, 1  ;;  %v706_v6 = vrot.slane %v704_v56, 1  ;;  %v692_v7 = vshll.u32 %v3677_v8, 16  ;;  %v3738_v20 = vld [vmem:[%s3648_s21 + $0x14] ss:$0 sps:$4 sm:$0x11]  }
  0x80   : > { %v599_v9 = vsel %vm587_vm1, %v594_v60, %v598_v54  ;;  %v689_v10 = vrot.slane %v687_v61, 1  ;;  %v2820_v12 = vcombine.low %v2653_v52, %v3720_v57  ;;  %v2812_v19 = vcombine.low %v2637_v62, %v3726_v63  ;;  %v3745_v24 = vld [vmem:[%s3648_s21 + $0x80] ss:$0 sps:$4 sm:$0x11]   ;;  %v2691_v40 = vld [vmem:[%s3648_s21 + $0x6c] sm:$0xe] }
  0x81   : > { %v611_v14 = vsel %vm587_vm1, %v606_v0, %v610_v59  ;;  %v702_v15 = vor.u32 %v701_v3, %v697_v47  ;;  %v694_v16 = vrot.slane %v692_v7, 1  ;;  %v1198_v21 = vshrl.u32 %v3663_v2, 16  ;;  %v2683_v43 = vld [vmem:[%s3648_s21 + $0xc] sm:$0xe]  ;;  %v2692_v49 = vld [vmem:[%s3648_s21 + $0x78] sm:$0xe] }
  0x82   : > { %782 = vrot.lane.b32.xlu1 %v611_v14, %s3423_s24  ;;  %v690_v8 = vor.u32 %v689_v10, %v685_v30  ;;  %v1202_v22 = vrot.slane %v1200_v11, 1  ;;  %v1212_v26 = vshll.u32 %v2820_v12, 16  ;;  %v1205_v27 = vshll.u32 %v3733_v13, 16  ;;  %v3756_v11 = vld [vmem:[%s3648_s21 + $0x20] ss:$0 sps:$4 sm:$0x11]  }
  0x83   : > { %780 = vrot.lane.b32.xlu0 %v599_v9, %s3423_s24  ;;  %v707_v25 = vsel %vm587_vm1, %v702_v15, %v706_v6  ;;  %v1102_v28 = vshrl.u32 %v3670_v5, 16  ;;  %v1116_v30 = vshll.u32 %v2812_v19, 16  ;;  %v1106_v32 = vrot.slane %v1104_v17, 1  ;;  %v2684_v53 = vld [vmem:[%s3648_s21 + $0x18] sm:$0xe]  ;;  %s3426_s5 = smov 24  }
  0x84   : > { %v695_v29 = vsel %vm587_vm1, %v690_v8, %v694_v16  ;;  %v1109_v2 = vshll.u32 %v3738_v20, 16  ;;  %v1203_v33 = vor.u32 %v1202_v22, %v1198_v21  ;;  %v1207_v34 = vrot.slane %v1205_v27, 1  ;;  %v2715_v54 = vld [vmem:[%s3648_s21 + $0x78] sm:$0xf]  ;;  %v3783_v60 = vld [vmem:[%s3648_s21 + $0x1c] sm:$0xf] }
  0x85   : > { %v1107_v35 = vor.u32 %v1106_v32, %v1102_v28  ;;  %v1210_v36 = vshrl.u32 %v2820_v12, 16  ;;  %v1214_v37 = vrot.slane %v1212_v26, 1  ;;  %v1217_v39 = vshll.u32 %v3745_v24, 16  ;;  %v2699_v55 = vld [vmem:[%s3648_s21 + $0x18] sm:$0xf]  ;;  %s3427_s26 = smov 28  }
  0x86   : > { %798 = vrot.lane.b32.xlu1 %v707_v25, %s3423_s24  ;;  %v1111_v5 = vrot.slane %v1109_v2, 1  ;;  %v1114_v17 = vshrl.u32 %v2812_v19, 16  ;;  %v1118_v41 = vrot.slane %v1116_v30, 1  ;;  %v1121_v42 = vshll.u32 %v3756_v11, 16  ;;  %v2717_v7 = vld [vmem:[%s3648_s21 + $0x84] sm:$0xf] }
  0x87   : > { %796 = vrot.lane.b32.xlu0 %v695_v29, %s3423_s24  ;;  %v2851_v44 = vcombine.low %v2691_v40, %v3660_v1  ;;  %v1208_v45 = vsel %vm587_vm1, %v1203_v33, %v1207_v34  ;;  %v1215_v46 = vor.u32 %v1214_v37, %v1210_v36  ;;  %v1219_v47 = vrot.slane %v1217_v39, 1  ;;  %v3775_v1 = vld [vmem:[%s3648_s21 + $0x7c] sm:$0xf]  ;;  %v3793_v9 = vld [vmem:[%s3648_s21 + $0x88] sm:$0xf]  ;;  %s3428_s10 = smov 32  }
  0x88   : > { %v2843_v48 = vcombine.low %v2683_v43, %v3667_v4  ;;  %v1112_v50 = vsel %vm587_vm1, %v1107_v35, %v1111_v5  ;;  %v1119_v51 = vor.u32 %v1118_v41, %v1114_v17  ;;  %v1123_v52 = vrot.slane %v1121_v42, 1  ;;  %v3800_v14 = vld [vmem:[%s3648_s21 + $0x28] sm:$0xf]  ;;  %v3806_v21 = vld [vmem:[%s3648_s21 + $0x80] ss:$0 sps:$4 sm:$0x11]  }
  0x89   : > { %v2852_v56 = vcombine.low %v2692_v49, %v3720_v57  ;;  %v1220_v4 = vsel %vm587_vm1, %v1215_v46, %v1219_v47  ;;  %v1397_v58 = vrot.slane %v2851_v44, 1  ;;  %v1398_v59 = vrot.slane %v3733_v13, 1  ;;  %v2701_v13 = vld [vmem:[%s3648_s21 + $0x24] sm:$0xf]  ;;  %v279_v37 = vld [vmem:[%s3648_s21 + $0x78] sm:$0xf] }
  0x8a   : > { %1039 = vrot.lane.b32.xlu1 %v2820_v12, %s3421_s20  ;;  %v2844_v61 = vcombine.low %v2684_v53, %v3726_v63  ;;  %v1124_v62 = vsel %vm587_vm1, %v1119_v51, %v1123_v52  ;;  %v1373_v0 = vrot.slane %v2843_v48, 1  ;;  %v1374_v3 = vrot.slane %v3738_v20, 1  ;;  %v3813_v26 = vld [vmem:[%s3648_s21 + $0x20] ss:$0 sps:$4 sm:$0x11]   ;;  %v3191_v41 = vld [vmem:[#allocation5] sm:$0xff]  }
  0x8b   : > { %1023 = vrot.lane.b32.xlu0 %v2812_v19, %s3421_s20  ;;  %v2867_v57 = vcombine.low %v2715_v54, %v3775_v1  ;;  %v2859_v6 = vcombine.low %v2699_v55, %v3783_v60  ;;  %v1399_v10 = vsel %vm860_vm0, %v1397_v58, %v1398_v59  ;;  %v1400_v63 = vrot.slane %v2852_v56, 1  ;;  %v3819_v34 = vld [vmem:[%s3648_s21 + $0x8c] ss:$0 sps:$4 sm:$0x11]   ;;  %v3828_v39 = vld [vmem:[%s3648_s21 + $0x7c] sm:$0xf]  ;;  %2952 = vmatprep.subr.bf16.mxu0 %v3191_v41 }
  0x8c   : > { %v1401_v12 = vrot.slane %v3745_v24, 1  ;;  %v1375_v15 = vsel %vm860_vm0, %v1373_v0, %v1374_v3  ;;  %v1376_v16 = vrot.slane %v2844_v61, 1  ;;  %v1377_v19 = vrot.slane %v3756_v11, 1  ;;  %v3824_v36 = vld [vmem:[%s3648_s21 + $0x2c] ss:$0 sps:$4 sm:$0x11]   ;;  %2990 = vmatprep.subr.bf16.mxu1 %v3191_v41  ;;  %2953 = vmatpush3.bf16.msra.mxu0 %v3191_v41 }
  0x8d   : > { %v1712_v20 = vshll.u32 %v2867_v57, 16  ;;  %v2868_v8 = vcombine.low %v2717_v7, %v3793_v9  ;;  %v1616_v22 = vshll.u32 %v2859_v6, 16  ;;  %v2860_v24 = vcombine.low %v2701_v13, %v3800_v14  ;;  %v263_v40 = vld [vmem:[%s3648_s21 + $0x18] sm:$0xf]  ;;  %v3832_v17 = vld [vmem:[%s3648_s21 + $0x1c] sm:$0xf]  ;;  %2993 = vmatpush3.bf16.msra.mxu1 %v3191_v41 }
  0x8e   : > { %1309 = vrot.lane.b32.xlu1 %v1208_v45, %s3424_s11  ;;  %v1402_v25 = vsel %vm860_vm0, %v1400_v63, %v1401_v12  ;;  %v1378_v27 = vsel %vm860_vm0, %v1376_v16, %v1377_v19  ;;  %v1710_v29 = vshrl.u32 %v2867_v57, 16  ;;  %v1717_v32 = vshll.u32 %v3806_v21, 16  ;;  %v2755_v42 = vld [vmem:[%s3648_s21 + $0x78] sm:$0xe]  ;;  %v281_v7 = vld [vmem:[%s3648_s21 + $0x84] sm:$0xf] }
  0x8f   : > { %1293 = vrot.lane.b32.xlu0 %v1112_v50, %s3424_s11  ;;  %v1724_v28 = vshll.u32 %v2868_v8, 16  ;;  %v1714_v30 = vrot.slane %v1712_v20, 1  ;;  %v1628_v2 = vshll.u32 %v2860_v24, 16  ;;  %v1614_v11 = vshrl.u32 %v2859_v6, 16  ;;  %v2747_v47 = vld [vmem:[%s3648_s21 + $0x18] sm:$0xe] }
  0x90   : > { %v1618_v33 = vrot.slane %v1616_v22, 1  ;;  %v1621_v35 = vshll.u32 %v3813_v26, 16  ;;  %v1719_v43 = vrot.slane %v1717_v32, 1  ;;  %v1722_v44 = vshrl.u32 %v2868_v8, 16  ;;  %v3196_v56 = vld [vmem:[#allocation5 + $0x8] sm:$0xff]   ;;  %s2634_s19 = sshll.u32 %s3644_s30, 8 }
  0x91   : > { %v1715_v5 = vor.u32 %v1714_v30, %v1710_v29  ;;  %v1726_v45 = vrot.slane %v1724_v28, 1  ;;  %v1729_v46 = vshll.u32 %v3819_v34, 16  ;;  %v1626_v48 = vshrl.u32 %v2860_v24, 16  ;;  %v3850_v61 = vld [vmem:[%s3648_s21 + $0x80] ss:$0 sps:$4 sm:$0x11]   ;;  %2954 = vmatprep.subr.bf16.mxu0 %v3196_v56  ;;  %2991 = vmatprep.subr.bf16.mxu1 %v3196_v56 }
  0x92   : > { %1311 = vrot.lane.b32.xlu1 %v1220_v4, %s3424_s11  ;;  %v1630_v49 = vrot.slane %v1628_v2, 1  ;;  %v1633_v50 = vshll.u32 %v3824_v36, 16  ;;  %v3841_v51 = vcombine.low %v279_v37, %v3828_v39  ;;  %v1619_v52 = vor.u32 %v1618_v33, %v1614_v11  ;;  %2955 = vmatpush3.bf16.msra.mxu0 %v3196_v56  ;;  %v265_v13 = vld [vmem:[%s3648_s21 + $0x24] sm:$0xf]  ;;  %s4860_s4 = scalar_lea.vmem [#allocation8], %s2634_s19  ;;  %s2932_s9 = sshll.u32 %s3406_s15, 12 }
  0x93   : > { %1295 = vrot.lane.b32.xlu0 %v1124_v62, %s3424_s11  ;;  %v1623_v53 = vrot.slane %v1621_v35, 1  ;;  %v3844_v54 = vcombine.low %v263_v40, %v3832_v17  ;;  %v2899_v55 = vcombine.low %v2755_v42, %v3775_v1  ;;  %v2891_v4 = vcombine.low %v2747_v47, %v3783_v60  ;;  %2994 = vmatpush3.bf16.msra.mxu1 %v3196_v56  ;;  %v2756_v16 = vld [vmem:[%s3648_s21 + $0x84] sm:$0xe]  ;;  %v3892_v40 = vld [vmem:[%s3648_s21 + $0x8c] ss:$0 sps:$4 sm:$0x11]   ;;  %s4922_s7 = scalar_lea.hbm %s4983_s3, %s2932_s9 }
  0x94   : > { %v1727_v58 = vor.u32 %v1726_v45, %v1722_v44  ;;  %v1731_v59 = vrot.slane %v1729_v46, 1  ;;  %v1720_v62 = vsel %vm587_vm1, %v1715_v5, %v1719_v43  ;;  %v1631_v0 = vor.u32 %v1630_v49, %v1626_v48  ;;  %s2503_s28 = sshll.u32 %s4860_s4, 4  ;;  %s2487_s8 = scalar_lea.sflag [#allocation4], %s3644_s30  ;;  %s4927_s28 = int_to_ptr.vmem [resolvable:$true] %s2503_s28 }
  0x95   : > { %v1635_v1 = vrot.slane %v1633_v50, 1  ;;  %v711_v3 = vshll.u32 %v3841_v51, 16  ;;  %v1624_v60 = vsel %vm587_vm1, %v1619_v52, %v1623_v53  ;;  %v1909_v63 = vrot.slane %v2899_v55, 1  ;;  %v317_v53 = vld [vmem:[%s3648_s21 + $0x78] sm:$0xe]  ;;  %p5016_p12 = scmp.ne.s32.totalorder %s5000_s27, 0 }
  0x96   : > { %1437 = vrot.lane.b32.xlu1 %v1399_v10, %s3425_s18  ;;  %v3862_v10 = vld [vmem:[%s3648_s21 + $0x88] sm:$0xf]  ;;  %v1910_v12 = vrot.slane %v3806_v21, 1  ;;  %v1732_v19 = vsel %vm587_vm1, %v1727_v58, %v1731_v59  ;;  %v1885_v20 = vrot.slane %v2891_v4, 1  ;;  %v716_v22 = vshll.u32 %v3850_v61, 16 }
  0x97   : > { %1421 = vrot.lane.b32.xlu0 %v1375_v15, %s3425_s18  ;;  %v3867_v15 = vld [vmem:[%s3648_s21 + $0x28] sm:$0xf]  ;;  %v1636_v21 = vsel %vm587_vm1, %v1631_v0, %v1635_v1  ;;  %v3879_v28 = vcombine.low %v281_v7, %v3862_v10  ;;  %v613_v29 = vshrl.u32 %v3844_v54, 16  ;;  %v2900_v2 = vcombine.low %v2756_v16, %v3793_v9  ;;  %v3897_v9 = vld [vmem:[%s3648_s21 + $0x2c] ss:$0 sps:$4 sm:$0x11]  }
  0x98   : > { %v3884_v32 = vcombine.low %v265_v13, %v3867_v15  ;;  %v718_v33 = vrot.slane %v716_v22, 1  ;;  %v1911_v35 = vsel %vm860_vm0, %v1909_v63, %v1910_v12  ;;  %v1913_v45 = vrot.slane %v3819_v34, 1  ;;  %v310_v63 = vld [vmem:[%s3648_s21 + $0x24] sm:$0xe] }
  0x99   : > { %5004 = vst [vmem:[#allocation12_spill] sm:$0xff] %v3879_v28  ;;  %v723_v5 = vshll.u32 %v3879_v28, 16  ;;  %v1912_v44 = vrot.slane %v2900_v2, 1  ;;  %v1889_v47 = vrot.slane %v3824_v36, 1  ;;  %v721_v49 = vshrl.u32 %v3879_v28, 16 }
  0x9a   : > { %1439 = vrot.lane.b32.xlu1 %v1402_v25, %s3425_s18  ;;  %v709_v25 = vshrl.u32 %v3841_v51, 16  ;;  %5005 = vst [vmem:[#allocation13_spill] sm:$0xff] %v3884_v32  ;;  %v728_v52 = vshll.u32 %v3892_v40, 16  ;;  %v625_v56 = vshrl.u32 %v3884_v32, 16  ;;  %v632_v4 = vshll.u32 %v3897_v9, 16 }
  0x9b   : > { %1423 = vrot.lane.b32.xlu0 %v1378_v27, %s3425_s18  ;;  %v713_v27 = vrot.slane %v711_v3, 1  ;;  %v725_v50 = vrot.slane %v723_v5, 1  ;;  %v309_v36 = vld [vmem:[%s3648_s21 + $0x18] sm:$0xe]  ;;  %v1914_v58 = vsel %vm860_vm0, %v1912_v44, %v1913_v45  ;;  %v2805_v0 = vcombine.low %v317_v53, %v3828_v39  ;;  %v318_v3 = vld [vmem:[%s3648_s21 + $0x84] sm:$0xe] }
  0x9c   : > { %v2797_v1 = vcombine.low %v309_v36, %v3832_v17  ;;  %v634_v7 = vrot.slane %v632_v4, 1  ;;  %v892_v12 = vrot.slane %v3850_v61, 1  ;;  %v2806_v16 = vcombine.low %v318_v3, %v3862_v10  ;;  %v2693_v4 = vld [vmem:[%s3648_s21 + $0x84] sm:$0xe]  ;;  %v4354_v28 = vld [vmem:[%s3648_s21 + $0x4c] sm:$0xf] }
  0x9d   : > { %v714_v37 = vor.u32 %v713_v27, %v709_v25  ;;  %v726_v59 = vor.u32 %v725_v50, %v721_v49  ;;  %v891_v17 = vrot.slane %v2805_v0, 1  ;;  %v2798_v61 = vcombine.low %v310_v63, %v3867_v15  ;;  %v3944_v15 = vld [vmem:[%s3648_s21 + $0x94] sm:$0xf]  ;;  %v2685_v0 = vld [vmem:[%s3648_s21 + $0x24] sm:$0xe] }
  0x9e   : > { %1549 = vrot.lane.b32.xlu1 %v2867_v57, %s3426_s5  ;;  %v3856_v57 = vld [vmem:[%s3648_s21 + $0x20] ss:$0 sps:$4 sm:$0x11]   ;;  %v894_v10 = vrot.slane %v2806_v16, 1  ;;  %vm2289_vm2 = vcmask 1041408   ;;  %vm1965_vm3 = vcmask 31744  }
  0x9f   : > { %1533 = vrot.lane.b32.xlu0 %v2859_v6, %s3426_s5  ;;  %v615_v6 = vshll.u32 %v3844_v54, 16  ;;  %v719_v48 = vsel %vm587_vm1, %v714_v37, %v718_v33  ;;  %v868_v13 = vrot.slane %v3856_v57, 1  ;;  %v893_v27 = vsel %vm860_vm0, %v891_v17, %v892_v12  ;;  %v2641_v33 = vld [vmem:[%s3648_s21 + $0x30] sm:$0xf] }
  0xa0   : > { %v870_v2 = vrot.slane %v2798_v61, 1  ;;  %v2694_v12 = vld [vmem:[%s3648_s21 + $0x90] sm:$0xe]  ;;  %vm1998_vm4 = vcmask 64512   ;;  %vm2031_vm5 = vcmask 97280   ;;  %vm2064_vm6 = vcmask 130048  }
  0xa1   : > { %v617_v30 = vrot.slane %v615_v6, 1  ;;  %vm2097_vm7 = vcmask 162816   ;;  %vm2130_vm8 = vcmask 195584   ;;  %vm2163_vm9 = vcmask 228352  }
  0xa2   : > { %1551 = vrot.lane.b32.xlu1 %v2868_v8, %s3426_s5  ;;  %v1886_v8 = vrot.slane %v3813_v26, 1  ;;  %v620_v26 = vshll.u32 %v3856_v57, 16  ;;  %v2639_v57 = vld [vmem:[%s3648_s21 + $0x24] sm:$0xf]  ;;  %vm2196_vm10 = vcmask 261120   ;;  %vm2256_vm11 = vcmask 293888  }
  0xa3   : > { %1535 = vrot.lane.b32.xlu0 %v2860_v24, %s3426_s5  ;;  %v2748_v24 = vld [vmem:[%s3648_s21 + $0x24] sm:$0xe]  ;;  %v618_v42 = vor.u32 %v617_v30, %v613_v29  ;;  %v2657_v30 = vld [vmem:[%s3648_s21 + $0x90] sm:$0xf] }
  0xa4   : > { %v2892_v11 = vcombine.low %v2748_v24, %v3800_v14  ;;  %v1887_v41 = vsel %vm860_vm0, %v1885_v20, %v1886_v8  ;;  %v622_v43 = vrot.slane %v620_v26, 1  ;;  %v627_v14 = vshll.u32 %v3884_v32, 16  ;;  %v2655_v20 = vld [vmem:[%s3648_s21 + $0x84] sm:$0xf]  ;;  %v3928_v8 = vld [vmem:[%s3648_s21 + $0x88] sm:$0xf] }
  0xa5   : > { %v3934_v24 = vld [vmem:[%s3648_s21 + $0x28] sm:$0xf]  ;;  %v2821_v25 = vcombine.low %v2655_v20, %v3928_v8 }
  0xa6   : > { %1821 = vrot.lane.b32.xlu1 %v1720_v62, %s3427_s26  ;;  %v1888_v46 = vrot.slane %v2892_v11, 1  ;;  %v623_v55 = vsel %vm587_vm1, %v618_v42, %v622_v43  ;;  %v629_v34 = vrot.slane %v627_v14, 1  ;;  %v730_v62 = vrot.slane %v728_v52, 1  ;;  %v3151_v43 = vld [vmem:[%s3648_s21 + $0x8c] ss:$0 sps:$4 sm:$0x11]  }
  0xa7   : > { %1805 = vrot.lane.b32.xlu0 %v1624_v60, %s3427_s26  ;;  %v2813_v29 = vcombine.low %v2639_v57, %v3934_v24  ;;  %v871_v11 = vrot.slane %v3897_v9, 1  ;;  %v1224_v37 = vshll.u32 %v2821_v25, 16  ;;  %v3960_v14 = vld [vmem:[%s3648_s21 + $0x2c] ss:$0 sps:$4 sm:$0x11]   ;;  %v1222_v45 = vshrl.u32 %v2821_v25, 16 }
  0xa8   : > { %v1890_v60 = vsel %vm860_vm0, %v1888_v46, %v1889_v47  ;;  %v630_v6 = vor.u32 %v629_v34, %v625_v56  ;;  %v731_v39 = vsel %vm587_vm1, %v726_v59, %v730_v62  ;;  %v1229_v49 = vshll.u32 %v3151_v43, 16  ;;  %v3965_v52 = vld [vmem:[%s3648_s21 + $0x98] ss:$0 sps:$4 sm:$0x11]   ;;  %v2719_v57 = vld [vmem:[%s3648_s21 + $0x90] sm:$0xf] }
  0xa9   : > { %v872_v9 = vsel %vm860_vm0, %v870_v2, %v871_v11  ;;  %v1226_v46 = vrot.slane %v1224_v37, 1  ;;  %v1126_v47 = vshrl.u32 %v2813_v29, 16  ;;  %v1133_v53 = vshll.u32 %v3960_v14, 16  ;;  %v2721_v11 = vld [vmem:[%s3648_s21 + $0x9c] sm:$0xf] }
  0xaa   : > { %1823 = vrot.lane.b32.xlu1 %v1732_v19, %s3427_s26  ;;  %v867_v19 = vrot.slane %v2797_v1, 1  ;;  %v635_v22 = vsel %vm587_vm1, %v630_v6, %v634_v7  ;;  %v1231_v36 = vrot.slane %v1229_v49, 1  ;;  %v1241_v62 = vshll.u32 %v3965_v52, 16  ;;  %v4024_v49 = vld [vmem:[%s3648_s21 + $0x38] ss:$0 sps:$4 sm:$0x11]  }
  0xab   : > { %1807 = vrot.lane.b32.xlu0 %v1636_v21, %s3427_s26  ;;  %v895_v21 = vrot.slane %v3892_v40, 1  ;;  %v2822_v40 = vcombine.low %v2657_v30, %v3944_v15  ;;  %v1227_v56 = vor.u32 %v1226_v46, %v1222_v45  ;;  %v1135_v1 = vrot.slane %v1133_v53, 1  ;;  %v4019_v46 = vld [vmem:[%s3648_s21 + $0x98] ss:$0 sps:$4 sm:$0x11]  }
  0xac   : > { %v869_v26 = vsel %vm860_vm0, %v867_v19, %v868_v13  ;;  %v2853_v7 = vcombine.low %v2693_v4, %v3928_v8  ;;  %v2845_v63 = vcombine.low %v2685_v0, %v3934_v24  ;;  %v2854_v8 = vcombine.low %v2694_v12, %v3944_v15  ;;  %v2703_v15 = vld [vmem:[%s3648_s21 + $0x30] sm:$0xf]  ;;  %v271_v32 = vld [vmem:[%s3648_s21 + $0x48] sm:$0xf] }
  0xad   : > { %v896_v5 = vsel %vm860_vm0, %v894_v10, %v895_v21  ;;  %v1236_v44 = vshll.u32 %v2822_v40, 16  ;;  %v1234_v34 = vshrl.u32 %v2822_v40, 16  ;;  %v1232_v13 = vsel %vm587_vm1, %v1227_v56, %v1231_v36  ;;  %v4029_v56 = vld [vmem:[%s3648_s21 + $0xa4] ss:$0 sps:$4 sm:$0x11]  }
  0xae   : > { %1949 = vrot.lane.b32.xlu1 %v1911_v35, %s3428_s10  ;;  %v3950_v35 = vld [vmem:[%s3648_s21 + $0x34] sm:$0xf]  ;;  %v1403_v61 = vrot.slane %v2853_v7, 1  ;;  %v1404_v10 = vrot.slane %v3151_v43, 1  ;;  %v1379_v21 = vrot.slane %v2845_v63, 1  ;;  %v1741_v4 = vshll.u32 %v4019_v46, 16 }
  0xaf   : > { %1933 = vrot.lane.b32.xlu0 %v1887_v41, %s3428_s10  ;;  %v1128_v41 = vshll.u32 %v2813_v29, 16  ;;  %v2814_v42 = vcombine.low %v2641_v33, %v3950_v35  ;;  %v1238_v59 = vrot.slane %v1236_v44, 1  ;;  %v4004_v33 = vld [vmem:[%s3648_s21 + $0xa0] sm:$0xf]  ;;  %v2757_v0 = vld [vmem:[%s3648_s21 + $0x90] sm:$0xe] }
  0xb0   : > { %v1405_v37 = vsel %vm860_vm0, %v1403_v61, %v1404_v10  ;;  %v4015_v44 = vld [vmem:[%s3648_s21 + $0x40] sm:$0xf]  ;;  %v267_v7 = vld [vmem:[%s3648_s21 + $0x30] sm:$0xf]  ;;  %v4045_v63 = vld [vmem:[%s3648_s21 + $0x34] sm:$0xf] }
  0xb1   : > { %v1130_v50 = vrot.slane %v1128_v41, 1  ;;  %v1138_v3 = vshrl.u32 %v2814_v42, 16  ;;  %v1239_v16 = vor.u32 %v1238_v59, %v1234_v34  ;;  %v1645_v59 = vshll.u32 %v4024_v49, 16 }
  0xb2   : > { %800 = vrot.lane.b32.xlu1 %v719_v48, %s3423_s24  ;;  %v1140_v48 = vshll.u32 %v2814_v42, 16  ;;  %v4056_v10 = vcombine.low %v267_v7, %v4045_v63 }
  0xb3   : > { %784 = vrot.lane.b32.xlu0 %v623_v55, %s3423_s24  ;;  %v3969_v55 = vld [vmem:[%s3648_s21 + $0x38] ss:$0 sps:$4 sm:$0x11]  }
  0xb4   : > { %v1145_v6 = vshll.u32 %v3969_v55, 16  ;;  %v1383_v43 = vrot.slane %v3969_v55, 1  ;;  %5007 = vst [vmem:[#allocation15_spill] sm:$0xff] %v4056_v10 }
  0xb6   : > { %1951 = vrot.lane.b32.xlu1 %v1914_v58, %s3428_s10  ;;  %v1131_v58 = vor.u32 %v1130_v50, %v1126_v47  ;;  %v1147_v20 = vrot.slane %v1145_v6, 1  ;;  %v4041_v6 = vld [vmem:[%s3648_s21 + $0x94] sm:$0xf] }
  0xb7   : > { %1935 = vrot.lane.b32.xlu0 %v1890_v60, %s3428_s10  ;;  %v1142_v60 = vrot.slane %v1140_v48, 1 }
  0xb8   : > { %v1136_v17 = vsel %vm587_vm1, %v1131_v58, %v1135_v1 }
  0xb9   : > { %v1143_v19 = vor.u32 %v1142_v60, %v1138_v3  ;;  %v283_v60 = vld [vmem:[%s3648_s21 + $0x90] sm:$0xf] }
  0xba   : > { %802 = vrot.lane.b32.xlu1 %v731_v39, %s3423_s24  ;;  %v1243_v39 = vrot.slane %v1241_v62, 1  ;;  %v4036_v62 = vld [vmem:[%s3648_s21 + $0x44] ss:$0 sps:$4 sm:$0x11]  }
  0xbb   : > { %786 = vrot.lane.b32.xlu0 %v635_v22, %s3423_s24  ;;  %v2686_v22 = vld [vmem:[%s3648_s21 + $0x30] sm:$0xe]  ;;  %v1148_v30 = vsel %vm587_vm1, %v1143_v19, %v1147_v20  ;;  %v1743_v19 = vrot.slane %v1741_v4, 1  ;;  %v2750_v4 = vld [vmem:[%s3648_s21 + $0x3c] sm:$0xe] }
  0xbc   : > { %v1244_v24 = vsel %vm587_vm1, %v1239_v16, %v1243_v39  ;;  %v1753_v16 = vshll.u32 %v4029_v56, 16  ;;  %v3201_v39 = vld [vmem:[#allocation5 + $0x10] ss:$0 sps:$4 sm:$0x33]  }
  0xbd   : > { %2996 = vmatprep.subr.msk.bf16.mxu0 %vm2289_vm2, %v3201_v39  ;;  %2997 = vmatprep.subr.msk.bf16.mxu1 %vm2289_vm2, %v3201_v39 }
  0xbe   : > { %929 = vrot.lane.b32.xlu1 %v893_v27, %s3422_s22  ;;  %v3992_v27 = vld [vmem:[%s3648_s21 + $0x94] sm:$0xf] }
  0xbf   : > { %913 = vrot.lane.b32.xlu0 %v869_v26, %s3422_s22  ;;  %v3998_v26 = vld [vmem:[%s3648_s21 + $0x34] sm:$0xf]  ;;  %v2869_v2 = vcombine.low %v2719_v57, %v3992_v27 }
  0xc1   : > { %v1736_v45 = vshll.u32 %v2869_v2, 16  ;;  %v1734_v55 = vshrl.u32 %v2869_v2, 16 }
  0xc2   : > { %931 = vrot.lane.b32.xlu1 %v896_v5, %s3422_s22  ;;  %v2861_v5 = vcombine.low %v2703_v15, %v3998_v26  ;;  %v1755_v15 = vrot.slane %v1753_v16, 1 }
  0xc3   : > { %915 = vrot.lane.b32.xlu0 %v872_v9, %s3422_s22  ;;  %v2705_v9 = vld [vmem:[%s3648_s21 + $0x3c] sm:$0xf]  ;;  %v1738_v34 = vrot.slane %v1736_v45, 1  ;;  %v1916_v45 = vrot.slane %v4019_v46, 1 }
  0xc4   : > { %v1640_v48 = vshll.u32 %v2861_v5, 16  ;;  %v1638_v36 = vshrl.u32 %v2861_v5, 16 }
  0xc5   : > { %v1739_v12 = vor.u32 %v1738_v34, %v1734_v55  ;;  %v1892_v55 = vrot.slane %v4024_v49, 1 }
  0xc6   : > { %1041 = vrot.lane.b32.xlu1 %v2821_v25, %s3421_s20  ;;  %v1380_v25 = vrot.slane %v3960_v14, 1  ;;  %v2870_v14 = vcombine.low %v2721_v11, %v4004_v33  ;;  %v1642_v58 = vrot.slane %v1640_v48, 1  ;;  %v4082_v48 = vld [vmem:[%s3648_s21 + $0x40] sm:$0xf] }
  0xc7   : > { %1025 = vrot.lane.b32.xlu0 %v2813_v29, %s3421_s20  ;;  %v2846_v29 = vcombine.low %v2686_v22, %v3950_v35  ;;  %v1406_v35 = vrot.slane %v2854_v8, 1  ;;  %v1647_v22 = vrot.slane %v1645_v59, 1  ;;  %v4052_v8 = vcombine.low %v283_v60, %v4041_v6 }
  0xc8   : > { %v1381_v41 = vsel %vm860_vm0, %v1379_v21, %v1380_v25  ;;  %v1748_v53 = vshll.u32 %v2870_v14, 16  ;;  %v1746_v3 = vshrl.u32 %v2870_v14, 16  ;;  %v1643_v20 = vor.u32 %v1642_v58, %v1638_v36 }
  0xc9   : > { %5006 = vst [vmem:[#allocation14_spill] sm:$0xff] %v4052_v8  ;;  %v2901_v21 = vcombine.low %v2757_v0, %v3992_v27  ;;  %v2291_v25 = vsel %vm2289_vm2, %v3201_v39, 0  ;;  %v1744_v11 = vsel %vm587_vm1, %v1739_v12, %v1743_v19  ;;  %v735_v27 = vshll.u32 %v4052_v8, 16  ;;  %v4110_v19 = vld [vmem:[%s3648_s21 + $0xa4] ss:$0 sps:$4 sm:$0x11]  }
  0xca   : > { %1043 = vrot.lane.b32.xlu1 %v2822_v40, %s3421_s20  ;;  %v1407_v40 = vrot.slane %v3965_v52, 1  ;;  %v2862_v52 = vcombine.low %v2705_v9, %v4015_v44  ;;  %2957 = vmatpush3.bf16.msra.mxu0 %v2291_v25  ;;  %v2758_v9 = vld [vmem:[%s3648_s21 + $0x9c] sm:$0xe]  ;;  %v733_v34 = vshrl.u32 %v4052_v8, 16  ;;  %v2894_v12 = vcombine.low %v2750_v4, %v4015_v44 }
  0xcb   : > { %1027 = vrot.lane.b32.xlu0 %v2814_v42, %s3421_s20  ;;  %v1382_v42 = vrot.slane %v2846_v29, 1  ;;  %2995 = vmatpush3.bf16.msra.mxu1 %v2291_v25  ;;  %v737_v36 = vrot.slane %v735_v27, 1  ;;  %v2902_v7 = vcombine.low %v2758_v9, %v4004_v33  ;;  %v4117_v44 = vld [vmem:[%s3648_s21 + $0x44] ss:$0 sps:$4 sm:$0x11]   ;;  %v1919_v25 = vrot.slane %v4029_v56, 1 }
  0xcc   : > { %v1408_v47 = vsel %vm860_vm0, %v1406_v35, %v1407_v40  ;;  %v1652_v1 = vshll.u32 %v2862_v52, 16  ;;  %v1650_v61 = vshrl.u32 %v2862_v52, 16  ;;  %v656_v56 = vshll.u32 %v4117_v44, 16 }
  0xcd   : > { %v1384_v50 = vsel %vm860_vm0, %v1382_v42, %v1383_v43  ;;  %v285_v42 = vld [vmem:[%s3648_s21 + $0x9c] sm:$0xf]  ;;  %v4076_v43 = vld [vmem:[%s3648_s21 + $0xa0] sm:$0xf]  ;;  %v738_v16 = vor.u32 %v737_v36, %v733_v34 }
  0xce   : > { %1313 = vrot.lane.b32.xlu1 %v1232_v13, %s3424_s11  ;;  %v1750_v13 = vrot.slane %v1748_v53, 1  ;;  %v1654_v57 = vrot.slane %v1652_v1, 1  ;;  %v4095_v59 = vcombine.low %v285_v42, %v4076_v43  ;;  %v637_v1 = vshrl.u32 %v4056_v10, 16 }
  0xcf   : > { %1297 = vrot.lane.b32.xlu0 %v1136_v17, %s3424_s11  ;;  %v2749_v17 = vld [vmem:[%s3648_s21 + $0x30] sm:$0xe]  ;;  %v658_v36 = vrot.slane %v656_v56, 1 }
  0xd0   : > { %v2893_v29 = vcombine.low %v2749_v17, %v3998_v26  ;;  %v1648_v26 = vsel %vm587_vm1, %v1643_v20, %v1647_v22  ;;  %v1655_v40 = vor.u32 %v1654_v57, %v1650_v61  ;;  %5008 = vst [vmem:[#allocation16_spill] sm:$0xff] %v4095_v59  ;;  %v747_v20 = vshll.u32 %v4095_v59, 16 }
  0xd2   : > { %1315 = vrot.lane.b32.xlu1 %v1244_v24, %s3424_s11  ;;  %v1657_v24 = vshll.u32 %v4036_v62, 16  ;;  %v1891_v53 = vrot.slane %v2893_v29, 1  ;;  %v1894_v29 = vrot.slane %v2894_v12, 1  ;;  %v749_v27 = vrot.slane %v747_v20, 1  ;;  %v4164_v20 = vld [vmem:[%s3648_s21 + $0x40] sm:$0xf] }
  0xd3   : > { %1299 = vrot.lane.b32.xlu0 %v1148_v30, %s3424_s11  ;;  %v1751_v30 = vor.u32 %v1750_v13, %v1746_v3 }
  0xd4   : > { %v1893_v33 = vsel %vm860_vm0, %v1891_v53, %v1892_v55 }
  0xd6   : > { %1441 = vrot.lane.b32.xlu1 %v1405_v37, %s3425_s18  ;;  %v4068_v37 = vld [vmem:[%s3648_s21 + $0x38] ss:$0 sps:$4 sm:$0x11]  }
  0xd7   : > { %1425 = vrot.lane.b32.xlu0 %v1381_v41, %s3425_s18  ;;  %v639_v41 = vshll.u32 %v4056_v10, 16  ;;  %v644_v58 = vshll.u32 %v4068_v37, 16 }
  0xd9   : > { %v641_v3 = vrot.slane %v639_v41, 1  ;;  %v646_v17 = vrot.slane %v644_v58, 1 }
  0xda   : > { %1443 = vrot.lane.b32.xlu1 %v1408_v47, %s3425_s18  ;;  %v269_v47 = vld [vmem:[%s3648_s21 + $0x3c] sm:$0xf] }
  0xdb   : > { %1427 = vrot.lane.b32.xlu0 %v1384_v50, %s3425_s18  ;;  %v4100_v49 = vcombine.low %v269_v47, %v4082_v48  ;;  %v642_v61 = vor.u32 %v641_v3, %v637_v1 }
  0xdd   : > { %5009 = vst [vmem:[#allocation17_spill] sm:$0xff] %v4100_v49  ;;  %v651_v57 = vshll.u32 %v4100_v49, 16  ;;  %v649_v41 = vshrl.u32 %v4100_v49, 16 }
  0xde   : > { %1553 = vrot.lane.b32.xlu1 %v2869_v2, %s3426_s5  ;;  %v4062_v2 = vld [vmem:[%s3648_s21 + $0x98] ss:$0 sps:$4 sm:$0x11]  }
  0xdf   : > { %1537 = vrot.lane.b32.xlu0 %v2861_v5, %s3426_s5  ;;  %v1659_v5 = vrot.slane %v1657_v24, 1  ;;  %v740_v46 = vshll.u32 %v4062_v2, 16  ;;  %v653_v42 = vrot.slane %v651_v57, 1  ;;  %v898_v1 = vrot.slane %v4062_v2, 1  ;;  %v4172_v57 = vld [vmem:[%s3648_s21 + $0xac] sm:$0xf] }
  0xe1   : > { %v1660_v0 = vsel %vm587_vm1, %v1655_v40, %v1659_v5  ;;  %v742_v39 = vrot.slane %v740_v46, 1  ;;  %v319_v40 = vld [vmem:[%s3648_s21 + $0x90] sm:$0xe]  ;;  %v647_v5 = vsel %vm587_vm1, %v642_v61, %v646_v17  ;;  %v654_v4 = vor.u32 %v653_v42, %v649_v41  ;;  %v320_v46 = vld [vmem:[%s3648_s21 + $0x9c] sm:$0xe] }
  0xe2   : > { %1555 = vrot.lane.b32.xlu1 %v2870_v14, %s3426_s5  ;;  %v1915_v14 = vrot.slane %v2901_v21, 1  ;;  %v1918_v21 = vrot.slane %v2902_v7, 1  ;;  %v4187_v41 = vld [vmem:[%s3648_s21 + $0x4c] sm:$0xf] }
  0xe3   : > { %1539 = vrot.lane.b32.xlu0 %v2862_v52, %s3426_s5  ;;  %v1756_v52 = vsel %vm587_vm1, %v1751_v30, %v1755_v15  ;;  %v1895_v30 = vrot.slane %v4036_v62, 1  ;;  %v743_v15 = vsel %vm587_vm1, %v738_v16, %v742_v39  ;;  %v311_v62 = vld [vmem:[%s3648_s21 + $0x30] sm:$0xe]  ;;  %v4156_v16 = vld [vmem:[%s3648_s21 + $0xa0] sm:$0xf]  ;;  %v659_v17 = vsel %vm587_vm1, %v654_v4, %v658_v36 }
  0xe4   : > { %v1917_v13 = vsel %vm860_vm0, %v1915_v14, %v1916_v45  ;;  %v1920_v14 = vsel %vm860_vm0, %v1918_v21, %v1919_v25  ;;  %v2799_v53 = vcombine.low %v311_v62, %v4045_v63  ;;  %v2659_v63 = vld [vmem:[%s3648_s21 + $0x9c] sm:$0xf]  ;;  %v901_v25 = vrot.slane %v4110_v19, 1  ;;  %v4191_v42 = vld [vmem:[%s3648_s21 + $0xa4] ss:$0 sps:$4 sm:$0x11]  }
  0xe5   : > { %v4071_v35 = vpop.permute.xlu1 %1037  ;;  %v1896_v34 = vsel %vm860_vm0, %v1894_v29, %v1895_v30  ;;  %v2823_v61 = vcombine.low %v2659_v63, %v4156_v16  ;;  %v1253_v36 = vshll.u32 %v4191_v42, 16 }
  0xe6   : > { %1825 = vrot.lane.b32.xlu1 %v1744_v11, %s3427_s26  ;;  %v4085_v50 = vpop.permute.xlu0 %1021  ;;  %v745_v11 = vshrl.u32 %v4095_v59, 16  ;;  %v873_v12 = vrot.slane %v2799_v53, 1 }
  0xe7   : > { %1809 = vrot.lane.b32.xlu0 %v1648_v26, %s3427_s26  ;;  %v752_v26 = vshll.u32 %v4110_v19, 16  ;;  %v1248_v19 = vshll.u32 %v2823_v61, 16 }
  0xe8   : > { %v750_v45 = vor.u32 %v749_v27, %v745_v11  ;;  %v877_v27 = vrot.slane %v4117_v44, 1 }
  0xe9   : > { %v754_v47 = vrot.slane %v752_v26, 1  ;;  %v1250_v4 = vrot.slane %v1248_v19, 1 }
  0xea   : > { %v4102_v60 = vpop.permute.xlu1 %925  ;;  %1827 = vrot.lane.b32.xlu1 %v1756_v52, %s3427_s26  ;;  %v2807_v52 = vcombine.low %v319_v40, %v4041_v6  ;;  %v874_v6 = vrot.slane %v4068_v37, 1  ;;  %v2643_v37 = vld [vmem:[%s3648_s21 + $0x3c] sm:$0xf] }
  0xeb   : > { %1811 = vrot.lane.b32.xlu0 %v1660_v0, %s3427_s26  ;;  %v312_v0 = vld [vmem:[%s3648_s21 + $0x3c] sm:$0xe]  ;;  %v755_v3 = vsel %vm587_vm1, %v750_v45, %v754_v47  ;;  %v2815_v29 = vcombine.low %v2643_v37, %v4164_v20  ;;  %v4200_v47 = vld [vmem:[%s3648_s21 + $0x44] ss:$0 sps:$4 sm:$0x11]   ;;  %v1255_v37 = vrot.slane %v1253_v36, 1 }
  0xec   : > { %v4113_v22 = vpop.permute.xlu0 %909  ;;  %v897_v7 = vrot.slane %v2807_v52, 1  ;;  %v2800_v2 = vcombine.low %v312_v0, %v4082_v48  ;;  %v4207_v0 = vld [vmem:[%s3648_s21 + $0xb0] ss:$0 sps:$4 sm:$0x11]  }
  0xed   : > { %v1152_v62 = vshll.u32 %v2815_v29, 16 }
  0xee   : > { %1953 = vrot.lane.b32.xlu1 %v1917_v13, %s3428_s10  ;;  %v4121_v24 = vpop.permute.xlu1 %927  ;;  %v2808_v13 = vcombine.low %v320_v46, %v4076_v43  ;;  %v2661_v43 = vld [vmem:[%s3648_s21 + $0xa8] sm:$0xf]  ;;  %v899_v21 = vsel %vm860_vm0, %v897_v7, %v898_v1  ;;  %v876_v11 = vrot.slane %v2800_v2, 1  ;;  %v1150_v46 = vshrl.u32 %v2815_v29, 16  ;;  %v2695_v2 = vld [vmem:[%s3648_s21 + $0x9c] sm:$0xe] }
  0xef   : > { %1937 = vrot.lane.b32.xlu0 %v1893_v33, %s3428_s10  ;;  %v2824_v40 = vcombine.low %v2661_v43, %v4172_v57  ;;  %v1154_v1 = vrot.slane %v1152_v62, 1  ;;  %v1157_v7 = vshll.u32 %v4200_v47, 16  ;;  %v4230_v62 = vld [vmem:[%s3648_s21 + $0xac] sm:$0xf] }
  0xf0   : > { %v900_v48 = vrot.slane %v2808_v13, 1 }
  0xf1   : > { %v4134_v9 = vpop.permute.xlu0 %911  ;;  %v1260_v53 = vshll.u32 %v2824_v40, 16  ;;  %v1155_v43 = vor.u32 %v1154_v1, %v1150_v46  ;;  %v2688_v46 = vld [vmem:[%s3648_s21 + $0x48] sm:$0xe] }
  0xf2   : > { %804 = vrot.lane.b32.xlu1 %v743_v15, %s3423_s24  ;;  %v875_v15 = vsel %vm860_vm0, %v873_v12, %v874_v6  ;;  %v902_v56 = vsel %vm860_vm0, %v900_v48, %v901_v25  ;;  %v4211_v6 = vld [vmem:[%s3648_s21 + $0x50] ss:$0 sps:$4 sm:$0x11]   ;;  %v1265_v48 = vshll.u32 %v4207_v0, 16  ;;  %v2687_v25 = vld [vmem:[%s3648_s21 + $0x3c] sm:$0xe] }
  0xf3   : > { %788 = vrot.lane.b32.xlu0 %v647_v5, %s3423_s24  ;;  %v2645_v5 = vld [vmem:[%s3648_s21 + $0x48] sm:$0xf] }
  0xf4   : > { %v4141_v55 = vpop.permute.xlu1 %782  ;;  %v2816_v45 = vcombine.low %v2645_v5, %v4187_v41  ;;  %v1169_v5 = vshll.u32 %v4211_v6, 16  ;;  %v1267_v36 = vrot.slane %v1265_v48, 1  ;;  %v2848_v48 = vcombine.low %v2688_v46, %v4187_v41 }
  0xf5   : > { %v4145_v58 = vpop.permute.xlu0 %780  ;;  %v1389_v46 = vrot.slane %v4211_v6, 1 }
  0xf6   : > { %1955 = vrot.lane.b32.xlu1 %v1920_v14, %s3428_s10  ;;  %v878_v14 = vsel %vm860_vm0, %v876_v11, %v877_v27  ;;  %v1159_v11 = vrot.slane %v1157_v7, 1  ;;  %v1162_v27 = vshrl.u32 %v2816_v45, 16  ;;  %v1171_v7 = vrot.slane %v1169_v5, 1 }
  0xf7   : > { %1939 = vrot.lane.b32.xlu0 %v1896_v34, %s3428_s10  ;;  %v1246_v34 = vshrl.u32 %v2823_v61, 16 }
  0xf8   : > { %v4158_v39 = vpop.permute.xlu1 %798 }
  0xf9   : > { %v4166_v33 = vpop.permute.xlu0 %796  ;;  %v1251_v13 = vor.u32 %v1250_v4, %v1246_v34 }
  0xfa   : > { %806 = vrot.lane.b32.xlu1 %v755_v3, %s3423_s24  ;;  %v1164_v3 = vshll.u32 %v2816_v45, 16 }
  0xfb   : > { %790 = vrot.lane.b32.xlu0 %v659_v17, %s3423_s24  ;;  %v1258_v17 = vshrl.u32 %v2824_v40, 16  ;;  %v1256_v34 = vsel %vm587_vm1, %v1251_v13, %v1255_v37  ;;  %v1410_v37 = vrot.slane %v4191_v42, 1 }
  0xfc   : > { %v4178_v30 = vpop.permute.xlu1 %1039 }
  0xfd   : > { %v4182_v26 = vpop.permute.xlu0 %1023 }
  0xfe   : > { %933 = vrot.lane.b32.xlu1 %v899_v21, %s3422_s22  ;;  %v1262_v21 = vrot.slane %v1260_v53, 1  ;;  %v2696_v53 = vld [vmem:[%s3648_s21 + $0xa8] sm:$0xe] }
  0xff   : > { %917 = vrot.lane.b32.xlu0 %v875_v15, %s3422_s22  ;;  %v2856_v13 = vcombine.low %v2696_v53, %v4172_v57 }
 0x100   : > { %v4195_v44 = vpop.permute.xlu1 %1309  ;;  %v1263_v4 = vor.u32 %v1262_v21, %v1258_v17  ;;  %v4256_v21 = vld [vmem:[%s3648_s21 + $0xb8] sm:$0xf] }
 0x101   : > { %v4202_v52 = vpop.permute.xlu0 %1293 }
 0x102   : > { %935 = vrot.lane.b32.xlu1 %v902_v56, %s3422_s22  ;;  %v2723_v56 = vld [vmem:[%s3648_s21 + $0xa8] sm:$0xf] }
 0x103   : > { %919 = vrot.lane.b32.xlu0 %v878_v14, %s3422_s22  ;;  %v2847_v14 = vcombine.low %v2687_v25, %v4164_v20  ;;  %v1268_v25 = vsel %vm587_vm1, %v1263_v4, %v1267_v36  ;;  %v1413_v4 = vrot.slane %v4207_v0, 1  ;;  %v1388_v36 = vrot.slane %v2848_v48, 1 }
 0x104   : > { %v4213_v63 = vpop.permute.xlu1 %1311  ;;  %v1983_v48 = vsel %vm1965_vm3, %v3688_v18, %v4166_v33  ;;  %v4317_v33 = vld [vmem:[%s3648_s21 + $0x5c] ss:$0 sps:$4 sm:$0x11]  }
 0x105   : > { %v4216_v12 = vpop.permute.xlu0 %1295 }
 0x106   : > { %1045 = vrot.lane.b32.xlu1 %v2823_v61, %s3421_s20  ;;  %v1166_v61 = vrot.slane %v1164_v3, 1  ;;  %v1160_v3 = vsel %vm587_vm1, %v1155_v43, %v1159_v11  ;;  %v2725_v43 = vld [vmem:[%s3648_s21 + $0xb4] sm:$0xf]  ;;  %v1385_v11 = vrot.slane %v2847_v14, 1 }
 0x107   : > { %1029 = vrot.lane.b32.xlu0 %v2815_v29, %s3421_s20  ;;  %v2855_v29 = vcombine.low %v2695_v2, %v4156_v16  ;;  %v2707_v2 = vld [vmem:[%s3648_s21 + $0x48] sm:$0xf]  ;;  %v4276_v53 = vcombine.low %v2725_v43, %v4256_v21  ;;  %v4279_v14 = vld [vmem:[%s3648_s21 + $0xb0] ss:$0 sps:$4 sm:$0x11]  }
 0x108   : > { %v4223_v15 = vpop.permute.xlu1 %1437  ;;  %v1167_v16 = vor.u32 %v1166_v61, %v1162_v27  ;;  %v1386_v61 = vrot.slane %v4200_v47, 1  ;;  %v1765_v43 = vshll.u32 %v4279_v14, 16 }
 0x109   : > { %v4226_v19 = vpop.permute.xlu0 %1421  ;;  %v1409_v17 = vrot.slane %v2855_v29, 1  ;;  %v4271_v29 = vld [vmem:[%s3648_s21 + $0x58] sm:$0xf]  ;;  %v1772_v6 = vshll.u32 %v4276_v53, 16 }
 0x10a   : > { %1047 = vrot.lane.b32.xlu1 %v2824_v40, %s3421_s20  ;;  %v4243_v40 = vcombine.low %v2723_v56, %v4230_v62  ;;  %v1172_v57 = vsel %vm587_vm1, %v1167_v16, %v1171_v7  ;;  %v2709_v56 = vld [vmem:[%s3648_s21 + $0x54] sm:$0xf]  ;;  %v1387_v7 = vsel %vm860_vm0, %v1385_v11, %v1386_v61  ;;  %v1967_v11 = vsel %vm1965_vm3, %v3693_v23, %v4145_v58 }
 0x10b   : > { %1031 = vrot.lane.b32.xlu0 %v2816_v45, %s3421_s20  ;;  %v4249_v45 = vld [vmem:[%s3648_s21 + $0x4c] sm:$0xf]  ;;  %v1411_v47 = vsel %vm860_vm0, %v1409_v17, %v1410_v37  ;;  %v4295_v37 = vld [vmem:[%s3648_s21 + $0x50] ss:$0 sps:$4 sm:$0x11]   ;;  %v1390_v61 = vsel %vm860_vm0, %v1388_v36, %v1389_v46  ;;  %v2016_v58 = vsel %vm1998_vm4, %v1983_v48, %v4102_v60  ;;  %v1770_v36 = vshrl.u32 %v4276_v53, 16 }
 0x10c   : > { %v4239_v1 = vpop.permute.xlu1 %1439  ;;  %v1760_v5 = vshll.u32 %v4243_v40, 16  ;;  %v4267_v42 = vcombine.low %v2707_v2, %v4249_v45  ;;  %v1758_v17 = vshrl.u32 %v4243_v40, 16  ;;  %v1669_v23 = vshll.u32 %v4295_v37, 16  ;;  %v4339_v48 = vld [vmem:[%s3648_s21 + $0xac] sm:$0xf] }
 0x10d   : > { %v4245_v20 = vpop.permute.xlu0 %1423  ;;  %v1774_v46 = vrot.slane %v1772_v6, 1 }
 0x10e   : > { %1317 = vrot.lane.b32.xlu1 %v1256_v34, %s3424_s11  ;;  %v1412_v34 = vrot.slane %v2856_v13, 1  ;;  %v1664_v2 = vshll.u32 %v4267_v42, 16  ;;  %v1762_v13 = vrot.slane %v1760_v5, 1  ;;  %v2759_v5 = vld [vmem:[%s3648_s21 + $0xa8] sm:$0xe]  ;;  %v1662_v59 = vshrl.u32 %v4267_v42, 16 }
 0x10f   : > { %1301 = vrot.lane.b32.xlu0 %v1160_v3, %s3424_s11  ;;  %v4287_v3 = vcombine.low %v2709_v56, %v4271_v29  ;;  %v2903_v60 = vcombine.low %v2759_v5, %v4230_v62  ;;  %v1671_v8 = vrot.slane %v1669_v23, 1 }
 0x110   : > { %v4261_v27 = vpop.permute.xlu1 %1549  ;;  %v1763_v49 = vor.u32 %v1762_v13, %v1758_v17  ;;  %v1666_v10 = vrot.slane %v1664_v2, 1 }
 0x111   : > { %v4273_v41 = vpop.permute.xlu0 %1533  ;;  %v1676_v18 = vshll.u32 %v4287_v3, 16  ;;  %v1674_v17 = vshrl.u32 %v4287_v3, 16 }
 0x112   : > { %1319 = vrot.lane.b32.xlu1 %v1268_v25, %s3424_s11  ;;  %v4306_v25 = vld [vmem:[%s3648_s21 + $0xbc] ss:$0 sps:$4 sm:$0x11]  }
 0x113   : > { %1303 = vrot.lane.b32.xlu0 %v1172_v57, %s3424_s11  ;;  %v1414_v57 = vsel %vm860_vm0, %v1412_v34, %v1413_v4  ;;  %v1767_v4 = vrot.slane %v1765_v43, 1  ;;  %v1777_v2 = vshll.u32 %v4306_v25, 16  ;;  %v1678_v6 = vrot.slane %v1676_v18, 1 }
 0x114   : > { %v4289_v16 = vpop.permute.xlu1 %1551  ;;  %v1681_v43 = vshll.u32 %v4317_v33, 16 }
 0x115   : > { %v4297_v0 = vpop.permute.xlu0 %1535  ;;  %v1768_v18 = vsel %vm587_vm1, %v1763_v49, %v1767_v4 }
 0x116   : > { %1445 = vrot.lane.b32.xlu1 %v1411_v47, %s3425_s18  ;;  %v4320_v47 = vld [vmem:[%s3648_s21 + $0x48] sm:$0xe]  ;;  %v1683_v23 = vrot.slane %v1681_v43, 1 }
 0x117   : > { %1429 = vrot.lane.b32.xlu0 %v1387_v7, %s3425_s18  ;;  %v2000_v7 = vsel %vm1998_vm4, %v1967_v11, %v4113_v22  ;;  %v2895_v13 = vcombine.low %v4320_v47, %v4249_v45  ;;  %v287_v22 = vld [vmem:[%s3648_s21 + $0xa8] sm:$0xf]  ;;  %v2049_v11 = vsel %vm2031_vm5, %v2016_v58, %v4071_v35  ;;  %v1775_v47 = vor.u32 %v1774_v46, %v1770_v36 }
 0x118   : > { %v1822_v56 = vpop.permute.xlu1 %1821  ;;  %v2082_v62 = vsel %vm2064_vm6, %v2049_v11, %v4195_v44  ;;  %v2033_v45 = vsel %vm2031_vm5, %v2000_v7, %v4085_v50  ;;  %v4363_v50 = vcombine.low %v287_v22, %v4339_v48  ;;  %v1898_v7 = vrot.slane %v4295_v37, 1  ;;  %v273_v22 = vld [vmem:[%s3648_s21 + $0x54] sm:$0xf]  ;;  %v4427_v11 = vld [vmem:[%s3648_s21 + $0x58] sm:$0xf] }
 0x119   : > { %v1806_v34 = vpop.permute.xlu0 %1805  ;;  %v2066_v35 = vsel %vm2064_vm6, %v2033_v45, %v4202_v52  ;;  %v1679_v52 = vor.u32 %v1678_v6, %v1674_v17  ;;  %v4415_v6 = vld [vmem:[%s3648_s21 + $0xb8] sm:$0xf] }
 0x11a   : > { %1447 = vrot.lane.b32.xlu1 %v1414_v57, %s3425_s18  ;;  %v2099_v49 = vsel %vm2097_vm7, %v2066_v35, %v4226_v19  ;;  %v4378_v19 = vcombine.low %v271_v32, %v4354_v28  ;;  %v2760_v35 = vld [vmem:[%s3648_s21 + $0xb4] sm:$0xe] }
 0x11b   : > { %1431 = vrot.lane.b32.xlu0 %v1390_v61, %s3425_s18  ;;  %v1667_v61 = vor.u32 %v1666_v10, %v1662_v59  ;;  %v2115_v10 = vsel %vm2097_vm7, %v2082_v62, %v4223_v15  ;;  %v1779_v59 = vrot.slane %v1777_v2, 1  ;;  %v1985_v15 = vsel %vm1965_vm3, %v3700_v31, %v4158_v39  ;;  %v4386_v39 = vld [vmem:[%s3648_s21 + $0xb0] ss:$0 sps:$4 sm:$0x11]  }
 0x11c   : > { %v4343_v57 = vpop.permute.xlu1 %1823  ;;  %v2148_v44 = vsel %vm2130_vm8, %v2115_v10, %v4261_v27  ;;  %v1969_v27 = vsel %vm1965_vm3, %v3706_v38, %v4141_v55  ;;  %v1921_v31 = vrot.slane %v2903_v60, 1  ;;  %v1922_v38 = vrot.slane %v4279_v14, 1  ;;  %v289_v60 = vld [vmem:[%s3648_s21 + $0xb4] sm:$0xf] }
 0x11d   : > { %v4349_v5 = vpop.permute.xlu0 %1807  ;;  %v2181_v58 = vsel %vm2163_vm9, %v2148_v44, %v1822_v56  ;;  %v1672_v32 = vsel %vm587_vm1, %v1667_v61, %v1671_v8  ;;  %v759_v55 = vshll.u32 %v4363_v50, 16  ;;  %v4396_v56 = vld [vmem:[%s3648_s21 + $0x50] ss:$0 sps:$4 sm:$0x11]   ;;  %v1897_v8 = vrot.slane %v2895_v13, 1 }
 0x11e   : > { %1557 = vrot.lane.b32.xlu1 %v4243_v40, %s3426_s5  ;;  %v2132_v40 = vsel %vm2130_vm8, %v2099_v49, %v4273_v41  ;;  %v2002_v2 = vsel %vm1998_vm4, %v1969_v27, %v4134_v9  ;;  %v757_v9 = vshrl.u32 %v4363_v50, 16  ;;  %v764_v43 = vshll.u32 %v4386_v39, 16  ;;  %v2752_v10 = vld [vmem:[%s3648_s21 + $0x54] sm:$0xe] }
 0x11f   : > { %1541 = vrot.lane.b32.xlu0 %v4267_v42, %s3426_s5  ;;  %v2165_v42 = vsel %vm2163_vm9, %v2132_v40, %v1806_v34  ;;  %v2018_v34 = vsel %vm1998_vm4, %v1985_v15, %v4121_v24  ;;  %v1684_v24 = vsel %vm587_vm1, %v1679_v52, %v1683_v23  ;;  %v2035_v37 = vsel %vm2031_vm5, %v2002_v2, %v4182_v26 }
 0x120   : > { %v1950_v4 = vpop.permute.xlu1 %1949  ;;  %v2051_v14 = vsel %vm2031_vm5, %v2018_v34, %v4178_v30  ;;  %v2068_v61 = vsel %vm2064_vm6, %v2035_v37, %v4216_v12  ;;  %v761_v26 = vrot.slane %v759_v55, 1  ;;  %v661_v12 = vshrl.u32 %v4378_v19, 16 }
 0x121   : > { %v1934_v36 = vpop.permute.xlu0 %1933  ;;  %v2214_v46 = vsel %vm2196_vm10, %v2181_v58, %v1950_v4  ;;  %v2084_v30 = vsel %vm2064_vm6, %v2051_v14, %v4213_v63  ;;  %v668_v63 = vshll.u32 %v4396_v56, 16  ;;  %v2101_v45 = vsel %vm2097_vm7, %v2068_v61, %v4245_v20  ;;  %v4465_v4 = vld [vmem:[%s3648_s21 + $0xbc] ss:$0 sps:$4 sm:$0x11]  }
 0x122   : > { %1559 = vrot.lane.b32.xlu1 %v4276_v53, %s3426_s5  ;;  %v2198_v41 = vsel %vm2196_vm10, %v2165_v42, %v1934_v36  ;;  %2974 = vmatprep.mubr.msk.bf16.mxu1 %vm2256_vm11, %v2214_v46  ;;  %v1780_v53 = vsel %vm587_vm1, %v1775_v47, %v1779_v59  ;;  %v2117_v62 = vsel %vm2097_vm7, %v2084_v30, %v4239_v1  ;;  %v766_v58 = vrot.slane %v764_v43, 1  ;;  %v4472_v46 = vld [vmem:[%s3648_s21 + $0x5c] ss:$0 sps:$4 sm:$0x11]   ;;  %v313_v30 = vld [vmem:[%s3648_s21 + $0x48] sm:$0xe] }
 0x123   : > { %1543 = vrot.lane.b32.xlu0 %v4287_v3, %s3426_s5  ;;  %2958 = vmatprep.mubr.msk.bf16.mxu0 %vm2256_vm11, %v2198_v41  ;;  %v663_v3 = vshll.u32 %v4378_v19, 16  ;;  %v2150_v47 = vsel %vm2130_vm8, %v2117_v62, %v4289_v16  ;;  %v4444_v59 = vcombine.low %v289_v60, %v4415_v6  ;;  %v2134_v1 = vsel %vm2130_vm8, %v2101_v45, %v4297_v0 }
 0x124   : > { %v4409_v17 = vpop.permute.xlu1 %800  ;;  %v4451_v16 = vcombine.low %v273_v22, %v4427_v11  ;;  %v2167_v44 = vsel %vm2163_vm9, %v2134_v1, %v4349_v5  ;;  %v2904_v15 = vcombine.low %v2760_v35, %v4256_v21  ;;  %v2896_v0 = vcombine.low %v2752_v10, %v4271_v29  ;;  %v322_v35 = vld [vmem:[%s3648_s21 + $0xb4] sm:$0xe] }
 0x125   : > { %v4421_v13 = vpop.permute.xlu0 %784  ;;  %v665_v20 = vrot.slane %v663_v3, 1  ;;  %v762_v5 = vor.u32 %v761_v26, %v757_v9  ;;  %v771_v21 = vshll.u32 %v4444_v59, 16  ;;  %v1899_v29 = vsel %vm860_vm0, %v1897_v8, %v1898_v7 }
 0x126   : > { %1829 = vrot.lane.b32.xlu1 %v1768_v18, %s3427_s26  ;;  %v2183_v18 = vsel %vm2163_vm9, %v2150_v47, %v4343_v57  ;;  %v1923_v57 = vsel %vm860_vm0, %v1921_v31, %v1922_v38  ;;  %v670_v36 = vrot.slane %v668_v63, 1  ;;  %v675_v41 = vshll.u32 %v4451_v16, 16 }
 0x127   : > { %1813 = vrot.lane.b32.xlu0 %v1672_v32, %s3427_s26  ;;  %v666_v42 = vor.u32 %v665_v20, %v661_v12  ;;  %v1924_v31 = vrot.slane %v2904_v15, 1  ;;  %v1925_v38 = vrot.slane %v4306_v25, 1  ;;  %v1900_v55 = vrot.slane %v2896_v0, 1  ;;  %v314_v12 = vld [vmem:[%s3648_s21 + $0x54] sm:$0xe] }
 0x128   : > { %v1952_v49 = vpop.permute.xlu1 %1951  ;;  %v1901_v34 = vrot.slane %v4317_v33, 1  ;;  %v769_v8 = vshrl.u32 %v4444_v59, 16  ;;  %v773_v7 = vrot.slane %v771_v21, 1  ;;  %v776_v14 = vshll.u32 %v4465_v4, 16  ;;  %v321_v33 = vld [vmem:[%s3648_s21 + $0xa8] sm:$0xe] }
 0x129   : > { %v2216_v52 = vsel %vm2196_vm10, %v2183_v18, %v1952_v49  ;;  %v1936_v23 = vpop.permute.xlu0 %1935  ;;  %v673_v3 = vshrl.u32 %v4451_v16, 16  ;;  %v677_v60 = vrot.slane %v675_v41, 1  ;;  %v680_v25 = vshll.u32 %v4472_v46, 16  ;;  %v2663_v15 = vld [vmem:[%s3648_s21 + $0xb4] sm:$0xf] }
 0x12a   : > { %v2200_v40 = vsel %vm2196_vm10, %v2167_v44, %v1936_v23  ;;  %1831 = vrot.lane.b32.xlu1 %v1780_v53, %s3427_s26  ;;  %2975 = vmatmul.mubr.msk.bf16.vlgmr.msra.gmra.mrb[0].mxu1 %vm2256_vm11, %v2216_v52  ;;  %v767_v53 = vsel %vm587_vm1, %v762_v5, %v766_v58  ;;  %v1926_v9 = vsel %vm860_vm0, %v1924_v31, %v1925_v38  ;;  %v778_v22 = vrot.slane %v776_v14, 1  ;;  %v4517_v0 = vld [vmem:[%s3648_s21 + $0xb8] sm:$0xf]  ;;  %v2665_v41 = vld [vmem:[%s3648_s21 + $0xc0] sm:$0xf] }
 0x12b   : > { %1815 = vrot.lane.b32.xlu0 %v1684_v24, %s3427_s26  ;;  %2959 = vmatmul.mubr.msk.bf16.vlgmr.msra.gmra.mrb[0].mxu0 %vm2256_vm11, %v2200_v40  ;;  %v671_v24 = vsel %vm587_vm1, %v666_v42, %v670_v36  ;;  %v774_v43 = vor.u32 %v773_v7, %v769_v8  ;;  %v2809_v61 = vcombine.low %v321_v33, %v4339_v48  ;;  %v682_v45 = vrot.slane %v680_v25, 1  ;;  %v4537_v31 = vld [vmem:[%s3648_s21 + $0xc4] sm:$0xf]  ;;  %v4553_v7 = vld [vmem:[%s3648_s21 + $0x5c] ss:$0 sps:$4 sm:$0x11]  }
 0x12c   : > { %v4468_v27 = vpop.permute.xlu1 %802  ;;  %v1902_v26 = vsel %vm860_vm0, %v1900_v55, %v1901_v34  ;;  %v678_v63 = vor.u32 %v677_v60, %v673_v3  ;;  %v2801_v47 = vcombine.low %v313_v30, %v4354_v28  ;;  %v904_v18 = vrot.slane %v4386_v39, 1  ;;  %v4523_v39 = vld [vmem:[%s3648_s21 + $0x58] sm:$0xf]  ;;  %v2649_v55 = vld [vmem:[%s3648_s21 + $0x60] sm:$0xf] }
 0x12d   : > { %v4475_v32 = vpop.permute.xlu0 %786  ;;  %v779_v48 = vsel %vm587_vm1, %v774_v43, %v778_v22  ;;  %v903_v1 = vrot.slane %v2809_v61, 1  ;;  %v2810_v49 = vcombine.low %v322_v35, %v4415_v6  ;;  %v880_v52 = vrot.slane %v4396_v56, 1  ;;  %v4543_v34 = vld [vmem:[%s3648_s21 + $0x64] sm:$0xf] }
 0x12e   : > { %1957 = vrot.lane.b32.xlu1 %v1923_v57, %s3428_s10  ;;  %v683_v28 = vsel %vm587_vm1, %v678_v63, %v682_v45  ;;  %v879_v44 = vrot.slane %v2801_v47, 1  ;;  %v2802_v23 = vcombine.low %v314_v12, %v4427_v11  ;;  %v2647_v57 = vld [vmem:[%s3648_s21 + $0x54] sm:$0xf]  ;;  %v907_v11 = vrot.slane %v4465_v4, 1 }
 0x12f   : > { %1941 = vrot.lane.b32.xlu0 %v1899_v29, %s3428_s10  ;;  %v905_v56 = vsel %vm860_vm0, %v903_v1, %v904_v18  ;;  %v906_v6 = vrot.slane %v2810_v49, 1  ;;  %v2825_v5 = vcombine.low %v2663_v15, %v4517_v0  ;;  %v883_v42 = vrot.slane %v4472_v46, 1  ;;  %v4547_v4 = vld [vmem:[%s3648_s21 + $0xbc] ss:$0 sps:$4 sm:$0x11]  }
 0x130   : > { %v4484_v2 = vpop.permute.xlu1 %929  ;;  %v881_v21 = vsel %vm860_vm0, %v879_v44, %v880_v52  ;;  %v882_v29 = vrot.slane %v2802_v23, 1  ;;  %v2817_v36 = vcombine.low %v2647_v57, %v4523_v39  ;;  %v2826_v46 = vcombine.low %v2665_v41, %v4537_v31  ;;  %v4566_v22 = vld [vmem:[%s3648_s21 + $0xc8] ss:$0 sps:$4 sm:$0x11]  }
 0x131   : > { %v4490_v37 = vpop.permute.xlu0 %913  ;;  %v1272_v8 = vshll.u32 %v2825_v5, 16  ;;  %v2818_v3 = vcombine.low %v2649_v55, %v4543_v34  ;;  %v1270_v33 = vshrl.u32 %v2825_v5, 16  ;;  %v1277_v30 = vshll.u32 %v4547_v4, 16  ;;  %v4571_v47 = vld [vmem:[%s3648_s21 + $0x68] ss:$0 sps:$4 sm:$0x11]  }
 0x132   : > { %808 = vrot.lane.b32.xlu1 %v767_v53, %s3423_s24  ;;  %v908_v53 = vsel %vm860_vm0, %v906_v6, %v907_v11  ;;  %v1176_v60 = vshll.u32 %v2817_v36, 16  ;;  %v1181_v43 = vshll.u32 %v4553_v7, 16  ;;  %v1284_v61 = vshll.u32 %v2826_v46, 16  ;;  %v2697_v6 = vld [vmem:[%s3648_s21 + $0xb4] sm:$0xe] }
 0x133   : > { %792 = vrot.lane.b32.xlu0 %v671_v24, %s3423_s24  ;;  %v884_v24 = vsel %vm860_vm0, %v882_v29, %v883_v42  ;;  %v1174_v63 = vshrl.u32 %v2817_v36, 16  ;;  %v1188_v35 = vshll.u32 %v2818_v3, 16  ;;  %v1282_v1 = vshrl.u32 %v2826_v46, 16 }
 0x134   : > { %v4497_v62 = vpop.permute.xlu1 %931  ;;  %v1178_v45 = vrot.slane %v1176_v60, 1  ;;  %v1183_v49 = vrot.slane %v1181_v43, 1  ;;  %v1289_v44 = vshll.u32 %v4566_v22, 16  ;;  %v1186_v15 = vshrl.u32 %v2818_v3, 16  ;;  %v2698_v60 = vld [vmem:[%s3648_s21 + $0xc0] sm:$0xe] }
 0x135   : > { %v4502_v10 = vpop.permute.xlu0 %915  ;;  %v1190_v57 = vrot.slane %v1188_v35, 1  ;;  %v2858_v43 = vcombine.low %v2698_v60, %v4537_v31  ;;  %v1392_v35 = vrot.slane %v4553_v7, 1  ;;  %v2729_v31 = vld [vmem:[%s3648_s21 + $0xcc] sm:$0xf] }
 0x136   : > { %1959 = vrot.lane.b32.xlu1 %v1926_v9, %s3428_s10  ;;  %v1274_v9 = vrot.slane %v1272_v8, 1  ;;  %v1179_v23 = vor.u32 %v1178_v45, %v1174_v63  ;;  %v1291_v42 = vrot.slane %v1289_v44, 1  ;;  %v1419_v44 = vrot.slane %v4566_v22, 1  ;;  %v4643_v22 = vld [vmem:[%s3648_s21 + $0x68] ss:$0 sps:$4 sm:$0x11]  }
 0x137   : > { %1943 = vrot.lane.b32.xlu0 %v1902_v26, %s3428_s10 }
 0x138   : > { %v4510_v20 = vpop.permute.xlu1 %1041  ;;  %v1275_v18 = vor.u32 %v1274_v9, %v1270_v33  ;;  %v1184_v55 = vsel %vm587_vm1, %v1179_v23, %v1183_v49  ;;  %v2711_v49 = vld [vmem:[%s3648_s21 + $0x60] sm:$0xf]  ;;  %v4627_v23 = vld [vmem:[%s3648_s21 + $0xc8] ss:$0 sps:$4 sm:$0x11]  }
 0x139   : > { %v4519_v40 = vpop.permute.xlu0 %1025 }
 0x13a   : > { %810 = vrot.lane.b32.xlu1 %v779_v48, %s3423_s24  ;;  %v1279_v48 = vrot.slane %v1277_v30, 1  ;;  %v4600_v30 = vld [vmem:[%s3648_s21 + $0xc4] sm:$0xf] }
 0x13b   : > { %794 = vrot.lane.b32.xlu0 %v683_v28, %s3423_s24  ;;  %v1286_v28 = vrot.slane %v1284_v61, 1 }
 0x13c   : > { %v4530_v58 = vpop.permute.xlu1 %1043 }
 0x13d   : > { %v4539_v38 = vpop.permute.xlu0 %1027  ;;  %v1287_v29 = vor.u32 %v1286_v28, %v1282_v1  ;;  %v4621_v28 = vld [vmem:[%s3648_s21 + $0xd0] sm:$0xf] }
 0x13e   : > { %937 = vrot.lane.b32.xlu1 %v905_v56, %s3422_s22  ;;  %v1193_v56 = vshll.u32 %v4571_v47, 16 }
 0x13f   : > { %921 = vrot.lane.b32.xlu0 %v881_v21, %s3422_s22  ;;  %v1280_v21 = vsel %vm587_vm1, %v1275_v18, %v1279_v48 }
 0x140   : > { %v4555_v14 = vpop.permute.xlu1 %1313  ;;  %v1195_v8 = vrot.slane %v1193_v56, 1 }
 0x141   : > { %v4559_v25 = vpop.permute.xlu0 %1297 }
 0x142   : > { %939 = vrot.lane.b32.xlu1 %v908_v53, %s3422_s22  ;;  %v1191_v53 = vor.u32 %v1190_v57, %v1186_v15 }
 0x143   : > { %923 = vrot.lane.b32.xlu0 %v884_v24, %s3422_s22 }
 0x144   : > { %v4568_v26 = vpop.permute.xlu1 %1315  ;;  %v1196_v63 = vsel %vm587_vm1, %v1191_v53, %v1195_v8  ;;  %v1789_v8 = vshll.u32 %v4627_v23, 16 }
 0x145   : > { %v4573_v12 = vpop.permute.xlu0 %1299 }
 0x146   : > { %1049 = vrot.lane.b32.xlu1 %v2825_v5, %s3421_s20  ;;  %v2689_v5 = vld [vmem:[%s3648_s21 + $0x54] sm:$0xe] }
 0x147   : > { %1033 = vrot.lane.b32.xlu0 %v2817_v36, %s3421_s20  ;;  %v2857_v36 = vcombine.low %v2697_v6, %v4517_v0  ;;  %v2849_v24 = vcombine.low %v2689_v5, %v4523_v39  ;;  %v1292_v0 = vsel %vm587_vm1, %v1287_v29, %v1291_v42  ;;  %v1416_v39 = vrot.slane %v4547_v4, 1  ;;  %v4616_v4 = vld [vmem:[%s3648_s21 + $0x64] sm:$0xf]  ;;  %v4636_v29 = vld [vmem:[%s3648_s21 + $0x70] sm:$0xf] }
 0x148   : > { %v4578_v52 = vpop.permute.xlu1 %1441  ;;  %v1395_v6 = vrot.slane %v4571_v47, 1  ;;  %v2865_v5 = vcombine.low %v2711_v49, %v4616_v4 }
 0x149   : > { %v4582_v11 = vpop.permute.xlu0 %1425  ;;  %v1415_v9 = vrot.slane %v2857_v36, 1  ;;  %v1391_v45 = vrot.slane %v2849_v24, 1  ;;  %v2874_v36 = vcombine.low %v2729_v31, %v4621_v28  ;;  %v1791_v31 = vrot.slane %v1789_v8, 1 }
 0x14a   : > { %1051 = vrot.lane.b32.xlu1 %v2826_v46, %s3421_s20  ;;  %v2690_v46 = vld [vmem:[%s3648_s21 + $0x60] sm:$0xe] }
 0x14b   : > { %1035 = vrot.lane.b32.xlu0 %v2818_v3, %s3421_s20  ;;  %v2727_v3 = vld [vmem:[%s3648_s21 + $0xc0] sm:$0xf]  ;;  %v2850_v48 = vcombine.low %v2690_v46, %v4543_v34  ;;  %v1417_v7 = vsel %vm860_vm0, %v1415_v9, %v1416_v39  ;;  %v1418_v34 = vrot.slane %v2858_v43, 1  ;;  %v1393_v57 = vsel %vm860_vm0, %v1391_v45, %v1392_v35  ;;  %v4658_v35 = vld [vmem:[%s3648_s21 + $0xd4] ss:$0 sps:$4 sm:$0x11]  }
 0x14c   : > { %v4589_v41 = vpop.permute.xlu1 %1443  ;;  %v2873_v18 = vcombine.low %v2727_v3, %v4600_v30  ;;  %v1688_v46 = vshll.u32 %v2865_v5, 16  ;;  %v1796_v39 = vshll.u32 %v2874_v36, 16  ;;  %v1987_v43 = vsel %vm1965_vm3, %v3841_v51, %v4409_v17  ;;  %s3429_s20 = smov [#allocation8]  }
 0x14d   : > { %v4594_v33 = vpop.permute.xlu0 %1427  ;;  %v1394_v56 = vrot.slane %v2850_v48, 1  ;;  %v1420_v53 = vsel %vm860_vm0, %v1418_v34, %v1419_v44  ;;  %v1693_v45 = vshll.u32 %v4643_v22, 16  ;;  %v1971_v48 = vsel %vm1965_vm3, %v3844_v54, %v4421_v13  ;;  %s3332_s24 = sshll.u32 %s3429_s20, 4  ;;  %s3333_s24 = int_to_ptr.vmem [resolvable:$false] %s3332_s24 }
 0x14e   : > { %1321 = vrot.lane.b32.xlu1 %v1280_v21, %s3424_s11  ;;  %v2713_v21 = vld [vmem:[%s3648_s21 + $0x6c] sm:$0xf]  ;;  %v2020_v49 = vsel %vm1998_vm4, %v1987_v43, %v4484_v2  ;;  %v2004_v17 = vsel %vm1998_vm4, %v1971_v48, %v4490_v37  ;;  %v1794_v54 = vshrl.u32 %v2874_v36, 16  ;;  %v2753_v48 = vld [vmem:[%s3648_s21 + $0x60] sm:$0xe]  ;;  %p3335_p3 = scmp.lt.s32.totalorder %s4927_s28, %s3333_s24 }
 0x14f   : > { %1305 = vrot.lane.b32.xlu0 %v1184_v55, %s3424_s11  ;;  %v1784_v55 = vshll.u32 %v2873_v18, 16  ;;  %v4648_v47 = vcombine.low %v2713_v21, %v4636_v29  ;;  %v1396_v60 = vsel %vm860_vm0, %v1394_v56, %v1395_v6  ;;  %v2053_v34 = vsel %vm2031_vm5, %v2020_v49, %v4510_v20  ;;  %v5010_v49 = vld [vmem:[#allocation12_spill] sm:$0xff] }
 0x150   : > { %v4606_v61 = vpop.permute.xlu1 %1553  ;;  %v2037_v13 = vsel %vm2031_vm5, %v2004_v17, %v4519_v40  ;;  %v2086_v2 = vsel %vm2064_vm6, %v2053_v34, %v4555_v14  ;;  %v1798_v21 = vrot.slane %v1796_v39, 1  ;;  %v2762_v17 = vld [vmem:[%s3648_s21 + $0xcc] sm:$0xe] }
 0x151   : > { %v4611_v1 = vpop.permute.xlu0 %1537  ;;  %v1786_v9 = vrot.slane %v1784_v55, 1  ;;  %v1700_v51 = vshll.u32 %v4648_v47, 16  ;;  %v2070_v37 = vsel %vm2064_vm6, %v2037_v13, %v4559_v25  ;;  %v2119_v20 = vsel %vm2097_vm7, %v2086_v2, %v4578_v52 }
 0x152   : > { %1323 = vrot.lane.b32.xlu1 %v1292_v0, %s3424_s11  ;;  %v1782_v0 = vshrl.u32 %v2873_v18, 16  ;;  %v1801_v55 = vshll.u32 %v4658_v35, 16  ;;  %v2103_v40 = vsel %vm2097_vm7, %v2070_v37, %v4582_v11  ;;  %v2152_v14 = vsel %vm2130_vm8, %v2119_v20, %v4606_v61 }
 0x153   : > { %1307 = vrot.lane.b32.xlu0 %v1196_v63, %s3424_s11  ;;  %v1686_v63 = vshrl.u32 %v2865_v5, 16  ;;  %v1702_v8 = vrot.slane %v1700_v51, 1  ;;  %v2136_v52 = vsel %vm2130_vm8, %v2103_v40, %v4611_v1  ;;  %v1989_v51 = vsel %vm1965_vm3, %v5010_v49, %v4468_v27  ;;  %s3334_s11 = scalar_lea.vmem %s3333_s24, 8192 }
 0x154   : > { %v4629_v15 = vpop.permute.xlu1 %1555  ;;  %v1787_v6 = vor.u32 %v1786_v9, %v1782_v0  ;;  %v1695_v9 = vrot.slane %v1693_v45, 1  ;;  %v1928_v2 = vrot.slane %v4627_v23, 1 }
 0x155   : > { %v4638_v42 = vpop.permute.xlu0 %1539 }
 0x156   : > { %1449 = vrot.lane.b32.xlu1 %v1417_v7, %s3425_s18  ;;  %v4667_v7 = vld [vmem:[%s3648_s21 + $0x74] ss:$0 sps:$4 sm:$0x11]   ;;  %v1792_v61 = vsel %vm587_vm1, %v1787_v6, %v1791_v31  ;;  %v2022_v31 = vsel %vm1998_vm4, %v1989_v51, %v4497_v62  ;;  %v2897_v62 = vcombine.low %v2753_v48, %v4616_v4  ;;  %v2754_v6 = vld [vmem:[%s3648_s21 + $0x6c] sm:$0xe]  ;;  %v2906_v4 = vcombine.low %v2762_v17, %v4621_v28 }
 0x157   : > { %1433 = vrot.lane.b32.xlu0 %v1393_v57, %s3425_s18  ;;  %v1690_v57 = vrot.slane %v1688_v46, 1  ;;  %v1705_v25 = vshll.u32 %v4667_v7, 16  ;;  %v2898_v28 = vcombine.low %v2754_v6, %v4636_v29  ;;  %v1931_v29 = vrot.slane %v4658_v35, 1 }
 0x158   : > { %v1826_v24 = vpop.permute.xlu1 %1825 }
 0x159   : > { %v1810_v3 = vpop.permute.xlu0 %1809  ;;  %v1691_v0 = vor.u32 %v1690_v57, %v1686_v63  ;;  %v5011_v63 = vld [vmem:[#allocation13_spill] sm:$0xff] }
 0x15a   : > { %1451 = vrot.lane.b32.xlu1 %v1420_v53, %s3425_s18  ;;  %v1698_v53 = vshrl.u32 %v4648_v47, 16  ;;  %v2169_v11 = vsel %vm2163_vm9, %v2136_v52, %v1810_v3  ;;  %v1973_v45 = vsel %vm1965_vm3, %v5011_v63, %v4475_v32 }
 0x15b   : > { %1435 = vrot.lane.b32.xlu0 %v1396_v60, %s3425_s18  ;;  %v2761_v60 = vld [vmem:[%s3648_s21 + $0xc0] sm:$0xe]  ;;  %v2006_v34 = vsel %vm1998_vm4, %v1973_v45, %v4502_v10  ;;  %v1696_v32 = vsel %vm587_vm1, %v1691_v0, %v1695_v9  ;;  %v1904_v10 = vrot.slane %v4643_v22, 1  ;;  %s3328_s21 = scalar_lea.vmem %s4927_s28, 4096 }
 0x15c   : > { %v4674_v44 = vpop.permute.xlu1 %1827  ;;  %v2905_v3 = vcombine.low %v2761_v60, %v4600_v30  ;;  %v1703_v27 = vor.u32 %v1702_v8, %v1698_v53  ;;  %v2055_v30 = vsel %vm2031_vm5, %v2022_v31, %v4530_v58  ;;  %v1906_v8 = vrot.slane %v2898_v28, 1  ;;  %p3329_p8 = scmp.ne.s32.totalorder %s4927_s28, %s3328_s21  ;;  %p3336_p5 = scmp.lt.s32.totalorder %s3334_s11, %s3328_s21 }
 0x15d   : > { %v4680_v56 = vpop.permute.xlu0 %1811 }
 0x15e   : > { %1561 = vrot.lane.b32.xlu1 %v2873_v18, %s3426_s5  ;;  %v2185_v18 = vsel %vm2163_vm9, %v2152_v14, %v1826_v24  ;;  %v1803_v24 = vrot.slane %v1801_v55, 1  ;;  %v1903_v55 = vrot.slane %v2897_v62, 1  ;;  %p3330_p1 = pnand %p3329_p8, %p5016_p12  ;;  %p3337_p9 = por %p3336_p5, %p3335_p3 }
 0x15f   : > { %1545 = vrot.lane.b32.xlu0 %v2865_v5, %s3426_s5  ;;  %v1799_v5 = vor.u32 %v1798_v21, %v1794_v54  ;;  %v2088_v54 = vsel %vm2064_vm6, %v2055_v30, %v4568_v26 }
 0x160   : > { %v1954_v46 = vpop.permute.xlu1 %1953  ;;  %v2121_v21 = vsel %vm2097_vm7, %v2088_v54, %v4589_v41  ;;  %p3331_p10 = pneg %p3330_p1 }
 0x161   : > { %v2218_v39 = vsel %vm2196_vm10, %v2185_v18, %v1954_v46  ;;  %v1938_v43 = vpop.permute.xlu0 %1937  ;;  %v2154_v23 = vsel %vm2130_vm8, %v2121_v21, %v4629_v15 }
 0x162   : > { %v2202_v1 = vsel %vm2196_vm10, %v2169_v11, %v1938_v43  ;;  %1563 = vrot.lane.b32.xlu1 %v2874_v36, %s3426_s5  ;;  %2978 = vmatprep.mubr.msk.bf16.mxu1 %vm2256_vm11, %v2218_v39  ;;  %v1707_v36 = vrot.slane %v1705_v25, 1  ;;  %v2187_v37 = vsel %vm2163_vm9, %v2154_v23, %v4674_v44  ;;  %v1930_v44 = vrot.slane %v2906_v4, 1  ;;  %p3338_p2 = pnand %p3337_p9, %p3331_p10 }
 0x163   : > { %1547 = vrot.lane.b32.xlu0 %v4648_v47, %s3426_s5  ;;  %2962 = vmatprep.mubr.msk.bf16.mxu0 %vm2256_vm11, %v2202_v1  ;;  %v2039_v47 = vsel %vm2031_vm5, %v2006_v34, %v4539_v38  ;;  %v1804_v38 = vsel %vm587_vm1, %v1799_v5, %v1803_v24  ;;  %v1907_v25 = vrot.slane %v4667_v7, 1  ;;  %v5012_v34 = vld [vmem:[#allocation14_spill] sm:$0xff] }
 0x164   : > { %v4723_v57 = vpop.permute.xlu1 %804  ;;  %v2072_v58 = vsel %vm2064_vm6, %v2039_v47, %v4573_v12  ;;  %v1708_v22 = vsel %vm587_vm1, %v1703_v27, %v1707_v36  ;;  %v1927_v12 = vrot.slane %v2905_v3, 1  ;;  %v1932_v52 = vsel %vm860_vm0, %v1930_v44, %v1931_v29 }
 0x165   : > { %v4731_v13 = vpop.permute.xlu0 %788  ;;  %v2105_v26 = vsel %vm2097_vm7, %v2072_v58, %v4594_v33  ;;  %v1908_v46 = vsel %vm860_vm0, %v1906_v8, %v1907_v25  ;;  %v1991_v30 = vsel %vm1965_vm3, %v5012_v34, %v4723_v57 }
 0x166   : > { %1833 = vrot.lane.b32.xlu1 %v1792_v61, %s3427_s26  ;;  %v2138_v41 = vsel %vm2130_vm8, %v2105_v26, %v4638_v42  ;;  %v1929_v42 = vsel %vm860_vm0, %v1927_v12, %v1928_v2 }
 0x167   : > { %1817 = vrot.lane.b32.xlu0 %v1696_v32, %s3427_s26  ;;  %v2171_v33 = vsel %vm2163_vm9, %v2138_v41, %v4680_v56  ;;  %v1905_v56 = vsel %vm860_vm0, %v1903_v55, %v1904_v10  ;;  %v5013_v32 = vld [vmem:[#allocation15_spill] sm:$0xff] }
 0x168   : > { %v1956_v20 = vpop.permute.xlu1 %1955  ;;  %v1975_v62 = vsel %vm1965_vm3, %v5013_v32, %v4731_v13 }
 0x169   : > { %v2220_v15 = vsel %vm2196_vm10, %v2187_v37, %v1956_v20  ;;  %v1940_v53 = vpop.permute.xlu0 %1939  ;;  %v5014_v20 = vld [vmem:[#allocation16_spill] sm:$0xff] }
 0x16a   : > { %v2204_v40 = vsel %vm2196_vm10, %v2171_v33, %v1940_v53  ;;  %1835 = vrot.lane.b32.xlu1 %v1804_v38, %s3427_s26  ;;  %2979 = vmatmul.mubr.msk.bf16.gmra.mrb[4].mxu1 %vm2256_vm11, %v2220_v15  ;;  %v5015_v33 = vld [vmem:[#allocation17_spill] sm:$0xff] }
 0x16b   : > { %1819 = vrot.lane.b32.xlu0 %v1708_v22, %s3427_s26  ;;  %2963 = vmatmul.mubr.msk.bf16.gmra.mrb[4].mxu0 %vm2256_vm11, %v2204_v40 }
 0x16c   : > { %v807_v14 = vpop.permute.xlu1 %806 }
 0x16d   : > { %v791_v60 = vpop.permute.xlu0 %790  ;;  %v1993_v55 = vsel %vm1965_vm3, %v5014_v20, %v807_v14 }
 0x16e   : > { %1961 = vrot.lane.b32.xlu1 %v1929_v42, %s3428_s10  ;;  %v1977_v15 = vsel %vm1965_vm3, %v5015_v33, %v791_v60 }
 0x16f   : > { %1945 = vrot.lane.b32.xlu0 %v1905_v56, %s3428_s10 }
 0x170   : > { %v934_v18 = vpop.permute.xlu1 %933 }
 0x171   : > { %v918_v0 = vpop.permute.xlu0 %917  ;;  %v2024_v47 = vsel %vm1998_vm4, %v1991_v30, %v934_v18 }
 0x172   : > { %1963 = vrot.lane.b32.xlu1 %v1932_v52, %s3428_s10  ;;  %v2008_v54 = vsel %vm1998_vm4, %v1975_v62, %v918_v0 }
 0x173   : > { %1947 = vrot.lane.b32.xlu0 %v1908_v46, %s3428_s10 }
 0x174   : > { %v936_v35 = vpop.permute.xlu1 %935 }
 0x175   : > { %v920_v9 = vpop.permute.xlu0 %919  ;;  %v2026_v53 = vsel %vm1998_vm4, %v1993_v55, %v936_v35 }
 0x176   : > { %v2010_v40 = vsel %vm1998_vm4, %v1977_v15, %v920_v9 }
 0x178   : > { %v1046_v11 = vpop.permute.xlu1 %1045 }
 0x179   : > { %v1030_v39 = vpop.permute.xlu0 %1029  ;;  %v2057_v2 = vsel %vm2031_vm5, %v2024_v47, %v1046_v11 }
 0x17a   : > { %v2041_v6 = vsel %vm2031_vm5, %v2008_v54, %v1030_v39 }
 0x17c   : > { %v1048_v7 = vpop.permute.xlu1 %1047 }
 0x17d   : > { %v1032_v43 = vpop.permute.xlu0 %1031  ;;  %v2059_v42 = vsel %vm2031_vm5, %v2026_v53, %v1048_v7 }
 0x17e   : > { %v2043_v29 = vsel %vm2031_vm5, %v2010_v40, %v1032_v43 }
 0x180   : > { %v1318_v61 = vpop.permute.xlu1 %1317 }
 0x181   : > { %v1302_v5 = vpop.permute.xlu0 %1301  ;;  %v2090_v58 = vsel %vm2064_vm6, %v2057_v2, %v1318_v61 }
 0x182   : > { %v2074_v38 = vsel %vm2064_vm6, %v2041_v6, %v1302_v5 }
 0x184   : > { %v1320_v48 = vpop.permute.xlu1 %1319 }
 0x185   : > { %v1304_v49 = vpop.permute.xlu0 %1303  ;;  %v2092_v14 = vsel %vm2064_vm6, %v2059_v42, %v1320_v48 }
 0x186   : > { %v2076_v8 = vsel %vm2064_vm6, %v2043_v29, %v1304_v49 }
 0x188   : > { %v1446_v51 = vpop.permute.xlu1 %1445 }
 0x189   : > { %v1430_v1 = vpop.permute.xlu0 %1429  ;;  %v2123_v57 = vsel %vm2097_vm7, %v2090_v58, %v1446_v51 }
 0x18a   : > { %v2107_v4 = vsel %vm2097_vm7, %v2074_v38, %v1430_v1 }
 0x18c   : > { %v1448_v24 = vpop.permute.xlu1 %1447 }
 0x18d   : > { %v1432_v3 = vpop.permute.xlu0 %1431  ;;  %v2125_v25 = vsel %vm2097_vm7, %v2092_v14, %v1448_v24 }
 0x18e   : > { %v2109_v60 = vsel %vm2097_vm7, %v2076_v8, %v1432_v3 }
 0x190   : > { %v1558_v63 = vpop.permute.xlu1 %1557 }
 0x191   : > { %v1542_v45 = vpop.permute.xlu0 %1541  ;;  %v2156_v13 = vsel %vm2130_vm8, %v2123_v57, %v1558_v63 }
 0x192   : > { %v2140_v26 = vsel %vm2130_vm8, %v2107_v4, %v1542_v45 }
 0x194   : > { %v1560_v31 = vpop.permute.xlu1 %1559 }
 0x195   : > { %v1544_v27 = vpop.permute.xlu0 %1543  ;;  %v2158_v52 = vsel %vm2130_vm8, %v2125_v25, %v1560_v31 }
 0x196   : > { %v2142_v18 = vsel %vm2130_vm8, %v2109_v60, %v1544_v27 }
 0x198   : > { %v1830_v36 = vpop.permute.xlu1 %1829 }
 0x199   : > { %v1814_v17 = vpop.permute.xlu0 %1813  ;;  %v2189_v23 = vsel %vm2163_vm9, %v2156_v13, %v1830_v36 }
 0x19a   : > { %v2173_v12 = vsel %vm2163_vm9, %v2140_v26, %v1814_v17 }
 0x19c   : > { %v1832_v10 = vpop.permute.xlu1 %1831 }
 0x19d   : > { %v1816_v21 = vpop.permute.xlu0 %1815  ;;  %v2191_v46 = vsel %vm2163_vm9, %v2158_v52, %v1832_v10 }
 0x19e   : > { %v2175_v35 = vsel %vm2163_vm9, %v2142_v18, %v1816_v21 }
 0x1a0   : > { %v1958_v22 = vpop.permute.xlu1 %1957 }
 0x1a1   : > { %v2222_v41 = vsel %vm2196_vm10, %v2189_v23, %v1958_v22  ;;  %v1942_v37 = vpop.permute.xlu0 %1941 }
 0x1a2   : > { %v2206_v28 = vsel %vm2196_vm10, %v2173_v12, %v1942_v37  ;;  %2982 = vmatprep.mubr.msk.bf16.mxu1 %vm2256_vm11, %v2222_v41 }
 0x1a3   : > { %2966 = vmatprep.mubr.msk.bf16.mxu0 %vm2256_vm11, %v2206_v28 }
 0x1a4   : > { %v809_v44 = vpop.permute.xlu1 %808 }
 0x1a5   : > { %v793_v56 = vpop.permute.xlu0 %792  ;;  %v1995_v6 = vsel %vm1965_vm3, %v4363_v50, %v809_v44 }
 0x1a6   : > { %v1979_v58 = vsel %vm1965_vm3, %v4378_v19, %v793_v56 }
 0x1a8   : > { %v1960_v0 = vpop.permute.xlu1 %1959 }
 0x1a9   : > { %v2224_v9 = vsel %vm2196_vm10, %v2191_v46, %v1960_v0  ;;  %v1944_v11 = vpop.permute.xlu0 %1943 }
 0x1aa   : > { %v2208_v39 = vsel %vm2196_vm10, %v2175_v35, %v1944_v11  ;;  %2983 = vmatmul.mubr.msk.bf16.gmra.mrb[8].mxu1 %vm2256_vm11, %v2224_v9  ;;  %v4855_v11 = vld [vmem:[#allocation7] ss:$0 sm:$0xff] }
 0x1ab   : > { %2967 = vmatmul.mubr.msk.bf16.gmra.mrb[8].mxu0 %vm2256_vm11, %v2208_v39 }
 0x1ac   : > { %v811_v7 = vpop.permute.xlu1 %810 }
 0x1ad   : > { %v795_v43 = vpop.permute.xlu0 %794  ;;  %v1997_v22 = vsel %vm1965_vm3, %v4444_v59, %v811_v7 }
 0x1ae   : > { %v1981_v19 = vsel %vm1965_vm3, %v4451_v16, %v795_v43 }
 0x1b0   : > { %v938_v61 = vpop.permute.xlu1 %937 }
 0x1b1   : > { %v922_v5 = vpop.permute.xlu0 %921  ;;  %v2028_v21 = vsel %vm1998_vm4, %v1995_v6, %v938_v61 }
 0x1b2   : > { %v2012_v38 = vsel %vm1998_vm4, %v1979_v58, %v922_v5 }
 0x1b4   : > { %v940_v48 = vpop.permute.xlu1 %939 }
 0x1b5   : > { %v924_v49 = vpop.permute.xlu0 %923  ;;  %v2030_v41 = vsel %vm1998_vm4, %v1997_v22, %v940_v48 }
 0x1b6   : > { %v2014_v55 = vsel %vm1998_vm4, %v1981_v19, %v924_v49 }
 0x1b8   : > { %v1050_v51 = vpop.permute.xlu1 %1049 }
 0x1b9   : > { %v1034_v1 = vpop.permute.xlu0 %1033  ;;  %v2061_v57 = vsel %vm2031_vm5, %v2028_v21, %v1050_v51 }
 0x1ba   : > { %v2045_v13 = vsel %vm2031_vm5, %v2012_v38, %v1034_v1 }
 0x1bc   : > { %v1052_v24 = vpop.permute.xlu1 %1051 }
 0x1bd   : > { %v1036_v3 = vpop.permute.xlu0 %1035  ;;  %v2063_v28 = vsel %vm2031_vm5, %v2030_v41, %v1052_v24 }
 0x1be   : > { %v2047_v53 = vsel %vm2031_vm5, %v2014_v55, %v1036_v3 }
 0x1c0   : > { %v1322_v63 = vpop.permute.xlu1 %1321 }
 0x1c1   : > { %v1306_v45 = vpop.permute.xlu0 %1305  ;;  %v2094_v26 = vsel %vm2064_vm6, %v2061_v57, %v1322_v63 }
 0x1c2   : > { %v2078_v50 = vsel %vm2064_vm6, %v2045_v13, %v1306_v45 }
 0x1c4   : > { %v1324_v31 = vpop.permute.xlu1 %1323 }
 0x1c5   : > { %v1308_v27 = vpop.permute.xlu0 %1307  ;;  %v2096_v40 = vsel %vm2064_vm6, %v2063_v28, %v1324_v31 }
 0x1c6   : > { %v2080_v29 = vsel %vm2064_vm6, %v2047_v53, %v1308_v27 }
 0x1c8   : > { %v1450_v36 = vpop.permute.xlu1 %1449 }
 0x1c9   : > { %v1434_v17 = vpop.permute.xlu0 %1433  ;;  %v2127_v12 = vsel %vm2097_vm7, %v2094_v26, %v1450_v36 }
 0x1ca   : > { %v2111_v37 = vsel %vm2097_vm7, %v2078_v50, %v1434_v17 }
 0x1cc   : > { %v1452_v34 = vpop.permute.xlu1 %1451 }
 0x1cd   : > { %v1436_v30 = vpop.permute.xlu0 %1435  ;;  %v2129_v14 = vsel %vm2097_vm7, %v2096_v40, %v1452_v34 }
 0x1ce   : > { %v2113_v8 = vsel %vm2097_vm7, %v2080_v29, %v1436_v30 }
 0x1d0   : > { %v1562_v32 = vpop.permute.xlu1 %1561 }
 0x1d1   : > { %v1546_v62 = vpop.permute.xlu0 %1545  ;;  %v2160_v20 = vsel %vm2130_vm8, %v2127_v12, %v1562_v32 }
 0x1d2   : > { %v2144_v33 = vsel %vm2130_vm8, %v2111_v37, %v1546_v62 }
 0x1d4   : > { %v1564_v47 = vpop.permute.xlu1 %1563 }
 0x1d5   : > { %v1548_v54 = vpop.permute.xlu0 %1547  ;;  %v2162_v25 = vsel %vm2130_vm8, %v2129_v14, %v1564_v47 }
 0x1d6   : > { %v2146_v60 = vsel %vm2130_vm8, %v2113_v8, %v1548_v54 }
 0x1d8   : > { %v1834_v2 = vpop.permute.xlu1 %1833 }
 0x1d9   : > { %v1818_v10 = vpop.permute.xlu0 %1817  ;;  %v2193_v59 = vsel %vm2163_vm9, %v2160_v20, %v1834_v2 }
 0x1da   : > { %v2177_v16 = vsel %vm2163_vm9, %v2144_v33, %v1818_v10 }
 0x1dc   : > { %v1836_v4 = vpop.permute.xlu1 %1835 }
 0x1dd   : > { %v1820_v23 = vpop.permute.xlu0 %1819  ;;  %v2195_v52 = vsel %vm2163_vm9, %v2162_v25, %v1836_v4 }
 0x1de   : > { %v2179_v46 = vsel %vm2163_vm9, %v2146_v60, %v1820_v23 }
 0x1e0   : > { %v1962_v15 = vpop.permute.xlu1 %1961 }
 0x1e1   : > { %v2226_v42 = vsel %vm2196_vm10, %v2193_v59, %v1962_v15  ;;  %v1946_v44 = vpop.permute.xlu0 %1945 }
 0x1e2   : > { %v2210_v56 = vsel %vm2196_vm10, %v2177_v16, %v1946_v44  ;;  %2986 = vmatprep.mubr.msk.bf16.mxu1 %vm2256_vm11, %v2226_v42 }
 0x1e3   : > { %2970 = vmatprep.mubr.msk.bf16.mxu0 %vm2256_vm11, %v2210_v56 }
 0x1e4   : > { %v1964_v18 = vpop.permute.xlu1 %1963 }
 0x1e5   : > { %v2228_v0 = vsel %vm2196_vm10, %v2195_v52, %v1964_v18  ;;  %v1948_v35 = vpop.permute.xlu0 %1947 }
 0x1e6   : > { %v2212_v9 = vsel %vm2196_vm10, %v2179_v46, %v1948_v35  ;;  %2987 = vmatmul.mubr.msk.bf16.gmra.mrb[12].mxu1 %vm2256_vm11, %v2228_v0 }
 0x1e7   : > { %2971 = vmatmul.mubr.msk.bf16.gmra.mrb[12].mxu0 %vm2256_vm11, %v2212_v9 }
 0x1fd   : > { %v2976_v39 = vpop.f32.mrb[0].mxu1 }
 0x1fe   : > { %v2960_v7 = vpop.f32.mrb[0].mxu0  ;;  %v2400_v43 = vadd.f32 %v2976_v39, %v4855_v11  ;;  %v2391_v61 = vpop.f32.mrb[1].mxu1 }
 0x1ff   : > { %v2336_v5 = vadd.f32 %v2960_v7, %v4855_v11  ;;  %v2327_v48 = vpop.f32.mrb[1].mxu0  ;;  %v2392_v49 = vadd.f32 %v4855_v11, %v2391_v61  ;;  %v2977_v51 = vpop.f32.mrb[2].mxu1 }
 0x200   : > { %2472 = vst [vmem:[%s4860_s4 + $0x90] sm:$0xff] %v2400_v43  ;;  %v2328_v1 = vadd.f32 %v4855_v11, %v2327_v48  ;;  %v2961_v24 = vpop.f32.mrb[2].mxu0  ;;  %v2403_v3 = vadd.f32 %v2977_v51, %v4855_v11  ;;  %v2394_v63 = vpop.f32.mrb[3].mxu1 }
 0x201   : > { %2456 = vst [vmem:[%s4860_s4 + $0x10] sm:$0xff] %v2336_v5  ;;  %2470 = vst [vmem:[%s4860_s4 + $0x80] sm:$0xff] %v2392_v49  ;;  %v2339_v45 = vadd.f32 %v2961_v24, %v4855_v11  ;;  %v2330_v31 = vpop.f32.mrb[3].mxu0  ;;  %v2395_v27 = vadd.f32 %v4855_v11, %v2394_v63 }
 0x202   : > { %2454 = vst [vmem:[%s4860_s4] sm:$0xff] %v2328_v1  ;;  %2473 = vst [vmem:[%s4860_s4 + $0x98] sm:$0xff] %v2403_v3  ;;  %v2331_v36 = vadd.f32 %v4855_v11, %v2330_v31 }
 0x203   : > { %2457 = vst [vmem:[%s4860_s4 + $0x18] sm:$0xff] %v2339_v45  ;;  %2471 = vst [vmem:[%s4860_s4 + $0x88] sm:$0xff] %v2395_v27 }
 0x204   : > { %2455 = vst [vmem:[%s4860_s4 + $0x8] sm:$0xff] %v2331_v36 }
 0x23d   : > { %v2980_v17 = vpop.f32.mrb[4].mxu1 }
 0x23e   : > { %v2964_v34 = vpop.f32.mrb[4].mxu0  ;;  %v2416_v30 = vadd.f32 %v2980_v17, %v4855_v11  ;;  %v2407_v32 = vpop.f32.mrb[5].mxu1 }
 0x23f   : > { %v2352_v62 = vadd.f32 %v2964_v34, %v4855_v11  ;;  %v2343_v47 = vpop.f32.mrb[5].mxu0  ;;  %v2408_v54 = vadd.f32 %v4855_v11, %v2407_v32  ;;  %v2981_v2 = vpop.f32.mrb[6].mxu1 }
 0x240   : > { %2476 = vst [vmem:[%s4860_s4 + $0xb0] sm:$0xff] %v2416_v30  ;;  %v2344_v10 = vadd.f32 %v4855_v11, %v2343_v47  ;;  %v2965_v6 = vpop.f32.mrb[6].mxu0  ;;  %v2419_v58 = vadd.f32 %v2981_v2, %v4855_v11  ;;  %v2410_v21 = vpop.f32.mrb[7].mxu1 }
 0x241   : > { %2460 = vst [vmem:[%s4860_s4 + $0x30] sm:$0xff] %v2352_v62  ;;  %2474 = vst [vmem:[%s4860_s4 + $0xa0] sm:$0xff] %v2408_v54  ;;  %v2355_v38 = vadd.f32 %v2965_v6, %v4855_v11  ;;  %v2346_v57 = vpop.f32.mrb[7].mxu0  ;;  %v2411_v4 = vadd.f32 %v4855_v11, %v2410_v21 }
 0x242   : > { %2458 = vst [vmem:[%s4860_s4 + $0x20] sm:$0xff] %v2344_v10  ;;  %2477 = vst [vmem:[%s4860_s4 + $0xb8] sm:$0xff] %v2419_v58  ;;  %v2347_v13 = vadd.f32 %v4855_v11, %v2346_v57 }
 0x243   : > { %2461 = vst [vmem:[%s4860_s4 + $0x38] sm:$0xff] %v2355_v38  ;;  %2475 = vst [vmem:[%s4860_s4 + $0xa8] sm:$0xff] %v2411_v4 }
 0x244   : > { %2459 = vst [vmem:[%s4860_s4 + $0x28] sm:$0xff] %v2347_v13 }
 0x27d   : > { %v2984_v26 = vpop.f32.mrb[8].mxu1 }
 0x27e   : > { %v2968_v23 = vpop.f32.mrb[8].mxu0  ;;  %v2432_v22 = vadd.f32 %v2984_v26, %v4855_v11  ;;  %v2423_v50 = vpop.f32.mrb[9].mxu1 }
 0x27f   : > { %v2368_v12 = vadd.f32 %v2968_v23, %v4855_v11  ;;  %v2359_v19 = vpop.f32.mrb[9].mxu0  ;;  %v2424_v41 = vadd.f32 %v4855_v11, %v2423_v50  ;;  %v2985_v37 = vpop.f32.mrb[10].mxu1 }
 0x280   : > { %2480 = vst [vmem:[%s4860_s4 + $0xd0] sm:$0xff] %v2432_v22  ;;  %v2360_v20 = vadd.f32 %v4855_v11, %v2359_v19  ;;  %v2969_v55 = vpop.f32.mrb[10].mxu0  ;;  %v2435_v28 = vadd.f32 %v2985_v37, %v4855_v11  ;;  %v2426_v33 = vpop.f32.mrb[11].mxu1 }
 0x281   : > { %2464 = vst [vmem:[%s4860_s4 + $0x50] sm:$0xff] %v2368_v12  ;;  %2478 = vst [vmem:[%s4860_s4 + $0xc0] sm:$0xff] %v2424_v41  ;;  %v2371_v59 = vadd.f32 %v2969_v55, %v4855_v11  ;;  %v2362_v15 = vpop.f32.mrb[11].mxu0  ;;  %v2427_v53 = vadd.f32 %v4855_v11, %v2426_v33 }
 0x282   : > { %2462 = vst [vmem:[%s4860_s4 + $0x40] sm:$0xff] %v2360_v20  ;;  %2481 = vst [vmem:[%s4860_s4 + $0xd8] sm:$0xff] %v2435_v28  ;;  %v2363_v40 = vadd.f32 %v4855_v11, %v2362_v15 }
 0x283   : > { %2465 = vst [vmem:[%s4860_s4 + $0x58] sm:$0xff] %v2371_v59  ;;  %2479 = vst [vmem:[%s4860_s4 + $0xc8] sm:$0xff] %v2427_v53 }
 0x284   : > { %2463 = vst [vmem:[%s4860_s4 + $0x48] sm:$0xff] %v2363_v40 }
 0x2b9   : > { %v2988_v16 = vpop.f32.mrb[12].mxu1 }
 0x2ba   : > { %v2972_v42 = vpop.f32.mrb[12].mxu0  ;;  %v2448_v44 = vadd.f32 %v2988_v16, %v4855_v11  ;;  %v2439_v29 = vpop.f32.mrb[13].mxu1 }
 0x2bb   : > { %v2384_v14 = vadd.f32 %v2972_v42, %v4855_v11  ;;  %v2375_v56 = vpop.f32.mrb[13].mxu0  ;;  %v2440_v8 = vadd.f32 %v4855_v11, %v2439_v29  ;;  %v2989_v25 = vpop.f32.mrb[14].mxu1 }
 0x2bc   : > { %2484 = vst [vmem:[%s4860_s4 + $0xf0] sm:$0xff] %v2448_v44  ;;  %v2376_v60 = vadd.f32 %v4855_v11, %v2375_v56  ;;  %v2973_v52 = vpop.f32.mrb[14].mxu0  ;;  %v2451_v18 = vadd.f32 %v2989_v25, %v4855_v11  ;;  %v2442_v46 = vpop.f32.mrb[15].mxu1 }
 0x2bd   : > { %2468 = vst [vmem:[%s4860_s4 + $0x70] sm:$0xff] %v2384_v14  ;;  %2482 = vst [vmem:[%s4860_s4 + $0xe0] sm:$0xff] %v2440_v8  ;;  %v2387_v0 = vadd.f32 %v2973_v52, %v4855_v11  ;;  %v2378_v35 = vpop.f32.mrb[15].mxu0  ;;  %v2443_v9 = vadd.f32 %v4855_v11, %v2442_v46 }
 0x2be   : > { %2466 = vst [vmem:[%s4860_s4 + $0x60] sm:$0xff] %v2376_v60  ;;  %2485 = vst [vmem:[%s4860_s4 + $0xf8] sm:$0xff] %v2451_v18  ;;  %v2379_v39 = vadd.f32 %v4855_v11, %v2378_v35 }
 0x2bf   : > { %2469 = vst [vmem:[%s4860_s4 + $0x78] sm:$0xff] %v2387_v0  ;;  %2483 = vst [vmem:[%s4860_s4 + $0xe8] sm:$0xff] %v2443_v9 }
 0x2c0   : > { %2467 = vst [vmem:[%s4860_s4 + $0x68] sm:$0xff] %v2379_v39 }
 0x2c1   : > { %3341 = shalt.err (!%p3338_p2)
}
 0x2c2   : > { %s3342_s18 = scalar_lea.hbm %s4922_s7, 4096  ;;  %s3346_s10 = scalar_lea.hbm %s4983_s3, 8192 }
 0x2c3   : > { %p3343_p0 = scmp.ne.s32.totalorder %s4922_s7, %s3342_s18  ;;  %p3347_p6 = scmp.lt.u32.totalorder %s4922_s7, %s4983_s3 }
 0x2c4   : > { %p3348_p7 = scmp.lt.u32.totalorder %s3346_s10, %s3342_s18  ;;  %p3350_p8 = scmp.lt.u32.totalorder %s3342_s18, %s4922_s7 }
 0x2c5   : > { %p3344_p4 = pnand %p3343_p0, %p5016_p12 }
 0x2c6   : > { %p3349_p11 = por %p3348_p7, %p3347_p6 }
 0x2c7   : > { %p3345_p13 = pneg %p3344_p4 }
 0x2c8   : > { %p3351_p1 = por %p3350_p8, %p3349_p11 }
 0x2ca   : > { %p3352_p10 = pnand %p3351_p1, %p3345_p13 }
 0x2cc   : > { %3355 = shalt.err (!%p3352_p10)
}
 0x2cd   : > { %s3430_s9 = smov 128  }
 0x2ce   : > { %3011 = dma.vmem_to_hbm [thread:$0]  (%p5016_p12), %s4927_s28, 4096, %s4922_s7, %s2487_s8, %s3430_s9, %s3430_s9, %s3422_s22  }
 0x2cf PF: > { %s2518_s15 = sand.u32 1, %s3394_s12   ;;  %p5017_p3 = scmp.ne.s32.totalorder %s4997_s23, 0 }
 0x2d0   : > { %p5018_p5 = scmp.ge.s32.totalorder %s3414_s17, 2  ;;  %s2519_s29 = scalar_lea.sflag [#allocation4], %s2518_s15 }
 0x2d2   : > { %p3025_p9 = pnand %p5018_p5, %p5017_p3 }
 0x2d4   : > { %3389 = dma.done.wait (!%p3025_p9), %s2519_s29, 4096  }
 0x2d5   : > { %3391 = vsyncadd (!%p3025_p9), %s2519_s29, 4294963200  ;;  %s20_s17 = sadd.s32 1, %s3414_s17   ;;  %s5019_s12 = smov %s3398_s13 }
 0x2d6   : > { %p17_p2 = scmp.ge.s32.totalorder %s20_s17, 4   ;;  %s5020_s13 = smov %s3402_s14 }
 0x2d7   : > { %s5021_s14 = smov %s3600_s6  ;;  %s5022_s15 = smov %s3410_s16 }
 0x2d8   : > { %s5023_s16 = smov %s5025_s25  ;;  %19 = sbr.rel (!%p17_p2) target bundleno = 7 (0x7), region = 90 }
 0x2df   :  { %2524 = vsyncpa [#allocation3], 1 }
 0x2e0   :  { %2526 = vsyncpa [#allocation3 + $0x1], 1 }
 0x2e1   :  { %2527 = vsyncpa [#allocation6], 1 }
 0x2e2   :  { %2528 = vsyncpa [#allocation4], 1 }
 0x2e3   :  { %2530 = vsyncpa [#allocation4 + $0x1], 1 }

// kernel: fn.1
= control target key start
LH: loop header
LB: loop body
LE: loop exit
PB: predicated region body
PF: predicated region fallthrough
CT: control target
= control target key end

     0   :  { %8 = vsyncpa [#allocation4], 0  ;;  %s9105_s0 = inlined_call_operand.hbm [shape: bf16[2,18,18,4], index: 0, kind: input, shape index: {}]   ;;  %s9106_s1 = inlined_call_operand.hbm [shape: bf16[9,4,128], index: 1, kind: input, shape index: {}]   ;;  %s9107_s2 = inlined_call_operand.hbm [shape: f32[1,128], index: 2, kind: input, shape index: {}]   ;;  %s9108_s3 = inlined_call_operand.hbm [shape: f32[2,256,128], index: 3, kind: output, shape index: {}]  }
   0x1   :  { %10 = vsyncpa [#allocation4 + $0x1], 0 }
   0x2   :  { %11 = vsyncpa [#allocation7], 0 }
   0x3   :  { %12 = vsyncpa [#allocation5], 0 }
   0x4   :  { %14 = vsyncpa [#allocation5 + $0x1], 0  ;;  %s7563_s12 = smov 0   ;;  %s7565_s13 = smov 0  }
   0x5   :  { %s7567_s14 = smov 0   ;;  %s7569_s15 = smov 0  }
   0x6   :  { %s7571_s16 = smov 0   ;;  %s7573_s17 = smov 0  }
   0x7 LB: > { %s5849_s18 = sadd.s32 4294967295, %s7531_s17   ;;  %s5850_s19 = sadd.s32 4294967294, %s7531_s17   ;;  %s7531_s17 = sphi %s7573_s17, %s20_s17   ;;  %s7527_s16 = sphi %s7571_s16, %s9134_s16   ;;  %s7523_s15 = sphi %s7569_s15, %s9133_s15   ;;  %s7519_s14 = sphi %s7567_s14, %s9132_s14   ;;  %s7515_s13 = sphi %s7565_s13, %s9131_s13   ;;  %s7511_s12 = sphi %s7563_s12, %s9130_s12  }
   0x8   : > { %p59_p0 = scmp.ne.s32.totalorder %s7515_s13, %s7511_s12  ;;  %p7597_p1 = scmp.eq.s32.totalorder %s5849_s18, 0 }
   0x9   : > { %p7601_p2 = scmp.eq.s32.totalorder %s5849_s18, 1  ;;  %p145_p3 = scmp.eq.s32.totalorder %s5850_s19, 1 }
   0xa   : > { %s9113_s20 = scalar_select %p7597_p1, 1, 0 }
   0xb   : > { %p7607_p4 = por %p7597_p1, %p59_p0  ;;  %p5851_p5 = scmp.ge.s32.totalorder %s7531_s17, 1 }
   0xc   : > { %p7612_p6 = por %p145_p3, %p59_p0  ;;  %p152_p7 = scmp.lt.s32.totalorder %s7531_s17, 3 }
   0xd   : > { %s9115_s22 = scalar_select %p7607_p4, 1, 0 }
   0xe   : > { %s9116_s23 = scalar_select %p7612_p6, 1, 0 }
   0xf   : > { %p7617_p8 = pnand %p5851_p5, %p152_p7  ;;  %s7533_s25 = smov [#allocation6]  }
  0x10   : > { %s166_s26 = sshll.u32 %s7533_s25, 4  ;;  %s7534_s28 = smov [#allocation8]   ;;  %s7621_s26 = int_to_ptr.vmem [resolvable:$true] %s166_s26 }
  0x11   : > { %p7233_p9 = pneg %p7617_p8  ;;  %s182_s29 = sshll.u32 %s7534_s28, 4  ;;  %s7632_s29 = int_to_ptr.vmem [resolvable:$true] %s182_s29 }
  0x12   : > { %s7359_s5 = scalar_lea.hbm %s9106_s1, 288 }
  0x13   : > { %p7628_p11 = pnand %p7233_p9, %p7597_p1  ;;  %p7360_p12 = scmp.ne.s32.totalorder %s9106_s1, %s7359_s5 }
  0x14   : > { %p7366_p5 = scmp.lt.u32.totalorder %s7359_s5, %s9106_s1 }
  0x15   : > { %p7361_p13 = pneg %p7628_p11 }
  0x17   : > { %p7362_p0 = pnand %p7361_p13, %p7360_p12 }
  0x19   : > { %p7363_p3 = pneg %p7362_p0 }
  0x1b   : > { %p7368_p7 = pnand %p7366_p5, %p7363_p3 }
  0x1d   : > { %7371 = shalt.err (!%p7368_p7)
}
  0x1e   : > { %s7372_s10 = scalar_lea.vmem %s7621_s26, 288  ;;  %p7380_p1 = scmp.lt.s32.totalorder %s7621_s26, %s7621_s26 }
  0x1f   : > { %p7373_p9 = scmp.ne.s32.totalorder %s7621_s26, %s7372_s10  ;;  %p7381_p12 = scmp.lt.s32.totalorder %s7372_s10, %s7372_s10 }
  0x21   : > { %p7375_p10 = pnand %p7373_p9, %p7361_p13  ;;  %p7382_p0 = por %p7381_p12, %p7380_p1 }
  0x23   : > { %p7376_p6 = pneg %p7375_p10 }
  0x25   : > { %p7383_p4 = pnand %p7382_p0, %p7376_p6 }
  0x27   : > { %7386 = shalt.err (!%p7383_p4)
}
  0x28   : > { %s7535_s11 = smov 32   ;;  %s7536_s18 = smov 2  }
  0x29   : > { %7236 = dma.hbm_to_vmem [thread:$0]  (!%p7628_p11), %s9106_s1, 288, %s7621_s26, [#allocation7], %s7535_s11, %s7535_s11, %s7536_s18  }
  0x2a   : > { %s7387_s4 = scalar_lea.hbm %s9107_s2, 16 }
  0x2b   : > { %p7388_p1 = scmp.ne.s32.totalorder %s9107_s2, %s7387_s4  ;;  %p7394_p10 = scmp.lt.u32.totalorder %s7387_s4, %s9107_s2 }
  0x2d   : > { %p7390_p4 = pnand %p7388_p1, %p7361_p13 }
  0x2f   : > { %p7391_p6 = pneg %p7390_p4 }
  0x31   : > { %p7396_p3 = pnand %p7394_p10, %p7391_p6 }
  0x33   : > { %7399 = shalt.err (!%p7396_p3)
}
  0x34   : > { %s7400_s26 = scalar_lea.vmem %s7632_s29, 16  ;;  %s7407_s9 = scalar_lea.vmem %s7632_s29, 32 }
  0x35   : > { %p7401_p5 = scmp.ne.s32.totalorder %s7632_s29, %s7400_s26  ;;  %p7408_p12 = scmp.lt.s32.totalorder %s7632_s29, %s7632_s29 }
  0x36   : > { %p7409_p0 = scmp.lt.s32.totalorder %s7407_s9, %s7400_s26 }
  0x37   : > { %p7403_p7 = pnand %p7401_p5, %p7361_p13 }
  0x38   : > { %p7410_p1 = por %p7409_p0, %p7408_p12 }
  0x39   : > { %p7404_p9 = pneg %p7403_p7 }
  0x3b   : > { %p7411_p4 = pnand %p7410_p1, %p7404_p9 }
  0x3d   : > { %7414 = shalt.err (!%p7411_p4)
}
  0x3e   : > { %7239 = dma.hbm_to_vmem [thread:$0]  (!%p7628_p11), %s9107_s2, 16, %s7632_s29, [#allocation7]  }
  0x3f   : > { %s39_s18 = sadd.s32 1, %s7527_s16  ;;  %s46_s19 = sadd.s32 1, %s7519_s14 }
  0x40   : > { %p41_p13 = scmp.ge.s32.totalorder %s39_s18, 2  ;;  %p53_p6 = scmp.ne.s32.totalorder %s7519_s14, %s7515_s13 }
  0x41   : > { %p54_p10 = scmp.eq.s32.totalorder %s7531_s17, 0  ;;  %p7250_p3 = scmp.lt.s32.totalorder %s7531_s17, 2 }
  0x42   : > { %s9136_s18 = smov (%p41_p13, %s39_s18), 0  ;;  %p7697_p7 = por %p7601_p2, %p53_p6 }
  0x43   : > { %p55_p5 = por %p54_p10, %p53_p6  ;;  %s43_s25 = ssub.s32 %s7527_s16, %s9136_s18 }
  0x44   : > { %s9119_s27 = scalar_select %p7697_p7, 1, 0 }
  0x45   : > { %s193_s28 = sand.u32 1, %s7519_s14   ;;  %p44_p9 = scmp.eq.s32.totalorder %s43_s25, 0 }
  0x46   : > { %s7218_s29 = smul.u32 216, %s193_s28  ;;  %p7704_p11 = pnand %p7250_p3, %p55_p5 }
  0x47   : > { %s7709_s4 = scalar_select %p44_p9, %s7519_s14, %s46_s19  }
  0x48   : > { %s7219_s5 = smul.u32 3456, %s7527_s16  ;;  %s197_s6 = scalar_lea.vmem [#allocation3], %s7218_s29 }
  0x49   : > { %s204_s7 = sshll.u32 %s197_s6, 4  ;;  %s7719_s9 = scalar_lea.sflag [#allocation4], %s193_s28  ;;  %s7717_s7 = int_to_ptr.vmem [resolvable:$true] %s204_s7 }
  0x4a   : > { %s7715_s26 = scalar_lea.hbm %s9105_s0, %s7219_s5  ;;  %p7417_p12 = pneg %p7704_p11 }
  0x4b   : > { %s7415_s10 = scalar_lea.hbm %s7715_s26, 3456  ;;  %s7420_s25 = scalar_lea.hbm %s9105_s0, 6912 }
  0x4c   : > { %p7416_p2 = scmp.ne.s32.totalorder %s7715_s26, %s7415_s10  ;;  %p7421_p4 = scmp.lt.u32.totalorder %s7715_s26, %s9105_s0 }
  0x4d   : > { %p7422_p13 = scmp.lt.u32.totalorder %s7420_s25, %s7415_s10  ;;  %p7424_p10 = scmp.lt.u32.totalorder %s7415_s10, %s7715_s26 }
  0x4e   : > { %p7418_p0 = pnand %p7417_p12, %p7416_p2 }
  0x4f   : > { %p7423_p6 = por %p7422_p13, %p7421_p4 }
  0x50   : > { %p7419_p1 = pneg %p7418_p0 }
  0x51   : > { %p7425_p3 = por %p7424_p10, %p7423_p6 }
  0x53   : > { %p7426_p5 = pnand %p7425_p3, %p7419_p1 }
  0x55   : > { %7429 = shalt.err (!%p7426_p5)
}
  0x56   : > { %s7430_s28 = scalar_lea.vmem %s7717_s7, 3456  ;;  %s7537_s6 = smov [#allocation3]  }
  0x57   : > { %p7431_p9 = scmp.ne.s32.totalorder %s7717_s7, %s7430_s28  ;;  %s7435_s21 = sshll.u32 %s7537_s6, 4  ;;  %s7436_s21 = int_to_ptr.vmem [resolvable:$false] %s7435_s21 }
  0x58   : > { %s7437_s8 = scalar_lea.vmem %s7436_s21, 6912  ;;  %p7438_p7 = scmp.lt.s32.totalorder %s7717_s7, %s7436_s21 }
  0x59   : > { %p7433_p2 = pnand %p7431_p9, %p7417_p12  ;;  %p7439_p4 = scmp.lt.s32.totalorder %s7437_s8, %s7430_s28 }
  0x5b   : > { %p7434_p0 = pneg %p7433_p2  ;;  %p7440_p13 = por %p7439_p4, %p7438_p7 }
  0x5d   : > { %p7441_p6 = pnand %p7440_p13, %p7434_p0 }
  0x5f   : > { %7444 = shalt.err (!%p7441_p6)
}
  0x60   : > { %s7538_s10 = smov 64   ;;  %s7539_s11 = smov 4  }
  0x61   : > { %7243 = dma.hbm_to_vmem [thread:$0]  (!%p7704_p11), %s7715_s26, 3456, %s7717_s7, %s7719_s9, %s7538_s10, %s7538_s10, %s7539_s11  }
  0x62   : > { %216 = sbr.rel (%p7617_p8) target bundleno = 647 (0x287), region = 32  ;;  %s7750_s19 = sand.u32 (!%p7617_p8), 1, %s7515_s13  }
  0x63   : > { %s7220_s25 = smul.u32 (!%p7617_p8), 216, %s7750_s19  ;;  %s219_s29 = scalar_lea.sflag (!%p7617_p8), [#allocation4], %s7750_s19 }
  0x64   : > { %p9121_p7 = scmp.ne.s32.totalorder (!%p7617_p8), %s9115_s22, 0 }
  0x65   : > { %s7754_s5 = scalar_lea.vmem (!%p7617_p8), [#allocation3], %s7220_s25 }
  0x69   : > { %7498 = dma.done.wait (%p9121_p7), %s219_s29, 3456  }
  0x6a   : > { %7500 = vsyncadd (%p9121_p7), %s219_s29, 4294963840  ;;  %p9122_p11 = scmp.ne.s32.totalorder %s9113_s20, 0 }
  0x6c   : > { %7502 = dma.done.wait (%p9122_p11), [#allocation7], 304  }
  0x6d   : > { %7504 = vsyncadd (%p9122_p11), [#allocation7], 4294966992  ;;  %vm492_vm0 = vcmask 1041408   ;;  %vm443_vm1 = vcmask 31744   ;;  %vm769_vm2 = vsmask.f32 3328 }
  0x6e   : > { %vm770_vm3 = vsmask.f32 7440  ;;  %v362_v0 = vld [vmem:[#allocation6] sm:$0x3]  ;;  %v7310_v2 = vld [vmem:[%s7754_s5] sm:$0xff]   ;;  %vm1610_vm5 = vcmask 1042432  }
  0x6f   : > { %7208 = vmatprep.subr.msk.bf16.mxu1 %vm492_vm0, %v362_v0  ;;  %v494_v1 = vsel %vm492_vm0, %v362_v0, 0  ;;  %v7311_v3 = vld [vmem:[%s7754_s5 + $0xc] sm:$0xff]   ;;  %v2974_v4 = vld [vmem:[#allocation6 + $0x8] sm:$0x3]  ;;  %6614 = vmatprep.mubr.msk.bf16.mxu1 %vm443_vm1, %v7310_v2  ;;  %v6039_v11 = vld [vmem:[%s7754_s5 + $0x14] sm:$0x1] }
  0x70   : > { %6613 = vmatpush3.bf16.msra.mxu1 %v494_v1  ;;  %v1189_v5 = vld [vmem:[#allocation6 + $0x2] sm:$0x3]  ;;  %7212 = vmatprep.subr.msk.bf16.mxu0 %vm492_vm0, %v2974_v4  ;;  %v7771_v6 = vsel %vm492_vm0, %v2974_v4, 0  ;;  %v6037_v9 = vld [vmem:[%s7754_s5 + $0xc] sm:$0xf]  ;;  %v2577_v16 = vshll.u32 %v6039_v11, 16  ;;  %vm7792_vm4 = vmor %vm769_vm2, %vm770_vm3 }
  0x71   : > { %v1287_v7 = vsel %vm492_vm0, %v1189_v5, 0  ;;  %6749 = vmatpush3.bf16.msra.mxu0 %v7771_v6  ;;  %7209 = vmatprep.subr.msk.bf16.mxu1 %vm492_vm0, %v1189_v5  ;;  %v7312_v8 = vld [vmem:[%s7754_s5 + $0x18] sm:$0xff]   ;;  %v6038_v10 = vld [vmem:[%s7754_s5 + $0x10] sm:$0xf]  ;;  %v2558_v12 = vshrl.u32 %v6037_v9, 16  ;;  %v2561_v13 = vshll.u32 %v6037_v9, 16 }
  0x72   : > { %v2567_v14 = vshll.u32 %v6038_v10, 16  ;;  %v2571_v15 = vshrl.u32 %v6038_v10, 16  ;;  %v3540_v17 = vld [vmem:[#allocation6 + $0xa] sm:$0x3]  ;;  %v7313_v22 = vld [vmem:[%s7754_s5 + $0x24] sm:$0xff]   ;;  %v2579_v23 = vrot.slane %v2577_v16, 5 }
  0x73   : > { %6615 = vmatmul.mubr.msk.bf16.vlgmr.msra.gmra.mrb[0].mxu1 %vm443_vm1, %v7311_v3  ;;  %v2560_v18 = vrot.slane %v2558_v12, 4  ;;  %v2563_v19 = vrot.slane %v2561_v13, 5  ;;  %7214 = vmatprep.subr.msk.bf16.mxu0 %vm492_vm0, %v3540_v17  ;;  %v6040_v24 = vld [vmem:[%s7754_s5 + $0x18] sm:$0xf]  ;;  %v6041_v25 = vld [vmem:[%s7754_s5 + $0x1c] sm:$0xf] }
  0x74   : > { %6647 = vmatpush3.bf16.msra.mxu1 %v1287_v7  ;;  %6618 = vmatprep.mubr.msk.bf16.mxu1 %vm443_vm1, %v7312_v8  ;;  %v2569_v20 = vrot.slane %v2567_v14, 5  ;;  %v2573_v21 = vrot.slane %v2571_v15, 4  ;;  %v7787_v26 = vsel %vm492_vm0, %v3540_v17, 0  ;;  %v6042_v29 = vld [vmem:[%s7754_s5 + $0x20] sm:$0x1]  ;;  %v2582_v30 = vshrl.u32 %v6040_v24, 16 }
  0x75   : > { %v2564_v27 = vor.u32 %v2563_v19, %v2560_v18  ;;  %v2585_v31 = vshll.u32 %v6040_v24, 16  ;;  %v2591_v33 = vshll.u32 %v6041_v25, 16  ;;  %v2595_v34 = vshrl.u32 %v6041_v25, 16  ;;  %v7314_v36 = vld [vmem:[%s7754_s5 + $0x30] sm:$0xff]   ;;  %v6043_v41 = vld [vmem:[%s7754_s5 + $0x24] sm:$0xf] }
  0x76   : > { %v2574_v28 = vor.u32 %v2573_v21, %v2569_v20  ;;  %v2601_v35 = vshll.u32 %v6042_v29, 16  ;;  %v2584_v39 = vrot.slane %v2582_v30, 4  ;;  %v6044_v45 = vld [vmem:[%s7754_s5 + $0x28] sm:$0xf]  ;;  %v2606_v46 = vshrl.u32 %v6043_v41, 16  ;;  %v7315_v61 = vld [vmem:[%s7754_s5 + $0x3c] sm:$0xff]  }
  0x77   : > { %v2565_v37 = vrot.slane %v2564_v27, 4  ;;  %v2587_v40 = vrot.slane %v2585_v31, 5  ;;  %v2593_v42 = vrot.slane %v2591_v33, 5  ;;  %v2597_v43 = vrot.slane %v2595_v34, 4  ;;  %v6045_v50 = vld [vmem:[%s7754_s5 + $0x2c] sm:$0x1] }
  0x78   : > { %v2575_v38 = vrot.slane %v2574_v28, 4  ;;  %v2603_v44 = vrot.slane %v2601_v35, 5  ;;  %v2609_v51 = vshll.u32 %v6043_v41, 16  ;;  %v2608_v54 = vrot.slane %v2606_v46, 4  ;;  %v6046_v56 = vld [vmem:[%s7754_s5 + $0x30] sm:$0xf] }
  0x79   : > { %v2570_v47 = vsel %vm7792_vm4, %v2565_v37, %v2569_v20  ;;  %v2588_v49 = vor.u32 %v2587_v40, %v2584_v39  ;;  %v2598_v53 = vor.u32 %v2597_v43, %v2593_v42  ;;  %v2615_v55 = vshll.u32 %v6044_v45, 16  ;;  %v6047_v62 = vld [vmem:[%s7754_s5 + $0x34] sm:$0xf]  ;;  %v6048_v1 = vld [vmem:[%s7754_s5 + $0x38] sm:$0x1]  ;;  %v7316_v13 = vld [vmem:[%s7754_s5 + $0x48] sm:$0xff]  }
  0x7a   : > { %v2580_v48 = vsel %vm7792_vm4, %v2575_v38, %v2579_v23  ;;  %v2611_v58 = vrot.slane %v2609_v51, 5  ;;  %v2619_v59 = vshrl.u32 %v6044_v45, 16  ;;  %v2625_v60 = vshll.u32 %v6045_v50, 16  ;;  %v6049_v14 = vld [vmem:[%s7754_s5 + $0x3c] sm:$0xf]  ;;  %v7317_v40 = vld [vmem:[%s7754_s5 + $0x54] sm:$0xff]  }
  0x7b   : > { %6619 = vmatmul.mubr.msk.bf16.gmra.mrb[4].mxu1 %vm443_vm1, %v7313_v22  ;;  %v6085_v52 = vcombine.low %v2570_v47, %v2580_v48  ;;  %v2589_v57 = vrot.slane %v2588_v49, 4  ;;  %v2599_v63 = vrot.slane %v2598_v53, 4  ;;  %v2617_v0 = vrot.slane %v2615_v55, 5  ;;  %v6050_v19 = vld [vmem:[%s7754_s5 + $0x40] sm:$0xf]  ;;  %s5859_s20 = sshll.u32 %s7750_s19, 8 }
  0x7c   : > { %6622 = vmatprep.mubr.msk.bf16.mxu1 %vm443_vm1, %v7314_v36  ;;  %v2630_v2 = vshrl.u32 %v6046_v56, 16  ;;  %v2633_v3 = vshll.u32 %v6046_v56, 16  ;;  %v2612_v5 = vor.u32 %v2611_v58, %v2608_v54  ;;  %v2621_v7 = vrot.slane %v2619_v59, 4  ;;  %v6051_v20 = vld [vmem:[%s7754_s5 + $0x44] sm:$0x1]  ;;  %s8987_s22 = scalar_lea.vmem [#allocation9], %s5859_s20 }
  0x7d   : > { %6750 = vmatprep.mubr.msk.bf16.mxu0 %vm443_vm1, %v6085_v52  ;;  %v2594_v4 = vsel %vm7792_vm4, %v2589_v57, %v2593_v42  ;;  %v2627_v8 = vrot.slane %v2625_v60, 5  ;;  %v2604_v9 = vsel %vm7792_vm4, %v2599_v63, %v2603_v44  ;;  %v2639_v12 = vshll.u32 %v6047_v62, 16  ;;  %v6052_v35 = vld [vmem:[%s7754_s5 + $0x48] sm:$0xf]  ;;  %v6053_v41 = vld [vmem:[%s7754_s5 + $0x4c] sm:$0xf] }
  0x7e   : > { %v2632_v10 = vrot.slane %v2630_v2, 4  ;;  %v2635_v11 = vrot.slane %v2633_v3, 5  ;;  %v6086_v15 = vcombine.low %v2594_v4, %v2604_v9  ;;  %v2613_v16 = vrot.slane %v2612_v5, 4  ;;  %v6054_v48 = vld [vmem:[%s7754_s5 + $0x50] sm:$0x1]  ;;  %v7318_v50 = vld [vmem:[%s7754_s5 + $0x60] sm:$0xff]  }
  0x7f   : > { %v2622_v17 = vor.u32 %v2621_v7, %v2617_v0  ;;  %v2643_v18 = vshrl.u32 %v6047_v62, 16  ;;  %v2641_v22 = vrot.slane %v2639_v12, 5  ;;  %v2649_v23 = vshll.u32 %v6048_v1, 16  ;;  %v6055_v55 = vld [vmem:[%s7754_s5 + $0x54] sm:$0xf]  ;;  %s6458_s24 = sshll.u32 %s7523_s15, 12 }
  0x80   : > { %v2636_v21 = vor.u32 %v2635_v11, %v2632_v10  ;;  %v2654_v24 = vshrl.u32 %v6049_v14, 16  ;;  %6751 = vmatmul.mubr.msk.bf16.vlgmr.msra.gmra.mrb[0].mxu0 %vm443_vm1, %v6086_v15  ;;  %v2618_v25 = vsel %vm7792_vm4, %v2613_v16, %v2617_v0  ;;  %v2657_v29 = vshll.u32 %v6049_v14, 16  ;;  %v6056_v60 = vld [vmem:[%s7754_s5 + $0x58] sm:$0xf]  ;;  %v6058_v11 = vld [vmem:[%s7754_s5 + $0x60] sm:$0xf]  ;;  %s9051_s9 = scalar_lea.hbm %s9108_s3, %s6458_s24 }
  0x81   : > { %v2623_v27 = vrot.slane %v2622_v17, 4  ;;  %v2645_v28 = vrot.slane %v2643_v18, 4  ;;  %6783 = vmatpush3.bf16.msra.mxu0 %v7787_v26  ;;  %v2651_v31 = vrot.slane %v2649_v23, 5  ;;  %v2663_v34 = vshll.u32 %v6050_v19, 16  ;;  %v6059_v16 = vld [vmem:[%s7754_s5 + $0x64] sm:$0xf] }
  0x82   : > { %v2637_v30 = vrot.slane %v2636_v21, 4  ;;  %v2656_v33 = vrot.slane %v2654_v24, 4  ;;  %v2659_v38 = vrot.slane %v2657_v29, 5  ;;  %v2667_v39 = vshrl.u32 %v6050_v19, 16  ;;  %v7319_v21 = vld [vmem:[%s7754_s5 + $0x6c] sm:$0xff]   ;;  %s5728_s30 = sshll.u32 %s8987_s22, 4  ;;  %s9053_s30 = int_to_ptr.vmem [resolvable:$true] %s5728_s30 }
  0x83   : > { %6623 = vmatmul.mubr.msk.bf16.gmra.mrb[8].mxu1 %vm443_vm1, %v7315_v61  ;;  %v2628_v36 = vsel %vm7792_vm4, %v2623_v27, %v2627_v8  ;;  %v2646_v37 = vor.u32 %v2645_v28, %v2641_v22  ;;  %v2665_v43 = vrot.slane %v2663_v34, 5  ;;  %v2673_v44 = vshll.u32 %v6051_v20, 16  ;;  %v6057_v8 = vld [vmem:[%s7754_s5 + $0x5c] sm:$0x1]  ;;  %v6117_v34 = vld [vmem:[%s7754_s5 + $0xc] sm:$0xe] }
  0x84   : > { %6626 = vmatprep.mubr.msk.bf16.mxu1 %vm443_vm1, %v7316_v13  ;;  %v6087_v42 = vcombine.low %v2618_v25, %v2628_v36  ;;  %v2642_v26 = vsel %vm7792_vm4, %v2637_v30, %v2641_v22  ;;  %v2660_v46 = vor.u32 %v2659_v38, %v2656_v33  ;;  %v2669_v47 = vrot.slane %v2667_v39, 4  ;;  %v6060_v25 = vld [vmem:[%s7754_s5 + $0x68] sm:$0x1]  ;;  %v7320_v33 = vld [vmem:[%s7754_s5 + $0x78] sm:$0xff]   ;;  %s5712_s15 = scalar_lea.sflag [#allocation5], %s7750_s19  ;;  %s7445_s28 = scalar_lea.vmem %s9053_s30, 4096 }
  0x85   : > { %v2647_v45 = vrot.slane %v2646_v37, 4  ;;  %v2678_v49 = vshrl.u32 %v6052_v35, 16  ;;  %vm1611_vm6 = vcmask 1046532   ;;  %v2675_v51 = vrot.slane %v2673_v44, 5  ;;  %p7446_p8 = scmp.ne.s32.totalorder %s9053_s30, %s7445_s28  ;;  %p9127_p12 = scmp.ne.s32.totalorder %s9119_s27, 0 }
  0x86   : > { %6754 = vmatprep.mubr.msk.bf16.mxu0 %vm443_vm1, %v6087_v42  ;;  %v2681_v52 = vshll.u32 %v6052_v35, 16  ;;  %v2687_v53 = vshll.u32 %v6053_v41, 16  ;;  %v2691_v54 = vshrl.u32 %v6053_v41, 16  ;;  %v2661_v57 = vrot.slane %v2660_v46, 4  ;;  %v6118_v35 = vld [vmem:[%s7754_s5 + $0x10] sm:$0xf]  ;;  %vm7864_vm7 = vmor %vm1610_vm5, %vm1611_vm6 }
  0x87   : > { %v2652_v56 = vsel %vm7792_vm4, %v2647_v45, %v2651_v31  ;;  %v2670_v58 = vor.u32 %v2669_v47, %v2665_v43  ;;  %v2680_v59 = vrot.slane %v2678_v49, 4  ;;  %v2697_v3 = vshll.u32 %v6054_v48, 16  ;;  %v7860_v41 = vld [vmem:[#allocation6 + $0xc] sm:$0x3]  ;;  %p7447_p1 = pnand %p7446_p8, %p9127_p12  ;;  %s7540_s6 = smov [#allocation9]  }
  0x88   : > { %v6088_v61 = vcombine.low %v2642_v26, %v2652_v56  ;;  %v2683_v62 = vrot.slane %v2681_v52, 5  ;;  %v2689_v63 = vrot.slane %v2687_v53, 5  ;;  %v2693_v0 = vrot.slane %v2691_v54, 4  ;;  %7215 = vmatprep.subr.msk.bf16.mxu0 %vm492_vm0, %v7860_v41  ;;  %v6122_v56 = vld [vmem:[%s7754_s5 + $0x20] sm:$0x1]  ;;  %s7449_s21 = sshll.u32 %s7540_s6, 4  ;;  %s7450_s21 = int_to_ptr.vmem [resolvable:$false] %s7449_s21 }
  0x89   : > { %v2666_v1 = vsel %vm7792_vm4, %v2661_v57, %v2665_v43  ;;  %v2671_v2 = vrot.slane %v2670_v58, 4  ;;  %v2702_v4 = vshrl.u32 %v6055_v55, 16  ;;  %v2705_v9 = vshll.u32 %v6055_v55, 16  ;;  %v6121_v55 = vld [vmem:[%s7754_s5 + $0x1c] sm:$0xf]  ;;  %p7448_p10 = pneg %p7447_p1  ;;  %s7451_s8 = scalar_lea.vmem %s7450_s21, 8192 }
  0x8a   : > { %6755 = vmatmul.mubr.msk.bf16.gmra.mrb[4].mxu0 %vm443_vm1, %v6088_v61  ;;  %v2684_v5 = vor.u32 %v2683_v62, %v2680_v59  ;;  %v2694_v7 = vor.u32 %v2693_v0, %v2689_v63  ;;  %v2711_v10 = vshll.u32 %v6056_v60, 16  ;;  %v2699_v13 = vrot.slane %v2697_v3, 5  ;;  %v7321_v61 = vld [vmem:[%s7754_s5 + $0x84] sm:$0xff]   ;;  %p7452_p3 = scmp.lt.s32.totalorder %s9053_s30, %s7450_s21  ;;  %p7453_p5 = scmp.lt.s32.totalorder %s7451_s8, %s7445_s28 }
  0x8b   : > { %6627 = vmatmul.mubr.msk.bf16.gmra.mrb[12].mxu1 %vm443_vm1, %v7317_v40  ;;  %v2676_v12 = vsel %vm7792_vm4, %v2671_v2, %v2675_v51  ;;  %v2704_v14 = vrot.slane %v2702_v4, 4  ;;  %v2715_v15 = vshrl.u32 %v6056_v60, 16  ;;  %v2707_v20 = vrot.slane %v2705_v9, 5  ;;  %v6119_v40 = vld [vmem:[%s7754_s5 + $0x14] sm:$0x1] }
  0x8c   : > { %6630 = vmatprep.mubr.msk.bf16.mxu1 %vm443_vm1, %v7318_v50  ;;  %v6089_v17 = vcombine.low %v2666_v1, %v2676_v12  ;;  %v2685_v18 = vrot.slane %v2684_v5, 4  ;;  %v2695_v19 = vrot.slane %v2694_v7, 4  ;;  %v2713_v22 = vrot.slane %v2711_v10, 5  ;;  %v6120_v50 = vld [vmem:[%s7754_s5 + $0x18] sm:$0xe]  ;;  %p7454_p9 = por %p7453_p5, %p7452_p3 }
  0x8d   : > { %v2717_v23 = vrot.slane %v2715_v15, 4  ;;  %v2721_v24 = vshll.u32 %v6057_v8, 16  ;;  %v2726_v27 = vshrl.u32 %v6058_v11, 16  ;;  %v2708_v30 = vor.u32 %v2707_v20, %v2704_v14  ;;  %v6123_v2 = vld [vmem:[%s7754_s5 + $0x24] sm:$0xe]  ;;  %v7322_v8 = vld [vmem:[%s7754_s5 + $0x90] sm:$0xff]  }
  0x8e   : > { %6758 = vmatprep.mubr.msk.bf16.mxu0 %vm443_vm1, %v6089_v17  ;;  %v2690_v28 = vsel %vm7792_vm4, %v2685_v18, %v2689_v63  ;;  %v2700_v29 = vsel %vm7792_vm4, %v2695_v19, %v2699_v13  ;;  %v2729_v31 = vshll.u32 %v6058_v11, 16  ;;  %v2735_v43 = vshll.u32 %v6059_v16, 16  ;;  %v6124_v3 = vld [vmem:[%s7754_s5 + $0x28] sm:$0xf]  ;;  %v6125_v9 = vld [vmem:[%s7754_s5 + $0x2c] sm:$0x1]  ;;  %p7455_p2 = pnand %p7454_p9, %p7448_p10 }
  0x8f   : > { %v6090_v36 = vcombine.low %v2690_v28, %v2700_v29  ;;  %v2718_v37 = vor.u32 %v2717_v23, %v2713_v22  ;;  %v2723_v38 = vrot.slane %v2721_v24, 5  ;;  %v2728_v39 = vrot.slane %v2726_v27, 4  ;;  %v6126_v17 = vld [vmem:[%s7754_s5 + $0x30] sm:$0xe]  ;;  %v6127_v18 = vld [vmem:[%s7754_s5 + $0x34] sm:$0xf] }
  0x90   : > { %v2709_v42 = vrot.slane %v2708_v30, 4  ;;  %v2731_v26 = vrot.slane %v2729_v31, 5  ;;  %v2739_v44 = vshrl.u32 %v6059_v16, 16  ;;  %v2745_v47 = vshll.u32 %v6060_v25, 16 }
  0x91   : > { %v2719_v46 = vrot.slane %v2718_v37, 4  ;;  %v6165_v48 = vrot.slane %v6117_v34, 9  ;;  %v3397_v49 = vrot.slane %v6118_v35, 5  ;;  %v2737_v53 = vrot.slane %v2735_v43, 5  ;;  %v6130_v34 = vld [vmem:[%s7754_s5 + $0x40] sm:$0xf] }
  0x92   : > { %6759 = vmatmul.mubr.msk.bf16.gmra.mrb[8].mxu0 %vm443_vm1, %v6090_v36  ;;  %v2714_v51 = vsel %vm7792_vm4, %v2709_v42, %v2713_v22  ;;  %v2732_v52 = vor.u32 %v2731_v26, %v2728_v39  ;;  %v2741_v54 = vrot.slane %v2739_v44, 4  ;;  %v2747_v58 = vrot.slane %v2745_v47, 5  ;;  %v7323_v36 = vld [vmem:[%s7754_s5 + $0x9c] sm:$0xff]   ;;  %v7324_v43 = vld [vmem:[%s7754_s5 + $0xa8] sm:$0xff]  }
  0x93   : > { %6631 = vmatmul.mubr.msk.bf16.gmra.mrb[16].mxu1 %vm443_vm1, %v7319_v21  ;;  %v2724_v57 = vsel %vm7792_vm4, %v2719_v46, %v2723_v38  ;;  %v3398_v59 = vsel %vm7864_vm7, %v6165_v48, %v3397_v49  ;;  %v3399_v60 = vrot.slane %v3397_v49, 4  ;;  %v3400_v1 = vrot.slane %v6119_v40, 5  ;;  %v6128_v21 = vld [vmem:[%s7754_s5 + $0x38] sm:$0x1]  ;;  %v6131_v38 = vld [vmem:[%s7754_s5 + $0x44] sm:$0x1] }
  0x94   : > { %6634 = vmatprep.mubr.msk.bf16.mxu1 %vm443_vm1, %v7320_v33  ;;  %v6091_v62 = vcombine.low %v2714_v51, %v2724_v57  ;;  %v2733_v63 = vrot.slane %v2732_v52, 4  ;;  %v2742_v0 = vor.u32 %v2741_v54, %v2737_v53  ;;  %v6166_v4 = vrot.slane %v6120_v50, 9  ;;  %v6129_v33 = vld [vmem:[%s7754_s5 + $0x3c] sm:$0xe]  ;;  %v6132_v46 = vld [vmem:[%s7754_s5 + $0x48] sm:$0xe] }
  0x95   : > { %v3404_v5 = vrot.slane %v6121_v55, 5  ;;  %v3407_v7 = vrot.slane %v6122_v56, 5  ;;  %v3401_v12 = vsel %vm7864_vm7, %v3399_v60, %v3400_v1  ;;  %v6167_v13 = vrot.slane %v6123_v2, 9  ;;  %v6133_v50 = vld [vmem:[%s7754_s5 + $0x4c] sm:$0xf] }
  0x96   : > { %6762 = vmatprep.mubr.msk.bf16.mxu0 %vm443_vm1, %v6091_v62  ;;  %v2738_v10 = vsel %vm7792_vm4, %v2733_v63, %v2737_v53  ;;  %v2743_v11 = vrot.slane %v2742_v0, 4  ;;  %v6181_v14 = vcombine.low %v3398_v59, %v3401_v12  ;;  %v3411_v16 = vrot.slane %v6124_v3, 5  ;;  %v6134_v51 = vld [vmem:[%s7754_s5 + $0x50] sm:$0x1]  ;;  %v721_v56 = vld [vmem:[%s7754_s5] sm:$0xf] }
  0x97   : > { %v3406_v15 = vrot.slane %v3404_v5, 4  ;;  %v3414_v20 = vrot.slane %v6125_v9, 5  ;;  %v6168_v22 = vrot.slane %v6126_v17, 9  ;;  %v3418_v23 = vrot.slane %v6127_v18, 5  ;;  %v722_v57 = vld [vmem:[%s7754_s5 + $0x4] sm:$0xf] }
  0x98   : > { %v2748_v19 = vsel %vm7792_vm4, %v2743_v11, %v2747_v58  ;;  %v3405_v25 = vsel %vm7864_vm7, %v6166_v4, %v3404_v5  ;;  %v3413_v27 = vrot.slane %v3411_v16, 4  ;;  %v7905_v29 = vsel %vm7864_vm7, %v6167_v13, %v3411_v16  ;;  %v723_v59 = vld [vmem:[%s7754_s5 + $0x8] sm:$0x1]  ;;  %v6135_v3 = vld [vmem:[%s7754_s5 + $0x54] sm:$0xe] }
  0x99   : > { %v6092_v24 = vcombine.low %v2738_v10, %v2748_v19  ;;  %v3408_v28 = vsel %vm7864_vm7, %v3406_v15, %v3407_v7  ;;  %v3420_v30 = vrot.slane %v3418_v23, 4  ;;  %v3421_v31 = vrot.slane %v6128_v21, 5  ;;  %v6136_v4 = vld [vmem:[%s7754_s5 + $0x58] sm:$0xf]  ;;  %v6137_v10 = vld [vmem:[%s7754_s5 + $0x5c] sm:$0x1] }
  0x9a   : > { %v3415_v35 = vsel %vm7864_vm7, %v3413_v27, %v3414_v20  ;;  %v7915_v37 = vsel %vm7864_vm7, %v6168_v22, %v3418_v23  ;;  %v6169_v39 = vrot.slane %v6129_v33, 9  ;;  %v3425_v40 = vrot.slane %v6130_v34, 5  ;;  %v724_v15 = vld [vmem:[%s7754_s5 + $0xc] sm:$0xf]  ;;  %v7325_v16 = vld [vmem:[%s7754_s5 + $0xb4] sm:$0xff]  }
  0x9b   : > { %6635 = vmatmul.mubr.msk.bf16.gmra.mrb[20].mxu1 %vm443_vm1, %v7321_v61  ;;  %6763 = vmatmul.mubr.msk.bf16.gmra.mrb[12].mxu0 %vm443_vm1, %v6092_v24  ;;  %v4064_v42 = vsel %vm492_vm0, %v7860_v41, 0  ;;  %v7923_v26 = vsel %vm7864_vm7, %v3420_v30, %v3421_v31  ;;  %v3428_v44 = vrot.slane %v6131_v38, 5  ;;  %v6182_v47 = vcombine.low %v3405_v25, %v3408_v28  ;;  %v725_v21 = vld [vmem:[%s7754_s5 + $0x10] sm:$0xf]  ;;  %v726_v22 = vld [vmem:[%s7754_s5 + $0x14] sm:$0x1] }
  0x9c   : > { %6638 = vmatprep.mubr.msk.bf16.mxu1 %vm443_vm1, %v7322_v8  ;;  %6784 = vmatprep.mubr.msk.bf16.mxu0 %vm443_vm1, %v6181_v14  ;;  %v7929_v48 = vsel %vm7864_vm7, %v6169_v39, %v3425_v40  ;;  %v3427_v49 = vrot.slane %v3425_v40, 4  ;;  %v6170_v52 = vrot.slane %v6132_v46, 9  ;;  %v6183_v41 = vcombine.low %v7905_v29, %v3415_v35  ;;  %v6138_v28 = vld [vmem:[%s7754_s5 + $0x60] sm:$0xe]  ;;  %v6139_v29 = vld [vmem:[%s7754_s5 + $0x64] sm:$0xf] }
  0x9d   : > { %v6184_v53 = vcombine.low %v7915_v37, %v7923_v26  ;;  %v3432_v54 = vrot.slane %v6133_v50, 5  ;;  %v3435_v55 = vrot.slane %v6134_v51, 5  ;;  %v773_v60 = vshrl.u32 %v721_v56, 16  ;;  %v6140_v35 = vld [vmem:[%s7754_s5 + $0x68] sm:$0x1] }
  0x9e   : > { %v7940_v58 = vsel %vm7864_vm7, %v3427_v49, %v3428_v44  ;;  %v776_v61 = vshll.u32 %v721_v56, 16  ;;  %v782_v62 = vshll.u32 %v722_v57, 16  ;;  %v786_v2 = vshrl.u32 %v722_v57, 16  ;;  %v727_v49 = vld [vmem:[%s7754_s5 + $0x18] sm:$0xf] }
  0x9f   : > { %v6185_v63 = vcombine.low %v7929_v48, %v7940_v58  ;;  %v7947_v0 = vsel %vm7864_vm7, %v6170_v52, %v3432_v54  ;;  %v3434_v1 = vrot.slane %v3432_v54, 4  ;;  %v775_v5 = vrot.slane %v773_v60, 4  ;;  %v728_v54 = vld [vmem:[%s7754_s5 + $0x1c] sm:$0xf]  ;;  %v730_v48 = vld [vmem:[%s7754_s5 + $0x24] sm:$0xf] }
  0xa0   : > { %v778_v7 = vrot.slane %v776_v61, 5  ;;  %v784_v8 = vrot.slane %v782_v62, 5  ;;  %v792_v9 = vshll.u32 %v723_v59, 16  ;;  %v788_v12 = vrot.slane %v786_v2, 4  ;;  %v729_v62 = vld [vmem:[%s7754_s5 + $0x20] sm:$0x1] }
  0xa1   : > { %v7956_v11 = vsel %vm7864_vm7, %v3434_v1, %v3435_v55  ;;  %v6171_v13 = vrot.slane %v6135_v3, 9  ;;  %v3439_v14 = vrot.slane %v6136_v4, 5  ;;  %v3442_v20 = vrot.slane %v6137_v10, 5  ;;  %v6142_v10 = vld [vmem:[%s7754_s5 + $0x70] sm:$0xf] }
  0xa2   : > { %v6186_v17 = vcombine.low %v7947_v0, %v7956_v11  ;;  %v779_v18 = vor.u32 %v778_v7, %v775_v5  ;;  %v794_v19 = vrot.slane %v792_v9, 5  ;;  %v789_v23 = vor.u32 %v788_v12, %v784_v8 }
  0xa3   : > { %6639 = vmatmul.mubr.msk.bf16.gmra.mrb[24].mxu1 %vm443_vm1, %v7323_v36  ;;  %6785 = vmatmul.mubr.msk.bf16.vlgmr.msra.gmra.mrb[0].mxu0 %vm443_vm1, %v6182_v47  ;;  %v7968_v24 = vsel %vm7864_vm7, %v6171_v13, %v3439_v14  ;;  %v3441_v25 = vrot.slane %v3439_v14, 4  ;;  %v797_v27 = vshrl.u32 %v724_v15, 16  ;;  %v800_v31 = vshll.u32 %v724_v15, 16 }
  0xa4   : > { %6642 = vmatprep.mubr.msk.bf16.mxu1 %vm443_vm1, %v7324_v43  ;;  %6817 = vmatpush3.bf16.msra.mxu0 %v4064_v42  ;;  %v780_v30 = vrot.slane %v779_v18, 4  ;;  %v806_v33 = vshll.u32 %v725_v21, 16  ;;  %v810_v34 = vshrl.u32 %v725_v21, 16  ;;  %v790_v36 = vrot.slane %v789_v23, 4  ;;  %v1758_v42 = vld [vmem:[#allocation6 + $0x4] sm:$0x3] }
  0xa5   : > { %6788 = vmatprep.mubr.msk.bf16.mxu0 %vm443_vm1, %v6183_v41  ;;  %v7975_v38 = vsel %vm7864_vm7, %v3441_v25, %v3442_v20  ;;  %v799_v39 = vrot.slane %v797_v27, 4  ;;  %v816_v40 = vshll.u32 %v726_v22, 16  ;;  %v802_v46 = vrot.slane %v800_v31, 5  ;;  %7210 = vmatprep.subr.msk.bf16.mxu1 %vm492_vm0, %v1758_v42  ;;  %v731_v20 = vld [vmem:[%s7754_s5 + $0x28] sm:$0xf] }
  0xa6   : > { %v785_v43 = vsel %vm7792_vm4, %v780_v30, %v784_v8  ;;  %v6187_v44 = vcombine.low %v7968_v24, %v7975_v38  ;;  %v808_v47 = vrot.slane %v806_v33, 5  ;;  %v795_v50 = vsel %vm7792_vm4, %v790_v36, %v794_v19  ;;  %v6141_v8 = vld [vmem:[%s7754_s5 + $0x6c] sm:$0xe]  ;;  %v732_v27 = vld [vmem:[%s7754_s5 + $0x2c] sm:$0x1] }
  0xa7   : > { %v812_v51 = vrot.slane %v810_v34, 4  ;;  %v818_v52 = vrot.slane %v816_v40, 5  ;;  %v6172_v41 = vrot.slane %v6138_v28, 9  ;;  %v5893_v55 = vcombine.low %v785_v43, %v795_v50  ;;  %v6144_v33 = vld [vmem:[%s7754_s5 + $0x78] sm:$0xe] }
  0xa8   : > { %v803_v56 = vor.u32 %v802_v46, %v799_v39  ;;  %v3446_v57 = vrot.slane %v6139_v29, 5  ;;  %v3449_v59 = vrot.slane %v6140_v35, 5  ;;  %v1856_v61 = vsel %vm492_vm0, %v1758_v42, 0  ;;  %v6145_v40 = vld [vmem:[%s7754_s5 + $0x7c] sm:$0xf] }
  0xa9   : > { %v813_v60 = vor.u32 %v812_v51, %v808_v47  ;;  %v821_v1 = vshrl.u32 %v727_v49, 16  ;;  %v824_v2 = vshll.u32 %v727_v49, 16  ;;  %v830_v7 = vshll.u32 %v728_v54, 16  ;;  %v6146_v49 = vld [vmem:[%s7754_s5 + $0x80] sm:$0x1] }
  0xaa   : > { %v804_v3 = vrot.slane %v803_v56, 4  ;;  %v7996_v4 = vsel %vm7864_vm7, %v6172_v41, %v3446_v57  ;;  %v3448_v5 = vrot.slane %v3446_v57, 4  ;;  %v834_v9 = vshrl.u32 %v728_v54, 16  ;;  %v733_v54 = vld [vmem:[%s7754_s5 + $0x30] sm:$0xf] }
  0xab   : > { %6643 = vmatmul.mubr.msk.bf16.gmra.mrb[28].mxu1 %vm443_vm1, %v7325_v16  ;;  %6789 = vmatmul.mubr.msk.bf16.gmra.mrb[4].mxu0 %vm443_vm1, %v6184_v53  ;;  %v814_v37 = vrot.slane %v813_v60, 4  ;;  %v823_v26 = vrot.slane %v821_v1, 4  ;;  %v826_v53 = vrot.slane %v824_v2, 5  ;;  %v832_v14 = vrot.slane %v830_v7, 5  ;;  %v6143_v16 = vld [vmem:[%s7754_s5 + $0x74] sm:$0x1] }
  0xac   : > { %6648 = vmatprep.mubr.msk.bf16.mxu1 %vm443_vm1, %v5893_v55  ;;  %6792 = vmatprep.mubr.msk.bf16.mxu0 %vm443_vm1, %v6185_v63  ;;  %v809_v12 = vsel %vm7792_vm4, %v804_v3, %v808_v47  ;;  %v8008_v13 = vsel %vm7864_vm7, %v3448_v5, %v3449_v59  ;;  %v840_v15 = vshll.u32 %v729_v62, 16  ;;  %v836_v19 = vrot.slane %v834_v9, 4  ;;  %v735_v2 = vld [vmem:[%s7754_s5 + $0x38] sm:$0x1] }
  0xad   : > { %v819_v58 = vsel %vm7792_vm4, %v814_v37, %v818_v52  ;;  %v6188_v63 = vcombine.low %v7996_v4, %v8008_v13  ;;  %v827_v18 = vor.u32 %v826_v53, %v823_v26  ;;  %v6173_v23 = vrot.slane %v6141_v8, 9  ;;  %v6147_v8 = vld [vmem:[%s7754_s5 + $0x84] sm:$0xe] }
  0xae   : > { %v5894_v21 = vcombine.low %v809_v12, %v819_v58  ;;  %v842_v22 = vrot.slane %v840_v15, 5  ;;  %v3453_v25 = vrot.slane %v6142_v10, 5  ;;  %v837_v29 = vor.u32 %v836_v19, %v832_v14  ;;  %v6148_v10 = vld [vmem:[%s7754_s5 + $0x88] sm:$0xf]  ;;  %v736_v58 = vld [vmem:[%s7754_s5 + $0x3c] sm:$0xf] }
  0xaf   : > { %v828_v28 = vrot.slane %v827_v18, 4  ;;  %v3456_v30 = vrot.slane %v6143_v16, 5  ;;  %v845_v31 = vshrl.u32 %v730_v48, 16  ;;  %v848_v36 = vshll.u32 %v730_v48, 16  ;;  %v6149_v48 = vld [vmem:[%s7754_s5 + $0x8c] sm:$0x1] }
  0xb0   : > { %v3454_v34 = vsel %vm7864_vm7, %v6173_v23, %v3453_v25  ;;  %v3455_v35 = vrot.slane %v3453_v25, 4  ;;  %v854_v39 = vshll.u32 %v731_v20, 16  ;;  %v838_v43 = vrot.slane %v837_v29, 4  ;;  %v738_v29 = vld [vmem:[%s7754_s5 + $0x44] sm:$0x1] }
  0xb1   : > { %v833_v42 = vsel %vm7792_vm4, %v828_v28, %v832_v14  ;;  %v847_v46 = vrot.slane %v845_v31, 4  ;;  %v858_v47 = vshrl.u32 %v731_v20, 16  ;;  %v850_v51 = vrot.slane %v848_v36, 5 }
  0xb2   : > { %v3457_v50 = vsel %vm7864_vm7, %v3455_v35, %v3456_v30  ;;  %v856_v52 = vrot.slane %v854_v39, 5  ;;  %v864_v41 = vshll.u32 %v732_v27, 16  ;;  %v843_v55 = vsel %vm7792_vm4, %v838_v43, %v842_v22  ;;  %v737_v22 = vld [vmem:[%s7754_s5 + $0x40] sm:$0xf]  ;;  %v6150_v35 = vld [vmem:[%s7754_s5 + $0x90] sm:$0xe] }
  0xb3   : > { %6649 = vmatmul.mubr.msk.bf16.vlgmr.msra.gmra.mrb[0].mxu1 %vm443_vm1, %v5894_v21  ;;  %6793 = vmatmul.mubr.msk.bf16.gmra.mrb[8].mxu0 %vm443_vm1, %v6186_v17  ;;  %v6189_v56 = vcombine.low %v3454_v34, %v3457_v50  ;;  %v860_v0 = vrot.slane %v858_v47, 4  ;;  %v6174_v11 = vrot.slane %v6144_v33, 9  ;;  %v734_v17 = vld [vmem:[%s7754_s5 + $0x34] sm:$0xf]  ;;  %v5895_v57 = vcombine.low %v833_v42, %v843_v55  ;;  %v6152_v47 = vld [vmem:[%s7754_s5 + $0x98] sm:$0x1] }
  0xb4   : > { %6681 = vmatpush3.bf16.msra.mxu1 %v1856_v61  ;;  %6796 = vmatprep.mubr.msk.bf16.mxu0 %vm443_vm1, %v6187_v44  ;;  %v851_v59 = vor.u32 %v850_v51, %v847_v46  ;;  %v866_v60 = vrot.slane %v864_v41, 5  ;;  %v3460_v61 = vrot.slane %v6145_v40, 5  ;;  %v3463_v1 = vrot.slane %v6146_v49, 5  ;;  %v6151_v39 = vld [vmem:[%s7754_s5 + $0x94] sm:$0xf] }
  0xb5   : > { %v861_v62 = vor.u32 %v860_v0, %v856_v52  ;;  %v869_v3 = vshrl.u32 %v733_v54, 16  ;;  %v872_v24 = vshll.u32 %v733_v54, 16  ;;  %6652 = vmatprep.mubr.msk.bf16.mxu1 %vm443_vm1, %v5895_v57  ;;  %v878_v7 = vshll.u32 %v734_v17, 16  ;;  %v739_v41 = vld [vmem:[%s7754_s5 + $0x48] sm:$0xf] }
  0xb6   : > { %v852_v38 = vrot.slane %v851_v59, 4  ;;  %v8044_v44 = vsel %vm7864_vm7, %v6174_v11, %v3460_v61  ;;  %v3462_v5 = vrot.slane %v3460_v61, 4  ;;  %v882_v9 = vshrl.u32 %v734_v17, 16  ;;  %v740_v11 = vld [vmem:[%s7754_s5 + $0x4c] sm:$0xf] }
  0xb7   : > { %v862_v37 = vrot.slane %v861_v62, 4  ;;  %v871_v26 = vrot.slane %v869_v3, 4  ;;  %v874_v53 = vrot.slane %v872_v24, 5  ;;  %v880_v15 = vrot.slane %v878_v7, 5  ;;  %v6153_v7 = vld [vmem:[%s7754_s5 + $0x9c] sm:$0xe] }
  0xb8   : > { %v857_v12 = vsel %vm7792_vm4, %v852_v38, %v856_v52  ;;  %v3464_v14 = vsel %vm7864_vm7, %v3462_v5, %v3463_v1  ;;  %v888_v16 = vshll.u32 %v735_v2, 16  ;;  %v884_v21 = vrot.slane %v882_v9, 4  ;;  %v741_v1 = vld [vmem:[%s7754_s5 + $0x50] sm:$0x1]  ;;  %v6154_v9 = vld [vmem:[%s7754_s5 + $0xa0] sm:$0xf] }
  0xb9   : > { %v867_v18 = vsel %vm7792_vm4, %v862_v37, %v866_v60  ;;  %v6190_v19 = vcombine.low %v8044_v44, %v3464_v14  ;;  %v875_v20 = vor.u32 %v874_v53, %v871_v26  ;;  %v6175_v27 = vrot.slane %v6147_v8, 9 }
  0xba   : > { %v5896_v23 = vcombine.low %v857_v12, %v867_v18  ;;  %v890_v25 = vrot.slane %v888_v16, 5  ;;  %v3467_v28 = vrot.slane %v6148_v10, 5  ;;  %v885_v31 = vor.u32 %v884_v21, %v880_v15  ;;  %v6155_v16 = vld [vmem:[%s7754_s5 + $0xa4] sm:$0x1]  ;;  %v743_v21 = vld [vmem:[%s7754_s5 + $0x58] sm:$0xf] }
  0xbb   : > { %6797 = vmatmul.mubr.msk.bf16.gmra.mrb[12].mxu0 %vm443_vm1, %v6188_v63  ;;  %v876_v30 = vrot.slane %v875_v20, 4  ;;  %v3470_v33 = vrot.slane %v6149_v48, 5  ;;  %v893_v34 = vshrl.u32 %v736_v58, 16  ;;  %v896_v63 = vshll.u32 %v736_v58, 16  ;;  %v742_v48 = vld [vmem:[%s7754_s5 + $0x54] sm:$0xf] }
  0xbc   : > { %6800 = vmatprep.mubr.msk.bf16.mxu0 %vm443_vm1, %v6189_v56  ;;  %6653 = vmatmul.mubr.msk.bf16.gmra.mrb[4].mxu1 %vm443_vm1, %v5896_v23  ;;  %v3468_v4 = vsel %vm7864_vm7, %v6175_v27, %v3467_v28  ;;  %v3469_v13 = vrot.slane %v3467_v28, 4  ;;  %v902_v36 = vshll.u32 %v737_v22, 16  ;;  %v886_v42 = vrot.slane %v885_v31, 4  ;;  %v744_v28 = vld [vmem:[%s7754_s5 + $0x5c] sm:$0x1] }
  0xbd   : > { %v881_v40 = vsel %vm7792_vm4, %v876_v30, %v880_v15  ;;  %v895_v43 = vrot.slane %v893_v34, 4  ;;  %v906_v46 = vshrl.u32 %v737_v22, 16  ;;  %v898_v50 = vrot.slane %v896_v63, 5  ;;  %v6156_v34 = vld [vmem:[%s7754_s5 + $0xa8] sm:$0xe] }
  0xbe   : > { %v3471_v49 = vsel %vm7864_vm7, %v3469_v13, %v3470_v33  ;;  %v904_v51 = vrot.slane %v902_v36, 5  ;;  %v912_v52 = vshll.u32 %v738_v29, 16  ;;  %v891_v54 = vsel %vm7792_vm4, %v886_v42, %v890_v25  ;;  %v6157_v36 = vld [vmem:[%s7754_s5 + $0xac] sm:$0xf] }
  0xbf   : > { %v6191_v55 = vcombine.low %v3468_v4, %v3471_v49  ;;  %v908_v56 = vrot.slane %v906_v46, 4  ;;  %v6176_v0 = vrot.slane %v6150_v35, 9  ;;  %v5897_v17 = vcombine.low %v881_v40, %v891_v54  ;;  %v6158_v46 = vld [vmem:[%s7754_s5 + $0xb0] sm:$0x1] }
  0xc0   : > { %v899_v57 = vor.u32 %v898_v50, %v895_v43  ;;  %v914_v59 = vrot.slane %v912_v52, 5  ;;  %v3474_v60 = vrot.slane %v6151_v39, 5  ;;  %v3477_v62 = vrot.slane %v6152_v47, 5  ;;  %v745_v52 = vld [vmem:[%s7754_s5 + $0x60] sm:$0xf] }
  0xc1   : > { %v909_v61 = vor.u32 %v908_v56, %v904_v51  ;;  %v917_v2 = vshrl.u32 %v739_v41, 16  ;;  %v920_v3 = vshll.u32 %v739_v41, 16  ;;  %6656 = vmatprep.mubr.msk.bf16.mxu1 %vm443_vm1, %v5897_v17  ;;  %v926_v5 = vshll.u32 %v740_v11, 16 }
  0xc2   : > { %v900_v24 = vrot.slane %v899_v57, 4  ;;  %v3475_v38 = vsel %vm7864_vm7, %v6176_v0, %v3474_v60  ;;  %v3476_v44 = vrot.slane %v3474_v60, 4  ;;  %v930_v53 = vshrl.u32 %v740_v11, 16  ;;  %v746_v0 = vld [vmem:[%s7754_s5 + $0x64] sm:$0xf] }
  0xc3   : > { %6801 = vmatmul.mubr.msk.bf16.gmra.mrb[16].mxu0 %vm443_vm1, %v6190_v19  ;;  %v910_v8 = vrot.slane %v909_v61, 4  ;;  %v919_v37 = vrot.slane %v917_v2, 4  ;;  %v922_v26 = vrot.slane %v920_v3, 5  ;;  %v928_v14 = vrot.slane %v926_v5, 5  ;;  %v747_v11 = vld [vmem:[%s7754_s5 + $0x68] sm:$0x1] }
  0xc4   : > { %6804 = vmatprep.mubr.msk.bf16.mxu0 %vm443_vm1, %v6191_v55  ;;  %v905_v10 = vsel %vm7792_vm4, %v900_v24, %v904_v51  ;;  %v3478_v12 = vsel %vm7864_vm7, %v3476_v44, %v3477_v62  ;;  %v936_v15 = vshll.u32 %v741_v1, 16  ;;  %v932_v20 = vrot.slane %v930_v53, 4  ;;  %v6159_v3 = vld [vmem:[%s7754_s5 + $0xb4] sm:$0xe]  ;;  %v6160_v24 = vld [vmem:[%s7754_s5 + $0xb8] sm:$0xf] }
  0xc5   : > { %v915_v58 = vsel %vm7792_vm4, %v910_v8, %v914_v59  ;;  %v6192_v18 = vcombine.low %v3475_v38, %v3478_v12  ;;  %v923_v19 = vor.u32 %v922_v26, %v919_v37  ;;  %v6177_v25 = vrot.slane %v6153_v7, 9  ;;  %v8115_v38 = vld [vmem:[#allocation6 + $0xe] sm:$0x3]  ;;  %v6161_v37 = vld [vmem:[%s7754_s5 + $0xbc] sm:$0x1] }
  0xc6   : > { %v5898_v22 = vcombine.low %v905_v10, %v915_v58  ;;  %v938_v23 = vrot.slane %v936_v15, 5  ;;  %v3481_v27 = vrot.slane %v6154_v9, 5  ;;  %v933_v30 = vor.u32 %v932_v20, %v928_v14  ;;  %7216 = vmatprep.subr.msk.bf16.mxu0 %vm492_vm0, %v8115_v38  ;;  %v748_v12 = vld [vmem:[%s7754_s5 + $0x6c] sm:$0xf]  ;;  %v749_v58 = vld [vmem:[%s7754_s5 + $0x70] sm:$0xf] }
  0xc7   : > { %v924_v29 = vrot.slane %v923_v19, 4  ;;  %v3484_v31 = vrot.slane %v6155_v16, 5  ;;  %v941_v33 = vshrl.u32 %v742_v48, 16  ;;  %v944_v13 = vshll.u32 %v742_v48, 16 }
  0xc8   : > { %6657 = vmatmul.mubr.msk.bf16.gmra.mrb[8].mxu1 %vm443_vm1, %v5898_v22  ;;  %v3482_v35 = vsel %vm7864_vm7, %v6177_v25, %v3481_v27  ;;  %v3483_v4 = vrot.slane %v3481_v27, 4  ;;  %v950_v63 = vshll.u32 %v743_v21, 16  ;;  %v934_v40 = vrot.slane %v933_v30, 4  ;;  %v750_v22 = vld [vmem:[%s7754_s5 + $0x74] sm:$0x1] }
  0xc9   : > { %v929_v39 = vsel %vm7792_vm4, %v924_v29, %v928_v14  ;;  %v943_v42 = vrot.slane %v941_v33, 4  ;;  %v954_v43 = vshrl.u32 %v743_v21, 16  ;;  %v946_v49 = vrot.slane %v944_v13, 5  ;;  %v6162_v29 = vld [vmem:[%s7754_s5 + $0xc0] sm:$0xe] }
  0xca   : > { %v3485_v47 = vsel %vm7864_vm7, %v3483_v4, %v3484_v31  ;;  %v952_v50 = vrot.slane %v950_v63, 5  ;;  %v960_v51 = vshll.u32 %v744_v28, 16  ;;  %v939_v41 = vsel %vm7792_vm4, %v934_v40, %v938_v23 }
  0xcb   : > { %6805 = vmatmul.mubr.msk.bf16.gmra.mrb[20].mxu0 %vm443_vm1, %v6192_v18  ;;  %v6193_v54 = vcombine.low %v3482_v35, %v3485_v47  ;;  %v956_v55 = vrot.slane %v954_v43, 4  ;;  %v6178_v56 = vrot.slane %v6156_v34, 9  ;;  %v5899_v17 = vcombine.low %v929_v39, %v939_v41  ;;  %v6163_v35 = vld [vmem:[%s7754_s5 + $0xc4] sm:$0xf]  ;;  %v6164_v39 = vld [vmem:[%s7754_s5 + $0xc8] sm:$0x1] }
  0xcc   : > { %v947_v57 = vor.u32 %v946_v49, %v943_v42  ;;  %v962_v59 = vrot.slane %v960_v51, 5  ;;  %v3488_v60 = vrot.slane %v6157_v36, 5  ;;  %v3491_v62 = vrot.slane %v6158_v46, 5 }
  0xcd   : > { %6808 = vmatprep.mubr.msk.bf16.mxu0 %vm443_vm1, %v6193_v54  ;;  %v957_v61 = vor.u32 %v956_v55, %v952_v50  ;;  %v965_v1 = vshrl.u32 %v745_v52, 16  ;;  %v968_v2 = vshll.u32 %v745_v52, 16  ;;  %6660 = vmatprep.mubr.msk.bf16.mxu1 %vm443_vm1, %v5899_v17  ;;  %v974_v8 = vshll.u32 %v746_v0, 16  ;;  %v751_v52 = vld [vmem:[%s7754_s5 + $0x78] sm:$0xf] }
  0xce   : > { %v948_v44 = vrot.slane %v947_v57, 4  ;;  %v3489_v5 = vsel %vm7864_vm7, %v6178_v56, %v3488_v60  ;;  %v3490_v7 = vrot.slane %v3488_v60, 4  ;;  %v978_v10 = vshrl.u32 %v746_v0, 16  ;;  %v752_v0 = vld [vmem:[%s7754_s5 + $0x7c] sm:$0xf] }
  0xcf   : > { %v958_v26 = vrot.slane %v957_v61, 4  ;;  %v967_v53 = vrot.slane %v965_v1, 4  ;;  %v970_v9 = vrot.slane %v968_v2, 5  ;;  %v976_v16 = vrot.slane %v974_v8, 5  ;;  %v754_v8 = vld [vmem:[%s7754_s5 + $0x84] sm:$0xf] }
  0xd0   : > { %v953_v14 = vsel %vm7792_vm4, %v948_v44, %v952_v50  ;;  %v3492_v15 = vsel %vm7864_vm7, %v3490_v7, %v3491_v62  ;;  %v984_v48 = vshll.u32 %v747_v11, 16  ;;  %v980_v21 = vrot.slane %v978_v10, 4  ;;  %v753_v62 = vld [vmem:[%s7754_s5 + $0x80] sm:$0x1]  ;;  %v7326_v7 = vld [vmem:[%s7754_s5 + $0x18] sm:$0xff]  }
  0xd1   : > { %v963_v18 = vsel %vm7792_vm4, %v958_v26, %v962_v59  ;;  %v6194_v19 = vcombine.low %v3489_v5, %v3492_v15  ;;  %v971_v20 = vor.u32 %v970_v9, %v967_v53  ;;  %v6179_v27 = vrot.slane %v6159_v3, 9  ;;  %v755_v10 = vld [vmem:[%s7754_s5 + $0x88] sm:$0xf] }
  0xd2   : > { %v5900_v23 = vcombine.low %v953_v14, %v963_v18  ;;  %v986_v25 = vrot.slane %v984_v48, 5  ;;  %v3495_v28 = vrot.slane %v6160_v24, 5  ;;  %v981_v31 = vor.u32 %v980_v21, %v976_v16  ;;  %v757_v21 = vld [vmem:[%s7754_s5 + $0x90] sm:$0xf] }
  0xd3   : > { %6809 = vmatmul.mubr.msk.bf16.gmra.mrb[24].mxu0 %vm443_vm1, %v6194_v19  ;;  %v972_v30 = vrot.slane %v971_v20, 4  ;;  %v3498_v33 = vrot.slane %v6161_v37, 5  ;;  %v989_v34 = vshrl.u32 %v748_v12, 16  ;;  %v992_v63 = vshll.u32 %v748_v12, 16  ;;  %v756_v20 = vld [vmem:[%s7754_s5 + $0x8c] sm:$0x1] }
  0xd4   : > { %6661 = vmatmul.mubr.msk.bf16.gmra.mrb[12].mxu1 %vm443_vm1, %v5900_v23  ;;  %v3496_v4 = vsel %vm7864_vm7, %v6179_v27, %v3495_v28  ;;  %v3497_v13 = vrot.slane %v3495_v28, 4  ;;  %v998_v36 = vshll.u32 %v749_v58, 16  ;;  %v982_v42 = vrot.slane %v981_v31, 4  ;;  %v758_v28 = vld [vmem:[%s7754_s5 + $0x94] sm:$0xf] }
  0xd5   : > { %v977_v40 = vsel %vm7792_vm4, %v972_v30, %v976_v16  ;;  %v991_v43 = vrot.slane %v989_v34, 4  ;;  %v1002_v46 = vshrl.u32 %v749_v58, 16  ;;  %v994_v49 = vrot.slane %v992_v63, 5 }
  0xd6   : > { %v3499_v47 = vsel %vm7864_vm7, %v3497_v13, %v3498_v33  ;;  %v1000_v50 = vrot.slane %v998_v36, 5  ;;  %v1008_v51 = vshll.u32 %v750_v22, 16  ;;  %v987_v41 = vsel %vm7792_vm4, %v982_v42, %v986_v25  ;;  %v759_v42 = vld [vmem:[%s7754_s5 + $0x98] sm:$0x1] }
  0xd7   : > { %v6195_v54 = vcombine.low %v3496_v4, %v3499_v47  ;;  %v1004_v55 = vrot.slane %v1002_v46, 4  ;;  %v6180_v56 = vrot.slane %v6162_v29, 9  ;;  %v5901_v11 = vcombine.low %v977_v40, %v987_v41  ;;  %v7327_v47 = vld [vmem:[%s7754_s5 + $0x24] sm:$0xff]  }
  0xd8   : > { %v995_v17 = vor.u32 %v994_v49, %v991_v43  ;;  %v1010_v57 = vrot.slane %v1008_v51, 5  ;;  %v3502_v59 = vrot.slane %v6163_v35, 5  ;;  %v3505_v61 = vrot.slane %v6164_v39, 5  ;;  %v760_v51 = vld [vmem:[%s7754_s5 + $0x9c] sm:$0xf] }
  0xd9   : > { %6812 = vmatprep.mubr.msk.bf16.mxu0 %vm443_vm1, %v6195_v54  ;;  %v1005_v60 = vor.u32 %v1004_v55, %v1000_v50  ;;  %v1013_v1 = vshrl.u32 %v751_v52, 16  ;;  %v1016_v2 = vshll.u32 %v751_v52, 16  ;;  %6664 = vmatprep.mubr.msk.bf16.mxu1 %vm443_vm1, %v5901_v11  ;;  %v1022_v5 = vshll.u32 %v752_v0, 16  ;;  %v761_v55 = vld [vmem:[%s7754_s5 + $0xa0] sm:$0xf] }
  0xda   : > { %v996_v3 = vrot.slane %v995_v17, 4  ;;  %v3503_v24 = vsel %vm7864_vm7, %v6180_v56, %v3502_v59  ;;  %v3504_v44 = vrot.slane %v3502_v59, 4  ;;  %v1026_v9 = vshrl.u32 %v752_v0, 16 }
  0xdb   : > { %v1006_v37 = vrot.slane %v1005_v60, 4  ;;  %v1015_v26 = vrot.slane %v1013_v1, 4  ;;  %v1018_v53 = vrot.slane %v1016_v2, 5  ;;  %v1024_v15 = vrot.slane %v1022_v5, 5  ;;  %v762_v1 = vld [vmem:[%s7754_s5 + $0xa4] sm:$0x1] }
  0xdc   : > { %v1001_v12 = vsel %vm7792_vm4, %v996_v3, %v1000_v50  ;;  %v3506_v14 = vsel %vm7864_vm7, %v3504_v44, %v3505_v61  ;;  %v1032_v16 = vshll.u32 %v753_v62, 16  ;;  %v1028_v19 = vrot.slane %v1026_v9, 4  ;;  %v763_v5 = vld [vmem:[%s7754_s5 + $0xa8] sm:$0xf] }
  0xdd   : > { %v1011_v48 = vsel %vm7792_vm4, %v1006_v37, %v1010_v57  ;;  %v6196_v58 = vcombine.low %v3503_v24, %v3506_v14  ;;  %v1019_v18 = vor.u32 %v1018_v53, %v1015_v26  ;;  %v1037_v25 = vshrl.u32 %v754_v8, 16  ;;  %v7328_v57 = vld [vmem:[%s7754_s5 + $0x30] sm:$0xff]  }
  0xde   : > { %v5902_v22 = vcombine.low %v1001_v12, %v1011_v48  ;;  %v1034_v23 = vrot.slane %v1032_v16, 5  ;;  %v1040_v27 = vshll.u32 %v754_v8, 16  ;;  %v1029_v30 = vor.u32 %v1028_v19, %v1024_v15  ;;  %v765_v19 = vld [vmem:[%s7754_s5 + $0xb0] sm:$0x1] }
  0xdf   : > { %6813 = vmatmul.mubr.msk.bf16.gmra.mrb[28].mxu0 %vm443_vm1, %v6196_v58  ;;  %v1020_v29 = vrot.slane %v1019_v18, 4  ;;  %v1046_v31 = vshll.u32 %v755_v10, 16  ;;  %v1050_v33 = vshrl.u32 %v755_v10, 16  ;;  %v1039_v34 = vrot.slane %v1037_v25, 4  ;;  %v766_v25 = vld [vmem:[%s7754_s5 + $0xb4] sm:$0xf] }
  0xe0   : > { %6665 = vmatmul.mubr.msk.bf16.gmra.mrb[16].mxu1 %vm443_vm1, %v5902_v22  ;;  %6818 = vmatprep.mubr.msk.bf16.mxu0 %vm443_vm1, %v7326_v7  ;;  %v1042_v35 = vrot.slane %v1040_v27, 5  ;;  %v1056_v4 = vshll.u32 %v756_v20, 16  ;;  %v4854_v13 = vsel %vm492_vm0, %v8115_v38, 0  ;;  %v1030_v36 = vrot.slane %v1029_v30, 4  ;;  %v764_v7 = vld [vmem:[%s7754_s5 + $0xac] sm:$0xf] }
  0xe1   : > { %v1025_v63 = vsel %vm7792_vm4, %v1020_v29, %v1024_v15  ;;  %v1048_v39 = vrot.slane %v1046_v31, 5  ;;  %v1052_v40 = vrot.slane %v1050_v33, 4  ;;  %v1061_v49 = vshrl.u32 %v757_v21, 16  ;;  %v8188_v15 = vld [vmem:[#allocation6 + $0x6] sm:$0x3] }
  0xe2   : > { %v1043_v43 = vor.u32 %v1042_v35, %v1039_v34  ;;  %v1058_v46 = vrot.slane %v1056_v4, 5  ;;  %v1064_v50 = vshll.u32 %v757_v21, 16  ;;  %v1035_v52 = vsel %vm7792_vm4, %v1030_v36, %v1034_v23  ;;  %7211 = vmatprep.subr.msk.bf16.mxu1 %vm492_vm0, %v8188_v15  ;;  %v767_v27 = vld [vmem:[%s7754_s5 + $0xb8] sm:$0xf]  ;;  %v7329_v31 = vld [vmem:[%s7754_s5 + $0x3c] sm:$0xff]  }
  0xe3   : > { %v1053_v38 = vor.u32 %v1052_v40, %v1048_v39  ;;  %v1070_v41 = vshll.u32 %v758_v28, 16  ;;  %v1074_v54 = vshrl.u32 %v758_v28, 16  ;;  %v5903_v56 = vcombine.low %v1025_v63, %v1035_v52  ;;  %v7330_v63 = vld [vmem:[%s7754_s5 + $0x48] sm:$0xff]   ;;  %v1515_v52 = vld [vmem:[%s7754_s5 + $0x4] sm:$0xf] }
  0xe4   : > { %v1044_v0 = vrot.slane %v1043_v43, 4  ;;  %v1063_v11 = vrot.slane %v1061_v49, 4  ;;  %v1066_v17 = vrot.slane %v1064_v50, 5  ;;  %v1080_v62 = vshll.u32 %v759_v42, 16  ;;  %v768_v43 = vld [vmem:[%s7754_s5 + $0xbc] sm:$0x1] }
  0xe5   : > { %v1054_v59 = vrot.slane %v1053_v38, 4  ;;  %v1072_v60 = vrot.slane %v1070_v41, 5  ;;  %v1076_v61 = vrot.slane %v1074_v54, 4  ;;  %6668 = vmatprep.mubr.msk.bf16.mxu1 %vm443_vm1, %v5903_v56  ;;  %v1085_v24 = vshrl.u32 %v760_v51, 16  ;;  %v1516_v56 = vld [vmem:[%s7754_s5 + $0x8] sm:$0x1] }
  0xe6   : > { %v1049_v2 = vsel %vm7792_vm4, %v1044_v0, %v1048_v39  ;;  %v1067_v3 = vor.u32 %v1066_v17, %v1063_v11  ;;  %v1088_v44 = vshll.u32 %v760_v51, 16  ;;  %v1082_v26 = vrot.slane %v1080_v62, 5  ;;  %v1514_v51 = vld [vmem:[%s7754_s5] sm:$0xe] }
  0xe7   : > { %v1059_v8 = vsel %vm7792_vm4, %v1054_v59, %v1058_v46  ;;  %6819 = vmatmul.mubr.msk.bf16.vlgmr.msra.gmra.mrb[0].mxu0 %vm443_vm1, %v7327_v47  ;;  %v1077_v37 = vor.u32 %v1076_v61, %v1072_v60  ;;  %v1094_v53 = vshll.u32 %v761_v55, 16  ;;  %v1087_v12 = vrot.slane %v1085_v24, 4 }
  0xe8   : > { %v5904_v9 = vcombine.low %v1049_v2, %v1059_v8  ;;  %6851 = vmatpush3.bf16.msra.mxu0 %v4854_v13  ;;  %v1068_v10 = vrot.slane %v1067_v3, 4  ;;  %6822 = vmatprep.mubr.msk.bf16.mxu0 %vm443_vm1, %v7328_v57  ;;  %v1090_v14 = vrot.slane %v1088_v44, 5  ;;  %v1098_v58 = vshrl.u32 %v761_v55, 16  ;;  %v1518_v2 = vld [vmem:[%s7754_s5 + $0x10] sm:$0xf] }
  0xe9   : > { %v1078_v16 = vrot.slane %v1077_v37, 4  ;;  %v1096_v48 = vrot.slane %v1094_v53, 5  ;;  %v1104_v18 = vshll.u32 %v762_v1, 16  ;;  %v1109_v22 = vshrl.u32 %v763_v5, 16  ;;  %v1517_v1 = vld [vmem:[%s7754_s5 + $0xc] sm:$0xe] }
  0xea   : > { %6669 = vmatmul.mubr.msk.bf16.gmra.mrb[20].mxu1 %vm443_vm1, %v5904_v9  ;;  %v1073_v20 = vsel %vm7792_vm4, %v1068_v10, %v1072_v60  ;;  %v1091_v21 = vor.u32 %v1090_v14, %v1087_v12  ;;  %v1112_v23 = vshll.u32 %v763_v5, 16  ;;  %v1100_v29 = vrot.slane %v1098_v58, 4  ;;  %v1519_v8 = vld [vmem:[%s7754_s5 + $0x14] sm:$0x1]  ;;  %v1520_v10 = vld [vmem:[%s7754_s5 + $0x18] sm:$0xe] }
  0xeb   : > { %v1083_v28 = vsel %vm7792_vm4, %v1078_v16, %v1082_v26  ;;  %v1106_v30 = vrot.slane %v1104_v18, 5  ;;  %v1118_v33 = vshll.u32 %v764_v7, 16  ;;  %v1111_v4 = vrot.slane %v1109_v22, 4  ;;  %v1521_v12 = vld [vmem:[%s7754_s5 + $0x1c] sm:$0xf]  ;;  %v7332_v58 = vld [vmem:[%s7754_s5 + $0x60] sm:$0xff]  }
  0xec   : > { %v5905_v34 = vcombine.low %v1073_v20, %v1083_v28  ;;  %v1092_v35 = vrot.slane %v1091_v21, 4  ;;  %v1114_v13 = vrot.slane %v1112_v23, 5  ;;  %v1101_v36 = vor.u32 %v1100_v29, %v1096_v48 }
  0xed   : > { %v1120_v39 = vrot.slane %v1118_v33, 5  ;;  %v1122_v40 = vshrl.u32 %v764_v7, 16  ;;  %v1128_v42 = vshll.u32 %v765_v19, 16  ;;  %v1133_v49 = vshrl.u32 %v766_v25, 16  ;;  %v7331_v7 = vld [vmem:[%s7754_s5 + $0x54] sm:$0xff]  }
  0xee   : > { %6672 = vmatprep.mubr.msk.bf16.mxu1 %vm443_vm1, %v5905_v34  ;;  %v1097_v46 = vsel %vm7792_vm4, %v1092_v35, %v1096_v48  ;;  %v1115_v47 = vor.u32 %v1114_v13, %v1111_v4  ;;  %v1136_v50 = vshll.u32 %v766_v25, 16  ;;  %v1102_v38 = vrot.slane %v1101_v36, 4  ;;  %v1522_v19 = vld [vmem:[%s7754_s5 + $0x20] sm:$0x1]  ;;  %v1523_v25 = vld [vmem:[%s7754_s5 + $0x24] sm:$0xe] }
  0xef   : > { %6823 = vmatmul.mubr.msk.bf16.gmra.mrb[4].mxu0 %vm443_vm1, %v7329_v31  ;;  %v1124_v41 = vrot.slane %v1122_v40, 4  ;;  %v1130_v54 = vrot.slane %v1128_v42, 5  ;;  %v1142_v55 = vshll.u32 %v767_v27, 16  ;;  %v1135_v11 = vrot.slane %v1133_v49, 4  ;;  %v1525_v33 = vld [vmem:[%s7754_s5 + $0x2c] sm:$0x1] }
  0xf0   : > { %v1116_v0 = vrot.slane %v1115_v47, 4  ;;  %6826 = vmatprep.mubr.msk.bf16.mxu0 %vm443_vm1, %v7330_v63  ;;  %v1138_v17 = vrot.slane %v1136_v50, 5  ;;  %v1146_v57 = vshrl.u32 %v767_v27, 16  ;;  %v1107_v59 = vsel %vm7792_vm4, %v1102_v38, %v1106_v30  ;;  %v1524_v27 = vld [vmem:[%s7754_s5 + $0x28] sm:$0xf] }
  0xf1   : > { %v1125_v60 = vor.u32 %v1124_v41, %v1120_v39  ;;  %v1144_v61 = vrot.slane %v1142_v55, 5  ;;  %v1152_v62 = vshll.u32 %v768_v43, 16  ;;  %v5906_v3 = vcombine.low %v1097_v46, %v1107_v59  ;;  %v1526_v34 = vld [vmem:[%s7754_s5 + $0x30] sm:$0xe]  ;;  %v1527_v35 = vld [vmem:[%s7754_s5 + $0x34] sm:$0xf] }
  0xf2   : > { %v1121_v24 = vsel %vm7792_vm4, %v1116_v0, %v1120_v39  ;;  %v1139_v44 = vor.u32 %v1138_v17, %v1135_v11  ;;  %v1148_v5 = vrot.slane %v1146_v57, 4  ;;  %v5925_v53 = vrot.slane %v1514_v51, 9  ;;  %v1528_v39 = vld [vmem:[%s7754_s5 + $0x38] sm:$0x1]  ;;  %v1529_v40 = vld [vmem:[%s7754_s5 + $0x3c] sm:$0xe] }
  0xf3   : > { %v1126_v37 = vrot.slane %v1125_v60, 4  ;;  %v1154_v26 = vrot.slane %v1152_v62, 5  ;;  %v1615_v9 = vrot.slane %v1515_v52, 5  ;;  %6673 = vmatmul.mubr.msk.bf16.gmra.mrb[24].mxu1 %vm443_vm1, %v5906_v3  ;;  %v1618_v48 = vrot.slane %v1516_v56, 5  ;;  %v1530_v49 = vld [vmem:[%s7754_s5 + $0x40] sm:$0xf] }
  0xf4   : > { %v1140_v14 = vrot.slane %v1139_v44, 4  ;;  %v1149_v16 = vor.u32 %v1148_v5, %v1144_v61  ;;  %v5926_v18 = vrot.slane %v1517_v1, 9  ;;  %v1622_v23 = vrot.slane %v1518_v2, 5  ;;  %v7333_v51 = vld [vmem:[%s7754_s5 + $0x6c] sm:$0xff]   ;;  %v1531_v41 = vld [vmem:[%s7754_s5 + $0x44] sm:$0x1] }
  0xf5   : > { %v1131_v20 = vsel %vm7792_vm4, %v1126_v37, %v1130_v54  ;;  %v1616_v21 = vsel %vm7864_vm7, %v5925_v53, %v1615_v9  ;;  %v1617_v22 = vrot.slane %v1615_v9, 4  ;;  %v1625_v31 = vrot.slane %v1519_v8, 5  ;;  %v7334_v0 = vld [vmem:[%s7754_s5 + $0x78] sm:$0xff]   ;;  %v1532_v17 = vld [vmem:[%s7754_s5 + $0x48] sm:$0xe] }
  0xf6   : > { %v5907_v28 = vcombine.low %v1121_v24, %v1131_v20  ;;  %v1145_v29 = vsel %vm7792_vm4, %v1140_v14, %v1144_v61  ;;  %v1150_v30 = vrot.slane %v1149_v16, 4  ;;  %v8240_v13 = vsel %vm7864_vm7, %v5926_v18, %v1622_v23  ;;  %v1533_v57 = vld [vmem:[%s7754_s5 + $0x4c] sm:$0xf]  ;;  %v1534_v1 = vld [vmem:[%s7754_s5 + $0x50] sm:$0x1] }
  0xf7   : > { %6827 = vmatmul.mubr.msk.bf16.gmra.mrb[8].mxu0 %vm443_vm1, %v7331_v7  ;;  %v1619_v4 = vsel %vm7864_vm7, %v1617_v22, %v1618_v48  ;;  %v1624_v63 = vrot.slane %v1622_v23, 4  ;;  %v8244_v36 = vsel %vm492_vm0, %v8188_v15, 0  ;;  %v5927_v46 = vrot.slane %v1520_v10, 9  ;;  %v1535_v5 = vld [vmem:[%s7754_s5 + $0x54] sm:$0xe] }
  0xf8   : > { %6676 = vmatprep.mubr.msk.bf16.mxu1 %vm443_vm1, %v5907_v28  ;;  %v1155_v42 = vsel %vm7792_vm4, %v1150_v30, %v1154_v26  ;;  %v5941_v43 = vcombine.low %v1616_v21, %v1619_v4  ;;  %6830 = vmatprep.mubr.msk.bf16.mxu0 %vm443_vm1, %v7332_v58  ;;  %v1629_v47 = vrot.slane %v1521_v12, 5  ;;  %v1632_v52 = vrot.slane %v1522_v19, 5  ;;  %v1536_v7 = vld [vmem:[%s7754_s5 + $0x58] sm:$0xf]  ;;  %v1537_v8 = vld [vmem:[%s7754_s5 + $0x5c] sm:$0x1] }
  0xf9   : > { %v5908_v50 = vcombine.low %v1145_v29, %v1155_v42  ;;  %v8255_v15 = vsel %vm7864_vm7, %v1624_v63, %v1625_v31  ;;  %v5928_v38 = vrot.slane %v1523_v25, 9  ;;  %v1636_v11 = vrot.slane %v1524_v27, 5  ;;  %v1538_v10 = vld [vmem:[%s7754_s5 + $0x60] sm:$0xe]  ;;  %v1539_v12 = vld [vmem:[%s7754_s5 + $0x64] sm:$0xf] }
  0xfa   : > { %v5942_v54 = vcombine.low %v8240_v13, %v8255_v15  ;;  %v8263_v55 = vsel %vm7864_vm7, %v5927_v46, %v1629_v47  ;;  %v1631_v56 = vrot.slane %v1629_v47, 4  ;;  %v1639_v59 = vrot.slane %v1525_v33, 5  ;;  %v1540_v18 = vld [vmem:[%s7754_s5 + $0x68] sm:$0x1]  ;;  %v1541_v23 = vld [vmem:[%s7754_s5 + $0x6c] sm:$0xe] }
  0xfb   : > { %v5929_v60 = vrot.slane %v1526_v34, 9  ;;  %v1643_v61 = vrot.slane %v1527_v35, 5  ;;  %v1646_v62 = vrot.slane %v1528_v39, 5  ;;  %6677 = vmatmul.mubr.msk.bf16.gmra.mrb[28].mxu1 %vm443_vm1, %v5908_v50  ;;  %v8274_v3 = vsel %vm7864_vm7, %v5928_v38, %v1636_v11  ;;  %v1542_v30 = vld [vmem:[%s7754_s5 + $0x70] sm:$0xf]  ;;  %v7335_v33 = vld [vmem:[%s7754_s5 + $0x84] sm:$0xff]  }
  0xfc   : > { %v1633_v2 = vsel %vm7864_vm7, %v1631_v56, %v1632_v52  ;;  %v1638_v24 = vrot.slane %v1636_v11, 4  ;;  %v5930_v44 = vrot.slane %v1529_v40, 9  ;;  %6682 = vmatprep.mubr.msk.bf16.mxu1 %vm443_vm1, %v5941_v43  ;;  %v1650_v9 = vrot.slane %v1530_v49, 5  ;;  %v1543_v31 = vld [vmem:[%s7754_s5 + $0x74] sm:$0x1] }
  0xfd   : > { %v5943_v37 = vcombine.low %v8263_v55, %v1633_v2  ;;  %v8283_v26 = vsel %vm7864_vm7, %v5929_v60, %v1643_v61  ;;  %v1645_v53 = vrot.slane %v1643_v61, 4  ;;  %v1653_v16 = vrot.slane %v1531_v41, 5  ;;  %v1544_v43 = vld [vmem:[%s7754_s5 + $0x78] sm:$0xe]  ;;  %v1545_v15 = vld [vmem:[%s7754_s5 + $0x7c] sm:$0xf] }
  0xfe   : > { %v8289_v14 = vsel %vm7864_vm7, %v1638_v24, %v1639_v59  ;;  %v5931_v48 = vrot.slane %v1532_v17, 9  ;;  %v1657_v58 = vrot.slane %v1533_v57, 5  ;;  %v8301_v21 = vsel %vm7864_vm7, %v5930_v44, %v1650_v9  ;;  %v7336_v52 = vld [vmem:[%s7754_s5 + $0x90] sm:$0xff]   ;;  %v6278_v59 = vld [vmem:[%s7754_s5 + $0x1c] sm:$0xf] }
  0xff   : > { %6831 = vmatmul.mubr.msk.bf16.gmra.mrb[12].mxu0 %vm443_vm1, %v7333_v51  ;;  %v5944_v19 = vcombine.low %v8274_v3, %v8289_v14  ;;  %v8297_v20 = vsel %vm7864_vm7, %v1645_v53, %v1646_v62  ;;  %v1652_v22 = vrot.slane %v1650_v9, 4  ;;  %v1660_v29 = vrot.slane %v1534_v1, 5  ;;  %v1546_v51 = vld [vmem:[%s7754_s5 + $0x80] sm:$0x1] }
 0x100   : > { %6834 = vmatprep.mubr.msk.bf16.mxu0 %vm443_vm1, %v7334_v0  ;;  %v5945_v25 = vcombine.low %v8283_v26, %v8297_v20  ;;  %v8309_v27 = vsel %vm7864_vm7, %v5931_v48, %v1657_v58  ;;  %v1659_v28 = vrot.slane %v1657_v58, 4  ;;  %v5932_v35 = vrot.slane %v1535_v5, 9  ;;  %v6277_v0 = vld [vmem:[%s7754_s5 + $0x18] sm:$0xf]  ;;  %v6279_v1 = vld [vmem:[%s7754_s5 + $0x20] sm:$0x1] }
 0x101   : > { %v8316_v34 = vsel %vm7864_vm7, %v1652_v22, %v1653_v16  ;;  %v1664_v4 = vrot.slane %v1536_v7, 5  ;;  %v1667_v13 = vrot.slane %v1537_v8, 5  ;;  %v5933_v40 = vrot.slane %v1538_v10, 9  ;;  %v8358_v2 = vld [vmem:[#allocation6 + $0x10] sm:$0x3] }
 0x102   : > { %v5946_v63 = vcombine.low %v8301_v21, %v8316_v34  ;;  %v8322_v39 = vsel %vm7864_vm7, %v1659_v28, %v1660_v29  ;;  %v1671_v42 = vrot.slane %v1539_v12, 5  ;;  %v1674_v50 = vrot.slane %v1540_v18, 5  ;;  %v7358_v24 = vld [vmem:[#allocation6 + $0x8] sm:$0x3]  ;;  %7217 = vmatprep.subr.msk.bf16.mxu0 %vm492_vm0, %v8358_v2  ;;  %v1548_v16 = vld [vmem:[%s7754_s5 + $0x88] sm:$0xf] }
 0x103   : > { %v5947_v46 = vcombine.low %v8309_v27, %v8322_v39  ;;  %v8329_v47 = vsel %vm7864_vm7, %v5932_v35, %v1664_v4  ;;  %v1666_v49 = vrot.slane %v1664_v4, 4  ;;  %6683 = vmatmul.mubr.msk.bf16.vlgmr.msra.gmra.mrb[0].mxu1 %vm443_vm1, %v5942_v54  ;;  %v5934_v55 = vrot.slane %v1541_v23, 9  ;;  %v1549_v23 = vld [vmem:[%s7754_s5 + $0x8c] sm:$0x1]  ;;  %v6280_v28 = vld [vmem:[%s7754_s5 + $0x24] sm:$0xf] }
 0x104   : > { %v8337_v38 = vsel %vm7864_vm7, %v5933_v40, %v1671_v42  ;;  %v1673_v41 = vrot.slane %v1671_v42, 4  ;;  %v1678_v56 = vrot.slane %v1542_v30, 5  ;;  %6715 = vmatpush3.bf16.msra.mxu1 %v8244_v36  ;;  %6686 = vmatprep.mubr.msk.bf16.mxu1 %vm443_vm1, %v5943_v37  ;;  %v1681_v17 = vrot.slane %v1543_v31, 5  ;;  %v1547_v37 = vld [vmem:[%s7754_s5 + $0x84] sm:$0xe]  ;;  %v7337_v4 = vld [vmem:[%s7754_s5 + $0x9c] sm:$0xff]  }
 0x105   : > { %v8344_v11 = vsel %vm7864_vm7, %v1666_v49, %v1667_v13  ;;  %v5935_v54 = vrot.slane %v1544_v43, 9  ;;  %v1685_v57 = vrot.slane %v1545_v15, 5  ;;  %7213 = vmatprep.subr.msk.bf16.mxu1 %vm492_vm0, %v7358_v24  ;;  %v1688_v8 = vrot.slane %v1546_v51, 5  ;;  %v6281_v35 = vld [vmem:[%s7754_s5 + $0x28] sm:$0xf] }
 0x106   : > { %v5948_v60 = vcombine.low %v8329_v47, %v8344_v11  ;;  %v8351_v61 = vsel %vm7864_vm7, %v1673_v41, %v1674_v50  ;;  %v8355_v36 = vsel %vm7864_vm7, %v5934_v55, %v1678_v56  ;;  %v1680_v62 = vrot.slane %v1678_v56, 4  ;;  %v7338_v49 = vld [vmem:[%s7754_s5 + $0xa8] sm:$0xff]  }
 0x107   : > { %6835 = vmatmul.mubr.msk.bf16.gmra.mrb[16].mxu0 %vm443_vm1, %v7335_v33  ;;  %v5949_v44 = vcombine.low %v8337_v38, %v8351_v61  ;;  %v8366_v5 = vsel %vm7864_vm7, %v5935_v54, %v1685_v57  ;;  %v1687_v7 = vrot.slane %v1685_v57, 4  ;;  %v4340_v9 = vshrl.u32 %v6277_v0, 16  ;;  %v6282_v51 = vld [vmem:[%s7754_s5 + $0x2c] sm:$0x1] }
 0x108   : > { %6838 = vmatprep.mubr.msk.bf16.mxu0 %vm443_vm1, %v7336_v52  ;;  %v8374_v53 = vsel %vm7864_vm7, %v1680_v62, %v1681_v17  ;;  %v4343_v10 = vshll.u32 %v6277_v0, 16  ;;  %v4349_v12 = vshll.u32 %v6278_v59, 16  ;;  %v4353_v18 = vshrl.u32 %v6278_v59, 16  ;;  %v1551_v59 = vld [vmem:[%s7754_s5 + $0x94] sm:$0xf] }
 0x109   : > { %v5950_v48 = vcombine.low %v8355_v36, %v8374_v53  ;;  %v8381_v58 = vsel %vm7864_vm7, %v1687_v7, %v1688_v8  ;;  %v4359_v22 = vshll.u32 %v6279_v1, 16  ;;  %v4342_v30 = vrot.slane %v4340_v9, 4  ;;  %v1552_v1 = vld [vmem:[%s7754_s5 + $0x98] sm:$0x1]  ;;  %v6283_v9 = vld [vmem:[%s7754_s5 + $0x30] sm:$0xf] }
 0x10a   : > { %v5951_v29 = vcombine.low %v8366_v5, %v8381_v58  ;;  %v4345_v31 = vrot.slane %v4343_v10, 5  ;;  %v4351_v33 = vrot.slane %v4349_v12, 5  ;;  %v4355_v13 = vrot.slane %v4353_v18, 4  ;;  %v6284_v10 = vld [vmem:[%s7754_s5 + $0x34] sm:$0xf] }
 0x10b   : > { %v4361_v40 = vrot.slane %v4359_v22, 5  ;;  %v5936_v42 = vrot.slane %v1547_v37, 9  ;;  %v1692_v43 = vrot.slane %v1548_v16, 5  ;;  %6687 = vmatmul.mubr.msk.bf16.gmra.mrb[4].mxu1 %vm443_vm1, %v5944_v19  ;;  %v1695_v15 = vrot.slane %v1549_v23, 5  ;;  %v1550_v19 = vld [vmem:[%s7754_s5 + $0x90] sm:$0xe] }
 0x10c   : > { %v4346_v50 = vor.u32 %v4345_v31, %v4342_v30  ;;  %v4364_v52 = vshrl.u32 %v6280_v28, 16  ;;  %v4367_v41 = vshll.u32 %v6280_v28, 16  ;;  %6690 = vmatprep.mubr.msk.bf16.mxu1 %vm443_vm1, %v5945_v25  ;;  %v4356_v55 = vor.u32 %v4355_v13, %v4351_v33  ;;  %v7339_v23 = vld [vmem:[%s7754_s5 + $0xb4] sm:$0xff]   ;;  %v7340_v28 = vld [vmem:[%s7754_s5 + $0xc0] sm:$0xff]  }
 0x10d   : > { %v8401_v56 = vsel %vm7864_vm7, %v5936_v42, %v1692_v43  ;;  %v1694_v3 = vrot.slane %v1692_v43, 4  ;;  %v4373_v14 = vshll.u32 %v6281_v35, 16  ;;  %v4377_v57 = vshrl.u32 %v6281_v35, 16 }
 0x10e   : > { %v4347_v0 = vrot.slane %v4346_v50, 4  ;;  %v4366_v17 = vrot.slane %v4364_v52, 4  ;;  %v4369_v54 = vrot.slane %v4367_v41, 5  ;;  %v4357_v26 = vrot.slane %v4356_v55, 4  ;;  %v1554_v52 = vld [vmem:[%s7754_s5 + $0xa0] sm:$0xf] }
 0x10f   : > { %6839 = vmatmul.mubr.msk.bf16.gmra.mrb[20].mxu0 %vm443_vm1, %v7337_v4  ;;  %v8408_v20 = vsel %vm7864_vm7, %v1694_v3, %v1695_v15  ;;  %v4375_v25 = vrot.slane %v4373_v14, 5  ;;  %v4383_v62 = vshll.u32 %v6282_v51, 16  ;;  %v4379_v37 = vrot.slane %v4377_v57, 4  ;;  %v6285_v4 = vld [vmem:[%s7754_s5 + $0x38] sm:$0x1] }
 0x110   : > { %6842 = vmatprep.mubr.msk.bf16.mxu0 %vm443_vm1, %v7338_v49  ;;  %v4352_v24 = vsel %vm7792_vm4, %v4347_v0, %v4351_v33  ;;  %v5952_v7 = vcombine.low %v8401_v56, %v8408_v20  ;;  %v4370_v8 = vor.u32 %v4369_v54, %v4366_v17  ;;  %v4362_v12 = vsel %vm7792_vm4, %v4357_v26, %v4361_v40  ;;  %v1553_v49 = vld [vmem:[%s7754_s5 + $0x9c] sm:$0xe]  ;;  %v1555_v41 = vld [vmem:[%s7754_s5 + $0xa4] sm:$0x1]  ;;  %v6287_v54 = vld [vmem:[%s7754_s5 + $0x40] sm:$0xf] }
 0x111   : > { %v4385_v16 = vrot.slane %v4383_v62, 5  ;;  %v8422_v18 = vsel %vm492_vm0, %v8358_v2, 0  ;;  %v5937_v22 = vrot.slane %v1550_v19, 9  ;;  %v8426_v30 = vcombine.low %v4352_v24, %v4362_v12  ;;  %v6286_v3 = vld [vmem:[%s7754_s5 + $0x3c] sm:$0xf] }
 0x112   : > { %v4371_v31 = vrot.slane %v4370_v8, 4  ;;  %v4380_v33 = vor.u32 %v4379_v37, %v4375_v25  ;;  %v1699_v35 = vrot.slane %v1551_v59, 5  ;;  %v1702_v13 = vrot.slane %v1552_v1, 5  ;;  %v6288_v59 = vld [vmem:[%s7754_s5 + $0x44] sm:$0x1] }
 0x113   : > { %v4388_v42 = vshrl.u32 %v6283_v9, 16  ;;  %v4391_v40 = vshll.u32 %v6283_v9, 16  ;;  %v4397_v43 = vshll.u32 %v6284_v10, 16  ;;  %6691 = vmatmul.mubr.msk.bf16.gmra.mrb[8].mxu1 %vm443_vm1, %v5946_v63  ;;  %v4401_v55 = vshrl.u32 %v6284_v10, 16  ;;  %v1556_v24 = vld [vmem:[%s7754_s5 + $0xa8] sm:$0xe] }
 0x114   : > { %v4376_v2 = vsel %vm7792_vm4, %v4371_v31, %v4375_v25  ;;  %v4381_v50 = vrot.slane %v4380_v33, 4  ;;  %v8438_v15 = vsel %vm7864_vm7, %v5937_v22, %v1699_v35  ;;  %v1701_v51 = vrot.slane %v1699_v35, 4  ;;  %6694 = vmatprep.mubr.msk.bf16.mxu1 %vm443_vm1, %v5947_v46  ;;  %v1557_v12 = vld [vmem:[%s7754_s5 + $0xac] sm:$0xf]  ;;  %v1558_v31 = vld [vmem:[%s7754_s5 + $0xb0] sm:$0x1] }
 0x115   : > { %v4390_v21 = vrot.slane %v4388_v42, 4  ;;  %v4393_v34 = vrot.slane %v4391_v40, 5  ;;  %v4399_v63 = vrot.slane %v4397_v43, 5  ;;  %v4407_v0 = vshll.u32 %v6285_v4, 16  ;;  %v7341_v33 = vld [vmem:[%s7754_s5 + $0xcc] sm:$0xff]  }
 0x116   : > { %v4386_v14 = vsel %vm7792_vm4, %v4381_v50, %v4385_v16  ;;  %v8451_v19 = vsel %vm7864_vm7, %v1701_v51, %v1702_v13  ;;  %v5938_v17 = vrot.slane %v1553_v49, 9  ;;  %v4403_v57 = vrot.slane %v4401_v55, 4  ;;  %v6289_v40 = vld [vmem:[%s7754_s5 + $0x48] sm:$0xf]  ;;  %v6290_v51 = vld [vmem:[%s7754_s5 + $0x4c] sm:$0xf] }
 0x117   : > { %6843 = vmatmul.mubr.msk.bf16.gmra.mrb[24].mxu0 %vm443_vm1, %v7339_v23  ;;  %v8455_v27 = vcombine.low %v4376_v2, %v4386_v14  ;;  %v5953_v39 = vcombine.low %v8438_v15, %v8451_v19  ;;  %v4394_v46 = vor.u32 %v4393_v34, %v4390_v21  ;;  %v4409_v26 = vrot.slane %v4407_v0, 5  ;;  %v6291_v55 = vld [vmem:[%s7754_s5 + $0x50] sm:$0x1]  ;;  %v1560_v0 = vld [vmem:[%s7754_s5 + $0xb8] sm:$0xf] }
 0x118   : > { %6846 = vmatprep.mubr.msk.bf16.mxu0 %vm443_vm1, %v7340_v28  ;;  %v1706_v25 = vrot.slane %v1554_v52, 5  ;;  %v1709_v62 = vrot.slane %v1555_v41, 5  ;;  %v4412_v1 = vshrl.u32 %v6286_v3, 16  ;;  %v4404_v37 = vor.u32 %v4403_v57, %v4399_v63 }
 0x119   : > { %v4395_v8 = vrot.slane %v4394_v46, 4  ;;  %v4415_v9 = vshll.u32 %v6286_v3, 16  ;;  %v4421_v10 = vshll.u32 %v6287_v54, 16  ;;  %v4425_v28 = vshrl.u32 %v6287_v54, 16  ;;  %v1559_v3 = vld [vmem:[%s7754_s5 + $0xb4] sm:$0xe] }
 0x11a   : > { %v8465_v16 = vsel %vm7864_vm7, %v5938_v17, %v1706_v25  ;;  %v1708_v22 = vrot.slane %v1706_v25, 4  ;;  %v4414_v23 = vrot.slane %v4412_v1, 4  ;;  %v4405_v4 = vrot.slane %v4404_v37, 4  ;;  %v1561_v17 = vld [vmem:[%s7754_s5 + $0xbc] sm:$0x1] }
 0x11b   : > { %v4400_v35 = vsel %vm7792_vm4, %v4395_v8, %v4399_v63  ;;  %v4417_v13 = vrot.slane %v4415_v9, 5  ;;  %v4423_v42 = vrot.slane %v4421_v10, 5  ;;  %6695 = vmatmul.mubr.msk.bf16.gmra.mrb[12].mxu1 %vm443_vm1, %v5948_v60  ;;  %v4427_v49 = vrot.slane %v4425_v28, 4  ;;  %v6293_v10 = vld [vmem:[%s7754_s5 + $0x58] sm:$0xf] }
 0x11c   : > { %v8478_v43 = vsel %vm7864_vm7, %v1708_v22, %v1709_v62  ;;  %v4431_v2 = vshll.u32 %v6288_v59, 16  ;;  %v5939_v50 = vrot.slane %v1556_v24, 9  ;;  %6698 = vmatprep.mubr.msk.bf16.mxu1 %vm443_vm1, %v5949_v44  ;;  %v4410_v47 = vsel %vm7792_vm4, %v4405_v4, %v4409_v26  ;;  %v6292_v24 = vld [vmem:[%s7754_s5 + $0x54] sm:$0xf] }
 0x11d   : > { %v5954_v11 = vcombine.low %v8465_v16, %v8478_v43  ;;  %v4418_v60 = vor.u32 %v4417_v13, %v4414_v23  ;;  %v1713_v52 = vrot.slane %v1557_v12, 5  ;;  %v6327_v41 = vcombine.low %v4400_v35, %v4410_v47 }
 0x11e   : > { %v4428_v21 = vor.u32 %v4427_v49, %v4423_v42  ;;  %v4433_v34 = vrot.slane %v4431_v2, 5  ;;  %v1716_v63 = vrot.slane %v1558_v31, 5  ;;  %v4436_v14 = vshrl.u32 %v6289_v40, 16  ;;  %v6294_v31 = vld [vmem:[%s7754_s5 + $0x5c] sm:$0x1] }
 0x11f   : > { %6847 = vmatmul.mubr.msk.bf16.gmra.mrb[28].mxu0 %vm443_vm1, %v7341_v33  ;;  %v4419_v38 = vrot.slane %v4418_v60, 4  ;;  %v8494_v61 = vsel %vm7864_vm7, %v5939_v50, %v1713_v52  ;;  %v1715_v44 = vrot.slane %v1713_v52, 4  ;;  %v4439_v46 = vshll.u32 %v6289_v40, 16  ;;  %v6295_v50 = vld [vmem:[%s7754_s5 + $0x60] sm:$0xf] }
 0x120   : > { %6852 = vmatprep.mubr.msk.bf16.mxu0 %vm443_vm1, %v8426_v30  ;;  %v4429_v54 = vrot.slane %v4428_v21, 4  ;;  %v4445_v57 = vshll.u32 %v6290_v51, 16  ;;  %v4449_v59 = vshrl.u32 %v6290_v51, 16  ;;  %v4438_v62 = vrot.slane %v4436_v14, 4  ;;  %v6296_v60 = vld [vmem:[%s7754_s5 + $0x64] sm:$0xf] }
 0x121   : > { %v4424_v26 = vsel %vm7792_vm4, %v4419_v38, %v4423_v42  ;;  %v8504_v25 = vsel %vm7864_vm7, %v1715_v44, %v1716_v63  ;;  %v4455_v1 = vshll.u32 %v6291_v55, 16  ;;  %v4441_v37 = vrot.slane %v4439_v46, 5  ;;  %v6297_v38 = vld [vmem:[%s7754_s5 + $0x68] sm:$0x1] }
 0x122   : > { %v4434_v8 = vsel %vm7792_vm4, %v4429_v54, %v4433_v34  ;;  %v5955_v30 = vcombine.low %v8494_v61, %v8504_v25  ;;  %v4447_v9 = vrot.slane %v4445_v57, 5  ;;  %v4451_v22 = vrot.slane %v4449_v59, 4 }
 0x123   : > { %v8512_v12 = vcombine.low %v4424_v26, %v4434_v8  ;;  %v4457_v23 = vrot.slane %v4455_v1, 5  ;;  %v5940_v28 = vrot.slane %v1559_v3, 9  ;;  %6699 = vmatmul.mubr.msk.bf16.gmra.mrb[16].mxu1 %vm443_vm1, %v5950_v48  ;;  %v4442_v33 = vor.u32 %v4441_v37, %v4438_v62  ;;  %v6299_v1 = vld [vmem:[%s7754_s5 + $0x70] sm:$0xf] }
 0x124   : > { %v1720_v35 = vrot.slane %v1560_v0, 5  ;;  %v1723_v4 = vrot.slane %v1561_v17, 5  ;;  %v4460_v13 = vshrl.u32 %v6292_v24, 16  ;;  %6702 = vmatprep.mubr.msk.bf16.mxu1 %vm443_vm1, %v5951_v29  ;;  %v4452_v42 = vor.u32 %v4451_v22, %v4447_v9 }
 0x125   : > { %v4463_v40 = vshll.u32 %v6292_v24, 16  ;;  %v4469_v49 = vshll.u32 %v6293_v10, 16  ;;  %v4473_v2 = vshrl.u32 %v6293_v10, 16  ;;  %v4443_v51 = vrot.slane %v4442_v33, 4  ;;  %v6301_v10 = vld [vmem:[%s7754_s5 + $0x78] sm:$0xf] }
 0x126   : > { %v8526_v36 = vsel %vm7864_vm7, %v5940_v28, %v1720_v35  ;;  %v1722_v53 = vrot.slane %v1720_v35, 4  ;;  %v4462_v48 = vrot.slane %v4460_v13, 4  ;;  %v4453_v5 = vrot.slane %v4452_v42, 4  ;;  %v6302_v35 = vld [vmem:[%s7754_s5 + $0x7c] sm:$0xf] }
 0x127   : > { %6853 = vmatmul.mubr.msk.bf16.vlgmr.msra.gmra.mrb[0].mxu0 %vm443_vm1, %v8455_v27  ;;  %v4465_v58 = vrot.slane %v4463_v40, 5  ;;  %v4471_v29 = vrot.slane %v4469_v49, 5  ;;  %v4475_v47 = vrot.slane %v4473_v2, 4  ;;  %v4448_v52 = vsel %vm7792_vm4, %v4443_v51, %v4447_v9  ;;  %v6303_v42 = vld [vmem:[%s7754_s5 + $0x80] sm:$0x1] }
 0x128   : > { %6885 = vmatpush3.bf16.msra.mxu0 %v8422_v18  ;;  %6856 = vmatprep.mubr.msk.bf16.mxu0 %vm443_vm1, %v6327_v41  ;;  %v8537_v21 = vsel %vm7864_vm7, %v1722_v53, %v1723_v4  ;;  %v4479_v34 = vshll.u32 %v6294_v31, 16  ;;  %v4484_v27 = vshrl.u32 %v6295_v50, 16  ;;  %v4458_v63 = vsel %vm7792_vm4, %v4453_v5, %v4457_v23  ;;  %v6298_v41 = vld [vmem:[%s7754_s5 + $0x6c] sm:$0xf] }
 0x129   : > { %v5956_v55 = vcombine.low %v8526_v36, %v8537_v21  ;;  %v4466_v3 = vor.u32 %v4465_v58, %v4462_v48  ;;  %v4476_v18 = vor.u32 %v4475_v47, %v4471_v29  ;;  %v6329_v44 = vcombine.low %v4448_v52, %v4458_v63 }
 0x12a   : > { %v4481_v14 = vrot.slane %v4479_v34, 5  ;;  %v4486_v0 = vrot.slane %v4484_v27, 4  ;;  %v4487_v17 = vshll.u32 %v6295_v50, 16  ;;  %v4493_v57 = vshll.u32 %v6296_v60, 16  ;;  %v6305_v27 = vld [vmem:[%s7754_s5 + $0x88] sm:$0xf] }
 0x12b   : > { %v4467_v54 = vrot.slane %v4466_v3, 4  ;;  %v4477_v46 = vrot.slane %v4476_v18, 4  ;;  %v4497_v59 = vshrl.u32 %v6296_v60, 16  ;;  %6703 = vmatmul.mubr.msk.bf16.gmra.mrb[20].mxu1 %vm443_vm1, %v5952_v7  ;;  %v4503_v62 = vshll.u32 %v6297_v38, 16  ;;  %v6300_v7 = vld [vmem:[%s7754_s5 + $0x74] sm:$0x1] }
 0x12c   : > { %v4489_v26 = vrot.slane %v4487_v17, 5  ;;  %v4508_v24 = vshrl.u32 %v6298_v41, 16  ;;  %v4511_v8 = vshll.u32 %v6298_v41, 16  ;;  %6706 = vmatprep.mubr.msk.bf16.mxu1 %vm443_vm1, %v5953_v39  ;;  %v4495_v56 = vrot.slane %v4493_v57, 5  ;;  %v6306_v41 = vld [vmem:[%s7754_s5 + $0x8c] sm:$0x1] }
 0x12d   : > { %v4472_v37 = vsel %vm7792_vm4, %v4467_v54, %v4471_v29  ;;  %v4482_v9 = vsel %vm7792_vm4, %v4477_v46, %v4481_v14  ;;  %v4499_v20 = vrot.slane %v4497_v59, 4  ;;  %v4505_v28 = vrot.slane %v4503_v62, 5 }
 0x12e   : > { %v6330_v22 = vcombine.low %v4472_v37, %v4482_v9  ;;  %v4490_v23 = vor.u32 %v4489_v26, %v4486_v0  ;;  %v4510_v31 = vrot.slane %v4508_v24, 4  ;;  %v4513_v19 = vrot.slane %v4511_v8, 5  ;;  %v7342_v26 = vld [vmem:[%s7754_s5 + $0xc] sm:$0xff]   ;;  %v6309_v37 = vld [vmem:[%s7754_s5 + $0x98] sm:$0x1] }
 0x12f   : > { %6857 = vmatmul.mubr.msk.bf16.gmra.mrb[4].mxu0 %vm443_vm1, %v8512_v12  ;;  %v4500_v15 = vor.u32 %v4499_v20, %v4495_v56  ;;  %v4517_v39 = vshll.u32 %v6299_v1, 16  ;;  %v4521_v33 = vshrl.u32 %v6299_v1, 16  ;;  %v4527_v13 = vshll.u32 %v6300_v7, 16  ;;  %v6304_v12 = vld [vmem:[%s7754_s5 + $0x84] sm:$0xf] }
 0x130   : > { %6860 = vmatprep.mubr.msk.bf16.mxu0 %vm443_vm1, %v6329_v44  ;;  %v4491_v4 = vrot.slane %v4490_v23, 4  ;;  %v4532_v40 = vshrl.u32 %v6301_v10, 16  ;;  %v4535_v49 = vshll.u32 %v6301_v10, 16  ;;  %v4514_v50 = vor.u32 %v4513_v19, %v4510_v31  ;;  %v6307_v44 = vld [vmem:[%s7754_s5 + $0x90] sm:$0xf] }
 0x131   : > { %v4501_v2 = vrot.slane %v4500_v15, 4  ;;  %v4519_v51 = vrot.slane %v4517_v39, 5  ;;  %v4523_v53 = vrot.slane %v4521_v33, 4  ;;  %v4529_v5 = vrot.slane %v4527_v13, 5  ;;  %v6310_v33 = vld [vmem:[%s7754_s5 + $0x9c] sm:$0xf] }
 0x132   : > { %v4496_v48 = vsel %vm7792_vm4, %v4491_v4, %v4495_v56  ;;  %v4534_v58 = vrot.slane %v4532_v40, 4  ;;  %v4537_v29 = vrot.slane %v4535_v49, 5  ;;  %v4515_v60 = vrot.slane %v4514_v50, 4  ;;  %v6311_v40 = vld [vmem:[%s7754_s5 + $0xa0] sm:$0xf] }
 0x133   : > { %v4506_v47 = vsel %vm7792_vm4, %v4501_v2, %v4505_v28  ;;  %v4524_v52 = vor.u32 %v4523_v53, %v4519_v51  ;;  %v4541_v34 = vshll.u32 %v6302_v35, 16  ;;  %6707 = vmatmul.mubr.msk.bf16.gmra.mrb[24].mxu1 %vm443_vm1, %v5954_v11  ;;  %v4545_v18 = vshrl.u32 %v6302_v35, 16  ;;  %v6312_v53 = vld [vmem:[%s7754_s5 + $0xa4] sm:$0x1] }
 0x134   : > { %v6331_v63 = vcombine.low %v4496_v48, %v4506_v47  ;;  %v4538_v3 = vor.u32 %v4537_v29, %v4534_v58  ;;  %v4551_v38 = vshll.u32 %v6303_v42, 16  ;;  %6710 = vmatprep.mubr.msk.bf16.mxu1 %vm443_vm1, %v5955_v30  ;;  %v4520_v14 = vsel %vm7792_vm4, %v4515_v60, %v4519_v51  ;;  %v6308_v30 = vld [vmem:[%s7754_s5 + $0x94] sm:$0xf]  ;;  %v7343_v48 = vld [vmem:[%s7754_s5 + $0x18] sm:$0xff]   ;;  %v6313_v60 = vld [vmem:[%s7754_s5 + $0xa8] sm:$0xf] }
 0x135   : > { %v4525_v0 = vrot.slane %v4524_v52, 4  ;;  %v4543_v16 = vrot.slane %v4541_v34, 5  ;;  %v4556_v43 = vshrl.u32 %v6304_v12, 16  ;;  %v4547_v17 = vrot.slane %v4545_v18, 4  ;;  %v7344_v52 = vld [vmem:[%s7754_s5 + $0x24] sm:$0xff]  }
 0x136   : > { %v4539_v11 = vrot.slane %v4538_v3, 4  ;;  %v4553_v54 = vrot.slane %v4551_v38, 5  ;;  %v4559_v46 = vshll.u32 %v6304_v12, 16  ;;  %v4565_v25 = vshll.u32 %v6305_v27, 16  ;;  %v6314_v18 = vld [vmem:[%s7754_s5 + $0xac] sm:$0xf] }
 0x137   : > { %6861 = vmatmul.mubr.msk.bf16.gmra.mrb[8].mxu0 %vm443_vm1, %v6330_v22  ;;  %v4530_v57 = vsel %vm7792_vm4, %v4525_v0, %v4529_v5  ;;  %v4558_v61 = vrot.slane %v4556_v43, 4  ;;  %v4569_v59 = vshrl.u32 %v6305_v27, 16  ;;  %v4548_v24 = vor.u32 %v4547_v17, %v4543_v16  ;;  %v6315_v43 = vld [vmem:[%s7754_s5 + $0xb0] sm:$0x1] }
 0x138   : > { %6864 = vmatprep.mubr.msk.bf16.mxu0 %vm443_vm1, %v6331_v63  ;;  %v6332_v62 = vcombine.low %v4520_v14, %v4530_v57  ;;  %v4544_v1 = vsel %vm7792_vm4, %v4539_v11, %v4543_v16  ;;  %v4561_v8 = vrot.slane %v4559_v46, 5  ;;  %v4567_v9 = vrot.slane %v4565_v25, 5  ;;  %v6316_v25 = vld [vmem:[%s7754_s5 + $0xb4] sm:$0xf] }
 0x139   : > { %v4571_v56 = vrot.slane %v4569_v59, 4  ;;  %v4575_v20 = vshll.u32 %v6306_v41, 16  ;;  %v4580_v7 = vshrl.u32 %v6307_v44, 16  ;;  %v4549_v10 = vrot.slane %v4548_v24, 4 }
 0x13a   : > { %v4562_v22 = vor.u32 %v4561_v8, %v4558_v61  ;;  %v4583_v23 = vshll.u32 %v6307_v44, 16  ;;  %v4589_v28 = vshll.u32 %v6308_v30, 16  ;;  %v4593_v39 = vshrl.u32 %v6308_v30, 16 }
 0x13b   : > { %v4572_v31 = vor.u32 %v4571_v56, %v4567_v9  ;;  %v4577_v15 = vrot.slane %v4575_v20, 5  ;;  %v4582_v19 = vrot.slane %v4580_v7, 4  ;;  %6711 = vmatmul.mubr.msk.bf16.gmra.mrb[28].mxu1 %vm443_vm1, %v5956_v55  ;;  %v4554_v35 = vsel %vm7792_vm4, %v4549_v10, %v4553_v54  ;;  %v7345_v56 = vld [vmem:[%s7754_s5 + $0x30] sm:$0xff]   ;;  %v6318_v10 = vld [vmem:[%s7754_s5 + $0xbc] sm:$0x1] }
 0x13c   : > { %v4563_v4 = vrot.slane %v4562_v22, 4  ;;  %v4585_v13 = vrot.slane %v4583_v23, 5  ;;  %v4591_v42 = vrot.slane %v4589_v28, 5  ;;  %6716 = vmatprep.mubr.msk.bf16.mxu1 %vm443_vm1, %v7342_v26  ;;  %v6333_v49 = vcombine.low %v4544_v1, %v4554_v35  ;;  %v6317_v1 = vld [vmem:[%s7754_s5 + $0xb8] sm:$0xf]  ;;  %v7346_v28 = vld [vmem:[%s7754_s5 + $0x3c] sm:$0xff]  }
 0x13d   : > { %v4573_v2 = vrot.slane %v4572_v31, 4  ;;  %v4595_v50 = vrot.slane %v4593_v39, 4  ;;  %v4599_v51 = vshll.u32 %v6309_v37, 16  ;;  %v4604_v55 = vshrl.u32 %v6310_v33, 16  ;;  %v6319_v39 = vld [vmem:[%s7754_s5 + $0xc0] sm:$0xf] }
 0x13e   : > { %v4568_v36 = vsel %vm7792_vm4, %v4563_v4, %v4567_v9  ;;  %v4586_v21 = vor.u32 %v4585_v13, %v4582_v19  ;;  %v4607_v12 = vshll.u32 %v6310_v33, 16  ;;  %v4613_v47 = vshll.u32 %v6311_v40, 16 }
 0x13f   : > { %6865 = vmatmul.mubr.msk.bf16.gmra.mrb[12].mxu0 %vm443_vm1, %v6332_v62  ;;  %v4578_v5 = vsel %vm7792_vm4, %v4573_v2, %v4577_v15  ;;  %v4596_v58 = vor.u32 %v4595_v50, %v4591_v42  ;;  %v4601_v29 = vrot.slane %v4599_v51, 5  ;;  %v4606_v63 = vrot.slane %v4604_v55, 4  ;;  %v6321_v55 = vld [vmem:[%s7754_s5 + $0xc8] sm:$0x1] }
 0x140   : > { %6868 = vmatprep.mubr.msk.bf16.mxu0 %vm443_vm1, %v6333_v49  ;;  %v6334_v34 = vcombine.low %v4568_v36, %v4578_v5  ;;  %v4587_v27 = vrot.slane %v4586_v21, 4  ;;  %v4609_v3 = vrot.slane %v4607_v12, 5  ;;  %v4615_v41 = vrot.slane %v4613_v47, 5  ;;  %v6322_v12 = vld [vmem:[%s7754_s5 + $0xcc] sm:$0xf] }
 0x141   : > { %v4597_v38 = vrot.slane %v4596_v58, 4  ;;  %v4617_v44 = vshrl.u32 %v6311_v40, 16  ;;  %v4623_v14 = vshll.u32 %v6312_v53, 16  ;;  %v4628_v11 = vshrl.u32 %v6313_v60, 16  ;;  %v6323_v47 = vld [vmem:[%s7754_s5 + $0xd0] sm:$0xf] }
 0x142   : > { %v4592_v0 = vsel %vm7792_vm4, %v4587_v27, %v4591_v42  ;;  %v4610_v16 = vor.u32 %v4609_v3, %v4606_v63  ;;  %v4631_v17 = vshll.u32 %v6313_v60, 16  ;;  %v4637_v61 = vshll.u32 %v6314_v18, 16  ;;  %v6320_v42 = vld [vmem:[%s7754_s5 + $0xc4] sm:$0xf] }
 0x143   : > { %v4602_v54 = vsel %vm7792_vm4, %v4597_v38, %v4601_v29  ;;  %v4619_v46 = vrot.slane %v4617_v44, 4  ;;  %v4625_v57 = vrot.slane %v4623_v14, 5  ;;  %6717 = vmatmul.mubr.msk.bf16.vlgmr.msra.gmra.mrb[0].mxu1 %vm443_vm1, %v7343_v48  ;;  %v4630_v26 = vrot.slane %v4628_v11, 4  ;;  %v6358_v11 = vld [vmem:[%s7754_s5 + $0x1c] sm:$0xf] }
 0x144   : > { %v6335_v59 = vcombine.low %v4592_v0, %v4602_v54  ;;  %v4611_v30 = vrot.slane %v4610_v16, 4  ;;  %v4633_v62 = vrot.slane %v4631_v17, 5  ;;  %6919 = vmatpush3.bf16.msra.mxu1 %v7771_v6  ;;  %6720 = vmatprep.mubr.msk.bf16.mxu1 %vm443_vm1, %v7344_v52  ;;  %v4639_v8 = vrot.slane %v4637_v61, 5  ;;  %v7347_v17 = vld [vmem:[%s7754_s5 + $0x48] sm:$0xff]  }
 0x145   : > { %v4620_v24 = vor.u32 %v4619_v46, %v4615_v41  ;;  %v4641_v37 = vshrl.u32 %v6314_v18, 16  ;;  %v4647_v9 = vshll.u32 %v6315_v43, 16  ;;  %v4652_v22 = vshrl.u32 %v6316_v25, 16  ;;  %v6357_v43 = vld [vmem:[%s7754_s5 + $0x18] sm:$0xe] }
 0x146   : > { %v4616_v20 = vsel %vm7792_vm4, %v4611_v30, %v4615_v41  ;;  %v4634_v7 = vor.u32 %v4633_v62, %v4630_v26  ;;  %v4655_v23 = vshll.u32 %v6316_v25, 16  ;;  %v4661_v19 = vshll.u32 %v6317_v1, 16  ;;  %v6324_v41 = vld [vmem:[%s7754_s5 + $0xd4] sm:$0x1]  ;;  %v6359_v25 = vld [vmem:[%s7754_s5 + $0x20] sm:$0x1] }
 0x147   : > { %6869 = vmatmul.mubr.msk.bf16.gmra.mrb[16].mxu0 %vm443_vm1, %v6334_v34  ;;  %v4621_v6 = vrot.slane %v4620_v24, 4  ;;  %v4643_v31 = vrot.slane %v4641_v37, 4  ;;  %v4649_v15 = vrot.slane %v4647_v9, 5  ;;  %v4654_v35 = vrot.slane %v4652_v22, 4  ;;  %v6360_v24 = vld [vmem:[%s7754_s5 + $0x24] sm:$0xe] }
 0x148   : > { %6872 = vmatprep.mubr.msk.bf16.mxu0 %vm443_vm1, %v6335_v59  ;;  %v4635_v33 = vrot.slane %v4634_v7, 4  ;;  %v4657_v4 = vrot.slane %v4655_v23, 5  ;;  %v4665_v13 = vshrl.u32 %v6317_v1, 16  ;;  %v4663_v2 = vrot.slane %v4661_v19, 5  ;;  %v7348_v59 = vld [vmem:[%s7754_s5 + $0x54] sm:$0xff]  }
 0x149   : > { %v4626_v40 = vsel %vm7792_vm4, %v4621_v6, %v4625_v57  ;;  %v4644_v49 = vor.u32 %v4643_v31, %v4639_v8  ;;  %v4671_v50 = vshll.u32 %v6318_v10, 16  ;;  %v4676_v58 = vshrl.u32 %v6319_v39, 16  ;;  %v6363_v6 = vld [vmem:[%s7754_s5 + $0x30] sm:$0xe] }
 0x14a   : > { %v6336_v51 = vcombine.low %v4616_v20, %v4626_v40  ;;  %v4640_v53 = vsel %vm7792_vm4, %v4635_v33, %v4639_v8  ;;  %v4658_v36 = vor.u32 %v4657_v4, %v4654_v35  ;;  %v4667_v21 = vrot.slane %v4665_v13, 4  ;;  %v6361_v20 = vld [vmem:[%s7754_s5 + $0x28] sm:$0xf]  ;;  %v6364_v33 = vld [vmem:[%s7754_s5 + $0x34] sm:$0xf] }
 0x14b   : > { %v4645_v48 = vrot.slane %v4644_v49, 4  ;;  %v4673_v5 = vrot.slane %v4671_v50, 5  ;;  %v4679_v29 = vshll.u32 %v6319_v39, 16  ;;  %6721 = vmatmul.mubr.msk.bf16.gmra.mrb[4].mxu1 %vm443_vm1, %v7345_v56  ;;  %v4685_v34 = vshll.u32 %v6320_v42, 16  ;;  %v6365_v50 = vld [vmem:[%s7754_s5 + $0x38] sm:$0x1] }
 0x14c   : > { %v4659_v60 = vrot.slane %v4658_v36, 4  ;;  %v4668_v52 = vor.u32 %v4667_v21, %v4663_v2  ;;  %v4689_v27 = vshrl.u32 %v6320_v42, 16  ;;  %6724 = vmatprep.mubr.msk.bf16.mxu1 %vm443_vm1, %v7346_v28  ;;  %v4678_v3 = vrot.slane %v4676_v58, 4  ;;  %v6362_v28 = vld [vmem:[%s7754_s5 + $0x2c] sm:$0x1] }
 0x14d   : > { %v4650_v63 = vsel %vm7792_vm4, %v4645_v48, %v4649_v15  ;;  %v4681_v18 = vrot.slane %v4679_v29, 5  ;;  %v4695_v38 = vshll.u32 %v6321_v55, 16  ;;  %v4687_v16 = vrot.slane %v4685_v34, 5  ;;  %v7349_v48 = vld [vmem:[%s7754_s5 + $0x60] sm:$0xff]  }
 0x14e   : > { %v6337_v44 = vcombine.low %v4640_v53, %v4650_v63  ;;  %v4664_v14 = vsel %vm7792_vm4, %v4659_v60, %v4663_v2  ;;  %v4669_v0 = vrot.slane %v4668_v52, 4  ;;  %v4691_v46 = vrot.slane %v4689_v27, 4  ;;  %v6368_v60 = vld [vmem:[%s7754_s5 + $0x44] sm:$0x1] }
 0x14f   : > { %6873 = vmatmul.mubr.msk.bf16.gmra.mrb[20].mxu0 %vm443_vm1, %v6336_v51  ;;  %v4682_v54 = vor.u32 %v4681_v18, %v4678_v3  ;;  %v4697_v57 = vrot.slane %v4695_v38, 5  ;;  %v4700_v61 = vshrl.u32 %v6322_v12, 16  ;;  %v4703_v26 = vshll.u32 %v6322_v12, 16  ;;  %v6366_v51 = vld [vmem:[%s7754_s5 + $0x3c] sm:$0xe] }
 0x150   : > { %6876 = vmatprep.mubr.msk.bf16.mxu0 %vm443_vm1, %v6337_v44  ;;  %v4674_v30 = vsel %vm7792_vm4, %v4669_v0, %v4673_v5  ;;  %v4709_v62 = vshll.u32 %v6323_v47, 16  ;;  %v4713_v1 = vshrl.u32 %v6323_v47, 16  ;;  %v4692_v9 = vor.u32 %v4691_v46, %v4687_v16  ;;  %v6367_v12 = vld [vmem:[%s7754_s5 + $0x40] sm:$0xf]  ;;  %v6369_v3 = vld [vmem:[%s7754_s5 + $0x48] sm:$0xe] }
 0x151   : > { %v6338_v8 = vcombine.low %v4664_v14, %v4674_v30  ;;  %v4683_v37 = vrot.slane %v4682_v54, 4  ;;  %v4702_v56 = vrot.slane %v4700_v61, 4  ;;  %v4705_v7 = vrot.slane %v4703_v26, 5  ;;  %v6370_v18 = vld [vmem:[%s7754_s5 + $0x4c] sm:$0xf] }
 0x152   : > { %v4711_v10 = vrot.slane %v4709_v62, 5  ;;  %v4715_v22 = vrot.slane %v4713_v1, 4  ;;  %v4719_v23 = vshll.u32 %v6324_v41, 16  ;;  %v4693_v15 = vrot.slane %v4692_v9, 4  ;;  %v6371_v38 = vld [vmem:[%s7754_s5 + $0x50] sm:$0x1] }
 0x153   : > { %v4688_v31 = vsel %vm7792_vm4, %v4683_v37, %v4687_v16  ;;  %v6405_v19 = vrot.slane %v6357_v43, 9  ;;  %v5179_v39 = vrot.slane %v6358_v11, 5  ;;  %6725 = vmatmul.mubr.msk.bf16.gmra.mrb[8].mxu1 %vm443_vm1, %v7347_v17  ;;  %v4706_v35 = vor.u32 %v4705_v7, %v4702_v56  ;;  %v7350_v41 = vld [vmem:[%s7754_s5 + $0x6c] sm:$0xff]   ;;  %v6372_v43 = vld [vmem:[%s7754_s5 + $0x54] sm:$0xe] }
 0x154   : > { %v4716_v4 = vor.u32 %v4715_v22, %v4711_v10  ;;  %v4721_v13 = vrot.slane %v4719_v23, 5  ;;  %v5182_v42 = vrot.slane %v6359_v25, 5  ;;  %6728 = vmatprep.mubr.msk.bf16.mxu1 %vm443_vm1, %v7348_v59  ;;  %v4698_v40 = vsel %vm7792_vm4, %v4693_v15, %v4697_v57  ;;  %v6373_v57 = vld [vmem:[%s7754_s5 + $0x58] sm:$0xf]  ;;  %v6061_v26 = vld [vmem:[%s7754_s5 + $0x6c] sm:$0xf] }
 0x155   : > { %v5181_v49 = vrot.slane %v5179_v39, 4  ;;  %v6406_v2 = vrot.slane %v6360_v24, 9  ;;  %v6339_v53 = vcombine.low %v4688_v31, %v4698_v40  ;;  %v4707_v36 = vrot.slane %v4706_v35, 4  ;;  %v6374_v37 = vld [vmem:[%s7754_s5 + $0x5c] sm:$0x1]  ;;  %v7352_v40 = vld [vmem:[%s7754_s5 + $0x84] sm:$0xff]  }
 0x156   : > { %v4717_v21 = vrot.slane %v4716_v4, 4  ;;  %v5186_v55 = vrot.slane %v6361_v20, 5  ;;  %v5180_v5 = vsel %vm7864_vm7, %v6405_v19, %v5179_v39  ;;  %v5189_v58 = vrot.slane %v6362_v28, 5  ;;  %v6062_v9 = vld [vmem:[%s7754_s5 + $0x70] sm:$0xf] }
 0x157   : > { %6877 = vmatmul.mubr.msk.bf16.gmra.mrb[24].mxu0 %vm443_vm1, %v6338_v8  ;;  %v6407_v29 = vrot.slane %v6363_v6, 9  ;;  %v5193_v47 = vrot.slane %v6364_v33, 5  ;;  %v4712_v52 = vsel %vm7792_vm4, %v4707_v36, %v4711_v10  ;;  %v5183_v27 = vsel %vm7864_vm7, %v5181_v49, %v5182_v42  ;;  %v6063_v22 = vld [vmem:[%s7754_s5 + $0x74] sm:$0x1]  ;;  %v6375_v23 = vld [vmem:[%s7754_s5 + $0x60] sm:$0xe] }
 0x158   : > { %6880 = vmatprep.mubr.msk.bf16.mxu0 %vm443_vm1, %v6339_v53  ;;  %v4722_v34 = vsel %vm7792_vm4, %v4717_v21, %v4721_v13  ;;  %v8682_v63 = vsel %vm7864_vm7, %v6406_v2, %v5186_v55  ;;  %v5188_v14 = vrot.slane %v5186_v55, 4  ;;  %v5196_v11 = vrot.slane %v6365_v50, 5  ;;  %v6376_v19 = vld [vmem:[%s7754_s5 + $0x64] sm:$0xf]  ;;  %v6377_v13 = vld [vmem:[%s7754_s5 + $0x68] sm:$0x1] }
 0x159   : > { %v6340_v44 = vcombine.low %v4712_v52, %v4722_v34  ;;  %v8690_v0 = vsel %vm7864_vm7, %v6407_v29, %v5193_v47  ;;  %v5195_v16 = vrot.slane %v5193_v47, 4  ;;  %v6408_v17 = vrot.slane %v6366_v51, 9  ;;  %v7351_v42 = vld [vmem:[%s7754_s5 + $0x78] sm:$0xff]  }
 0x15a   : > { %v5200_v54 = vrot.slane %v6367_v12, 5  ;;  %v5203_v46 = vrot.slane %v6368_v60, 5  ;;  %v8696_v61 = vsel %vm7864_vm7, %v5188_v14, %v5189_v58  ;;  %v6409_v25 = vrot.slane %v6369_v3, 9  ;;  %v6064_v12 = vld [vmem:[%s7754_s5 + $0x78] sm:$0xf] }
 0x15b   : > { %v5207_v59 = vrot.slane %v6370_v18, 5  ;;  %v5210_v30 = vrot.slane %v6371_v38, 5  ;;  %6729 = vmatmul.mubr.msk.bf16.gmra.mrb[12].mxu1 %vm443_vm1, %v7349_v48  ;;  %v6421_v62 = vcombine.low %v5180_v5, %v5183_v27  ;;  %v6422_v1 = vcombine.low %v8682_v63, %v8696_v61  ;;  %v6065_v47 = vld [vmem:[%s7754_s5 + $0x7c] sm:$0xf]  ;;  %v6066_v3 = vld [vmem:[%s7754_s5 + $0x80] sm:$0x1] }
 0x15c   : > { %v8704_v24 = vsel %vm7864_vm7, %v5195_v16, %v5196_v11  ;;  %v5202_v8 = vrot.slane %v5200_v54, 4  ;;  %6732 = vmatprep.mubr.msk.bf16.mxu1 %vm443_vm1, %v7350_v41  ;;  %v8713_v20 = vsel %vm7864_vm7, %v6408_v17, %v5200_v54  ;;  %v6410_v6 = vrot.slane %v6372_v43, 9  ;;  %v6378_v18 = vld [vmem:[%s7754_s5 + $0x6c] sm:$0xe]  ;;  %v6379_v16 = vld [vmem:[%s7754_s5 + $0x70] sm:$0xf] }
 0x15d   : > { %v6423_v56 = vcombine.low %v8690_v0, %v8704_v24  ;;  %v8717_v7 = vsel %vm7864_vm7, %v6409_v25, %v5207_v59  ;;  %v5209_v10 = vrot.slane %v5207_v59, 4  ;;  %v5214_v31 = vrot.slane %v6373_v57, 5 }
 0x15e   : > { %v8723_v28 = vsel %vm7864_vm7, %v5202_v8, %v5203_v46  ;;  %v2750_v15 = vshrl.u32 %v6061_v26, 16  ;;  %v5217_v33 = vrot.slane %v6374_v37, 5  ;;  %v2753_v35 = vshll.u32 %v6061_v26, 16  ;;  %v6380_v46 = vld [vmem:[%s7754_s5 + $0x74] sm:$0x1] }
 0x15f   : > { %6881 = vmatmul.mubr.msk.bf16.gmra.mrb[28].mxu0 %vm443_vm1, %v6340_v44  ;;  %v8729_v39 = vsel %vm7864_vm7, %v5209_v10, %v5210_v30  ;;  %v2759_v4 = vshll.u32 %v6062_v9, 16  ;;  %v6424_v49 = vcombine.low %v8713_v20, %v8723_v28  ;;  %v5216_v50 = vrot.slane %v5214_v31, 4  ;;  %v6067_v26 = vld [vmem:[%s7754_s5 + $0x84] sm:$0xf]  ;;  %v7353_v10 = vld [vmem:[%s7754_s5 + $0x90] sm:$0xff]  }
 0x160   : > { %6886 = vmatprep.mubr.msk.bf16.mxu0 %vm443_vm1, %v6421_v62  ;;  %v6425_v2 = vcombine.low %v8717_v7, %v8729_v39  ;;  %v2752_v51 = vrot.slane %v2750_v15, 4  ;;  %v2755_v53 = vrot.slane %v2753_v35, 5  ;;  %v2763_v21 = vshrl.u32 %v6062_v9, 16 }
 0x161   : > { %v2761_v36 = vrot.slane %v2759_v4, 5  ;;  %v2769_v55 = vshll.u32 %v6063_v22, 16  ;;  %v8742_v48 = vsel %vm7864_vm7, %v6410_v6, %v5214_v31  ;;  %v6411_v5 = vrot.slane %v6375_v23, 9  ;;  %v6068_v23 = vld [vmem:[%s7754_s5 + $0x88] sm:$0xf]  ;;  %v7354_v6 = vld [vmem:[%s7754_s5 + $0x9c] sm:$0xff]  }
 0x162   : > { %v5221_v58 = vrot.slane %v6376_v19, 5  ;;  %v5224_v29 = vrot.slane %v6377_v13, 5  ;;  %v8747_v60 = vsel %vm7864_vm7, %v5216_v50, %v5217_v33  ;;  %v2756_v52 = vor.u32 %v2755_v53, %v2752_v51  ;;  %v6069_v33 = vld [vmem:[%s7754_s5 + $0x8c] sm:$0x1]  ;;  %v6381_v13 = vld [vmem:[%s7754_s5 + $0x78] sm:$0xe] }
 0x163   : > { %v2765_v34 = vrot.slane %v2763_v21, 4  ;;  %v2771_v27 = vrot.slane %v2769_v55, 5  ;;  %6733 = vmatmul.mubr.msk.bf16.gmra.mrb[16].mxu1 %vm443_vm1, %v7351_v42  ;;  %v2774_v44 = vshrl.u32 %v6064_v12, 16  ;;  %v2777_v14 = vshll.u32 %v6064_v12, 16  ;;  %v6382_v53 = vld [vmem:[%s7754_s5 + $0x7c] sm:$0xf] }
 0x164   : > { %v8754_v38 = vsel %vm7864_vm7, %v6411_v5, %v5221_v58  ;;  %v5223_v41 = vrot.slane %v5221_v58, 4  ;;  %6736 = vmatprep.mubr.msk.bf16.mxu1 %vm443_vm1, %v7352_v40  ;;  %v2757_v43 = vrot.slane %v2756_v52, 4  ;;  %v2783_v17 = vshll.u32 %v6065_v47, 16  ;;  %v6383_v5 = vld [vmem:[%s7754_s5 + $0x80] sm:$0x1] }
 0x165   : > { %v2766_v11 = vor.u32 %v2765_v34, %v2761_v36  ;;  %v2787_v54 = vshrl.u32 %v6065_v47, 16  ;;  %v2776_v25 = vrot.slane %v2774_v44, 4  ;;  %v2779_v59 = vrot.slane %v2777_v14, 5  ;;  %v6070_v34 = vld [vmem:[%s7754_s5 + $0x90] sm:$0xf] }
 0x166   : > { %v8761_v57 = vsel %vm7864_vm7, %v5223_v41, %v5224_v29  ;;  %v2793_v30 = vshll.u32 %v6066_v3, 16  ;;  %v6426_v62 = vcombine.low %v8742_v48, %v8747_v60  ;;  %v2762_v8 = vsel %vm7792_vm4, %v2757_v43, %v2761_v36  ;;  %v6071_v44 = vld [vmem:[%s7754_s5 + $0x94] sm:$0xf] }
 0x167   : > { %6887 = vmatmul.mubr.msk.bf16.vlgmr.msra.gmra.mrb[0].mxu0 %vm443_vm1, %v6422_v1  ;;  %v2767_v37 = vrot.slane %v2766_v11, 4  ;;  %v2785_v9 = vrot.slane %v2783_v17, 5  ;;  %v6427_v63 = vcombine.low %v8754_v38, %v8761_v57  ;;  %v2780_v61 = vor.u32 %v2779_v59, %v2776_v25  ;;  %v6072_v17 = vld [vmem:[%s7754_s5 + $0x98] sm:$0x1]  ;;  %v6076_v57 = vld [vmem:[%s7754_s5 + $0xa8] sm:$0xf] }
 0x168   : > { %6890 = vmatprep.mubr.msk.bf16.mxu0 %vm443_vm1, %v6423_v56  ;;  %v2789_v1 = vrot.slane %v2787_v54, 4  ;;  %v6412_v22 = vrot.slane %v6378_v18, 9  ;;  %v5228_v15 = vrot.slane %v6379_v16, 5  ;;  %v5231_v19 = vrot.slane %v6380_v46, 5  ;;  %v7355_v54 = vld [vmem:[%s7754_s5 + $0xa8] sm:$0xff]   ;;  %v7356_v59 = vld [vmem:[%s7754_s5 + $0xb4] sm:$0xff]  }
 0x169   : > { %v2772_v31 = vsel %vm7792_vm4, %v2767_v37, %v2771_v27  ;;  %v2798_v35 = vshrl.u32 %v6067_v26, 16  ;;  %v2781_v0 = vrot.slane %v2780_v61, 4  ;;  %v2795_v56 = vrot.slane %v2793_v30, 5  ;;  %v6386_v61 = vld [vmem:[%s7754_s5 + $0x8c] sm:$0x1] }
 0x16a   : > { %v2790_v24 = vor.u32 %v2789_v1, %v2785_v9  ;;  %v2801_v4 = vshll.u32 %v6067_v26, 16  ;;  %v8785_v42 = vcombine.low %v2762_v8, %v2772_v31  ;;  %v5230_v40 = vrot.slane %v5228_v15, 4  ;;  %v6073_v31 = vld [vmem:[%s7754_s5 + $0x9c] sm:$0xf] }
 0x16b   : > { %v2800_v50 = vrot.slane %v2798_v35, 4  ;;  %v2807_v51 = vshll.u32 %v6068_v23, 16  ;;  %6737 = vmatmul.mubr.msk.bf16.gmra.mrb[20].mxu1 %vm443_vm1, %v7353_v10  ;;  %v8791_v21 = vsel %vm7864_vm7, %v6412_v22, %v5228_v15  ;;  %v2811_v12 = vshrl.u32 %v6068_v23, 16 }
 0x16c   : > { %v2791_v36 = vrot.slane %v2790_v24, 4  ;;  %v2803_v55 = vrot.slane %v2801_v4, 5  ;;  %6740 = vmatprep.mubr.msk.bf16.mxu1 %vm443_vm1, %v7354_v6  ;;  %v8797_v58 = vsel %vm7864_vm7, %v5230_v40, %v5231_v19  ;;  %v2817_v47 = vshll.u32 %v6069_v33, 16  ;;  %v6075_v40 = vld [vmem:[%s7754_s5 + $0xa4] sm:$0x1] }
 0x16d   : > { %v2809_v29 = vrot.slane %v2807_v51, 5  ;;  %v6413_v52 = vrot.slane %v6381_v13, 9  ;;  %v2786_v27 = vsel %vm7792_vm4, %v2781_v0, %v2785_v9  ;;  %v2813_v41 = vrot.slane %v2811_v12, 4  ;;  %v6385_v9 = vld [vmem:[%s7754_s5 + $0x88] sm:$0xf] }
 0x16e   : > { %v2796_v3 = vsel %vm7792_vm4, %v2791_v36, %v2795_v56  ;;  %v2804_v18 = vor.u32 %v2803_v55, %v2800_v50  ;;  %v6428_v14 = vcombine.low %v8791_v21, %v8797_v58  ;;  %v2819_v16 = vrot.slane %v2817_v47, 5  ;;  %v6074_v0 = vld [vmem:[%s7754_s5 + $0xa0] sm:$0xf]  ;;  %v6387_v55 = vld [vmem:[%s7754_s5 + $0x90] sm:$0xe] }
 0x16f   : > { %6891 = vmatmul.mubr.msk.bf16.gmra.mrb[4].mxu0 %vm443_vm1, %v6424_v49  ;;  %v5235_v43 = vrot.slane %v6382_v53, 5  ;;  %v5238_v11 = vrot.slane %v6383_v5, 5  ;;  %v2814_v25 = vor.u32 %v2813_v41, %v2809_v29  ;;  %v2822_v20 = vshrl.u32 %v6070_v34, 16  ;;  %v6384_v49 = vld [vmem:[%s7754_s5 + $0x84] sm:$0xe] }
 0x170   : > { %6894 = vmatprep.mubr.msk.bf16.mxu0 %vm443_vm1, %v6425_v2  ;;  %v2805_v46 = vrot.slane %v2804_v18, 4  ;;  %v2825_v28 = vshll.u32 %v6070_v34, 16  ;;  %v2831_v8 = vshll.u32 %v6071_v44, 16  ;;  %v2835_v37 = vshrl.u32 %v6071_v44, 16  ;;  %v7357_v34 = vld [vmem:[%s7754_s5 + $0xc0] sm:$0xff]  }
 0x171   : > { %v8821_v30 = vsel %vm7864_vm7, %v6413_v52, %v5235_v43  ;;  %v5237_v26 = vrot.slane %v5235_v43, 4  ;;  %v8824_v7 = vcombine.low %v2786_v27, %v2796_v3  ;;  %v2815_v39 = vrot.slane %v2814_v25, 4  ;;  %v6388_v52 = vld [vmem:[%s7754_s5 + $0x94] sm:$0xf]  ;;  %v6389_v3 = vld [vmem:[%s7754_s5 + $0x98] sm:$0x1] }
 0x172   : > { %v2824_v2 = vrot.slane %v2822_v20, 4  ;;  %v2827_v10 = vrot.slane %v2825_v28, 5  ;;  %v2833_v22 = vrot.slane %v2831_v8, 5  ;;  %v2837_v23 = vrot.slane %v2835_v37, 4  ;;  %v6078_v28 = vld [vmem:[%s7754_s5 + $0xb0] sm:$0x1] }
 0x173   : > { %v8829_v1 = vsel %vm7864_vm7, %v5237_v26, %v5238_v11  ;;  %v2841_v6 = vshll.u32 %v6072_v17, 16  ;;  %6741 = vmatmul.mubr.msk.bf16.gmra.mrb[24].mxu1 %vm443_vm1, %v7355_v54  ;;  %v2810_v15 = vsel %vm7792_vm4, %v2805_v46, %v2809_v29  ;;  %v2820_v19 = vsel %vm7792_vm4, %v2815_v39, %v2819_v16  ;;  %v6077_v17 = vld [vmem:[%s7754_s5 + $0xac] sm:$0xf]  ;;  %v6390_v37 = vld [vmem:[%s7754_s5 + $0x9c] sm:$0xe] }
 0x174   : > { %v6429_v33 = vcombine.low %v8821_v30, %v8829_v1  ;;  %v2828_v35 = vor.u32 %v2827_v10, %v2824_v2  ;;  %6744 = vmatprep.mubr.msk.bf16.mxu1 %vm443_vm1, %v7356_v59  ;;  %v2838_v24 = vor.u32 %v2837_v23, %v2833_v22  ;;  %v6414_v4 = vrot.slane %v6384_v49, 9  ;;  %v6081_v30 = vld [vmem:[%s7754_s5 + $0xbc] sm:$0x1] }
 0x175   : > { %v2843_v56 = vrot.slane %v2841_v6, 5  ;;  %v5242_v13 = vrot.slane %v6385_v9, 5  ;;  %v5245_v51 = vrot.slane %v6386_v61, 5  ;;  %v2846_v53 = vshrl.u32 %v6073_v31, 16  ;;  %v6391_v61 = vld [vmem:[%s7754_s5 + $0xa0] sm:$0xf] }
 0x176   : > { %v2829_v50 = vrot.slane %v2828_v35, 4  ;;  %v2849_v36 = vshll.u32 %v6073_v31, 16  ;;  %v8847_v12 = vcombine.low %v2810_v15, %v2820_v19  ;;  %v2839_v5 = vrot.slane %v2838_v24, 4  ;;  %v6392_v15 = vld [vmem:[%s7754_s5 + $0xa4] sm:$0x1] }
 0x177   : > { %6895 = vmatmul.mubr.msk.bf16.gmra.mrb[8].mxu0 %vm443_vm1, %v6426_v62  ;;  %v5244_v29 = vrot.slane %v5242_v13, 4  ;;  %v2855_v47 = vshll.u32 %v6074_v0, 16  ;;  %v2848_v48 = vrot.slane %v2846_v53, 4  ;;  %v2859_v62 = vshrl.u32 %v6074_v0, 16  ;;  %v6079_v24 = vld [vmem:[%s7754_s5 + $0xb4] sm:$0xf] }
 0x178   : > { %6898 = vmatprep.mubr.msk.bf16.mxu0 %vm443_vm1, %v6427_v63  ;;  %v2834_v27 = vsel %vm7792_vm4, %v2829_v50, %v2833_v22  ;;  %v2851_v60 = vrot.slane %v2849_v36, 5  ;;  %v2844_v18 = vsel %vm7792_vm4, %v2839_v5, %v2843_v56  ;;  %v8862_v41 = vsel %vm7864_vm7, %v6414_v4, %v5242_v13  ;;  %v6080_v4 = vld [vmem:[%s7754_s5 + $0xb8] sm:$0xf] }
 0x179   : > { %v2857_v44 = vrot.slane %v2855_v47, 5  ;;  %v2865_v38 = vshll.u32 %v6075_v40, 16  ;;  %v8865_v63 = vcombine.low %v2834_v27, %v2844_v18  ;;  %v8869_v16 = vsel %vm7864_vm7, %v5244_v29, %v5245_v51 }
 0x17a   : > { %v2852_v43 = vor.u32 %v2851_v60, %v2848_v48  ;;  %v2861_v11 = vrot.slane %v2859_v62, 4  ;;  %v6415_v46 = vrot.slane %v6387_v55, 9  ;;  %v5249_v25 = vrot.slane %v6388_v52, 5  ;;  %v6393_v55 = vld [vmem:[%s7754_s5 + $0xa8] sm:$0xe] }
 0x17b   : > { %v2867_v54 = vrot.slane %v2865_v38, 5  ;;  %v5252_v20 = vrot.slane %v6389_v3, 5  ;;  %6745 = vmatmul.mubr.msk.bf16.gmra.mrb[28].mxu1 %vm443_vm1, %v7357_v34  ;;  %v2870_v26 = vshrl.u32 %v6076_v57, 16  ;;  %v2873_v8 = vshll.u32 %v6076_v57, 16  ;;  %v6394_v34 = vld [vmem:[%s7754_s5 + $0xac] sm:$0xf] }
 0x17c   : > { %v2853_v49 = vrot.slane %v2852_v43, 4  ;;  %v2862_v59 = vor.u32 %v2861_v11, %v2857_v44  ;;  %6766 = vmatprep.mubr.msk.bf16.mxu1 %vm443_vm1, %v8785_v42  ;;  %v6430_v9 = vcombine.low %v8862_v41, %v8869_v16  ;;  %v5251_v39 = vrot.slane %v5249_v25, 4  ;;  %v6395_v3 = vld [vmem:[%s7754_s5 + $0xb0] sm:$0x1]  ;;  %v6082_v38 = vld [vmem:[%s7754_s5 + $0xc0] sm:$0xf] }
 0x17d   : > { %v2879_v2 = vshll.u32 %v6077_v17, 16  ;;  %v2883_v10 = vshrl.u32 %v6077_v17, 16  ;;  %v5250_v23 = vsel %vm7864_vm7, %v6415_v46, %v5249_v25  ;;  %v2872_v6 = vrot.slane %v2870_v26, 4  ;;  %v6083_v11 = vld [vmem:[%s7754_s5 + $0xc4] sm:$0xf] }
 0x17e   : > { %v2863_v22 = vrot.slane %v2862_v59, 4  ;;  %v2875_v31 = vrot.slane %v2873_v8, 5  ;;  %v5253_v42 = vsel %vm7864_vm7, %v5251_v39, %v5252_v20  ;;  %v2889_v0 = vshll.u32 %v6078_v28, 16  ;;  %v6084_v17 = vld [vmem:[%s7754_s5 + $0xc8] sm:$0x1] }
 0x17f   : > { %6899 = vmatmul.mubr.msk.bf16.gmra.mrb[12].mxu0 %vm443_vm1, %v6428_v14  ;;  %v8889_v19 = vrot.slane %v2879_v2, 5  ;;  %v2885_v35 = vrot.slane %v2883_v10, 4  ;;  %v2858_v21 = vsel %vm7792_vm4, %v2853_v49, %v2857_v44  ;;  %v6416_v56 = vrot.slane %v6390_v37, 9  ;;  %v6396_v28 = vld [vmem:[%s7754_s5 + $0xb4] sm:$0xe] }
 0x180   : > { %6902 = vmatprep.mubr.msk.bf16.mxu0 %vm443_vm1, %v6429_v33  ;;  %v2868_v58 = vsel %vm7792_vm4, %v2863_v22, %v2867_v54  ;;  %v2876_v14 = vor.u32 %v2875_v31, %v2872_v6  ;;  %v6431_v13 = vcombine.low %v5250_v23, %v5253_v42  ;;  %v8902_v50 = vrot.slane %v2889_v0, 5  ;;  %v6397_v37 = vld [vmem:[%s7754_s5 + $0xb8] sm:$0xf] }
 0x181   : > { %v2886_v40 = vor.u32 %v2885_v35, %v8889_v19  ;;  %v5256_v51 = vrot.slane %v6391_v61, 5  ;;  %v5259_v33 = vrot.slane %v6392_v15, 5  ;;  %v2894_v53 = vshrl.u32 %v6079_v24, 16  ;;  %v6398_v61 = vld [vmem:[%s7754_s5 + $0xbc] sm:$0x1] }
 0x182   : > { %v8905_v1 = vrot.slane %v2876_v14, 4  ;;  %v2897_v36 = vshll.u32 %v6079_v24, 16  ;;  %v2903_v52 = vshll.u32 %v6080_v4, 16  ;;  %v6097_v27 = vcombine.low %v2858_v21, %v2868_v58  ;;  %v6399_v15 = vld [vmem:[%s7754_s5 + $0xc0] sm:$0xe] }
 0x183   : > { %v8908_v5 = vrot.slane %v2886_v40, 4  ;;  %v8912_v29 = vsel %vm7864_vm7, %v6416_v56, %v5256_v51  ;;  %v5258_v47 = vrot.slane %v5256_v51, 4  ;;  %6767 = vmatmul.mubr.msk.bf16.vlgmr.msra.gmra.mrb[16].mxu1 %vm443_vm1, %v8824_v7  ;;  %v2896_v48 = vrot.slane %v2894_v53, 4  ;;  %v6400_v24 = vld [vmem:[%s7754_s5 + $0xc4] sm:$0xf] }
 0x184   : > { %v2899_v60 = vrot.slane %v2897_v36, 5  ;;  %v2907_v62 = vshrl.u32 %v6080_v4, 16  ;;  %6770 = vmatprep.mubr.msk.bf16.mxu1 %vm443_vm1, %v8847_v12  ;;  %v2882_v18 = vsel %vm7792_vm4, %v8905_v1, %v8889_v19  ;;  %v2905_v7 = vrot.slane %v2903_v52, 5  ;;  %v6401_v4 = vld [vmem:[%s7754_s5 + $0xc8] sm:$0x1] }
 0x185   : > { %v5260_v41 = vsel %vm7864_vm7, %v5258_v47, %v5259_v33  ;;  %v2913_v44 = vshll.u32 %v6081_v30, 16  ;;  %v2892_v57 = vsel %vm7792_vm4, %v8908_v5, %v8902_v50  ;;  %v6417_v46 = vrot.slane %v6393_v55, 9  ;;  %v6403_v1 = vld [vmem:[%s7754_s5 + $0xd0] sm:$0xf] }
 0x186   : > { %v6432_v16 = vcombine.low %v8912_v29, %v5260_v41  ;;  %v2900_v12 = vor.u32 %v2899_v60, %v2896_v48  ;;  %v2909_v43 = vrot.slane %v2907_v62, 4  ;;  %v5263_v25 = vrot.slane %v6394_v34, 5  ;;  %v6402_v48 = vld [vmem:[%s7754_s5 + $0xcc] sm:$0xe]  ;;  %v6404_v60 = vld [vmem:[%s7754_s5 + $0xd4] sm:$0x1] }
 0x187   : > { %6903 = vmatmul.mubr.msk.bf16.gmra.mrb[16].mxu0 %vm443_vm1, %v6430_v9  ;;  %v2915_v54 = vrot.slane %v2913_v44, 5  ;;  %v5266_v20 = vrot.slane %v6395_v3, 5  ;;  %v2918_v26 = vshrl.u32 %v6082_v38, 16  ;;  %v2921_v8 = vshll.u32 %v6082_v38, 16 }
 0x188   : > { %6906 = vmatprep.mubr.msk.bf16.mxu0 %vm443_vm1, %v6431_v13  ;;  %v2901_v49 = vrot.slane %v2900_v12, 4  ;;  %v2910_v59 = vor.u32 %v2909_v43, %v2905_v7  ;;  %v5264_v39 = vsel %vm7864_vm7, %v6417_v46, %v5263_v25  ;;  %v5265_v2 = vrot.slane %v5263_v25, 4 }
 0x189   : > { %v2927_v9 = vshll.u32 %v6083_v11, 16  ;;  %v2931_v10 = vshrl.u32 %v6083_v11, 16  ;;  %v2920_v6 = vrot.slane %v2918_v26, 4  ;;  %v2923_v31 = vrot.slane %v2921_v8, 5 }
 0x18a   : > { %v2906_v22 = vsel %vm7792_vm4, %v2901_v49, %v2905_v7  ;;  %v2911_v23 = vrot.slane %v2910_v59, 4  ;;  %v5267_v42 = vsel %vm7864_vm7, %v5265_v2, %v5266_v20  ;;  %v2937_v0 = vshll.u32 %v6084_v17, 16 }
 0x18b   : > { %v2929_v19 = vrot.slane %v2927_v9, 5  ;;  %v2933_v35 = vrot.slane %v2931_v10, 4  ;;  %6771 = vmatmul.mubr.msk.bf16.gmra.mrb[20].mxu1 %vm443_vm1, %v8865_v63  ;;  %v6433_v58 = vcombine.low %v5264_v39, %v5267_v42  ;;  %v2924_v14 = vor.u32 %v2923_v31, %v2920_v6 }
 0x18c   : > { %v2916_v21 = vsel %vm7792_vm4, %v2911_v23, %v2915_v54  ;;  %v6418_v56 = vrot.slane %v6396_v28, 9  ;;  %6774 = vmatprep.mubr.msk.bf16.mxu1 %vm443_vm1, %v6097_v27  ;;  %v5270_v40 = vrot.slane %v6397_v37, 5  ;;  %v5273_v50 = vrot.slane %v6398_v61, 5  ;;  %v8980_v61 = vld [vmem:[#allocation8] ss:$0 sm:$0xff] }
 0x18d   : > { %v2934_v13 = vor.u32 %v2933_v35, %v2929_v19  ;;  %v6419_v51 = vrot.slane %v6399_v15, 9  ;;  %v5277_v30 = vrot.slane %v6400_v24, 5  ;;  %v6098_v33 = vcombine.low %v2882_v18, %v2892_v57 }
 0x18e   : > { %v6099_v63 = vcombine.low %v2906_v22, %v2916_v21  ;;  %v5272_v53 = vrot.slane %v5270_v40, 4  ;;  %v5280_v36 = vrot.slane %v6401_v4, 5  ;;  %v2925_v55 = vrot.slane %v2924_v14, 4 }
 0x18f   : > { %6907 = vmatmul.mubr.msk.bf16.gmra.mrb[20].mxu0 %vm443_vm1, %v6432_v16  ;;  %v2939_v5 = vrot.slane %v2937_v0, 5  ;;  %v5271_v29 = vsel %vm7864_vm7, %v6418_v56, %v5270_v40  ;;  %v5279_v47 = vrot.slane %v5277_v30, 4  ;;  %v2935_v52 = vrot.slane %v2934_v13, 4 }
 0x190   : > { %6910 = vmatprep.mubr.msk.bf16.mxu0 %vm443_vm1, %v6433_v58  ;;  %v5274_v34 = vsel %vm7864_vm7, %v5272_v53, %v5273_v50  ;;  %v5278_v27 = vsel %vm7864_vm7, %v6419_v51, %v5277_v30  ;;  %v5284_v62 = vrot.slane %v6403_v1, 5  ;;  %v6420_v7 = vrot.slane %v6402_v48, 9 }
 0x191   : > { %v5281_v3 = vsel %vm7864_vm7, %v5279_v47, %v5280_v36  ;;  %v6434_v18 = vcombine.low %v5271_v29, %v5274_v34  ;;  %v5287_v38 = vrot.slane %v6404_v60, 5  ;;  %v2930_v57 = vsel %vm7792_vm4, %v2925_v55, %v2929_v19 }
 0x192   : > { %v6435_v41 = vcombine.low %v5278_v27, %v5281_v3  ;;  %v5286_v44 = vrot.slane %v5284_v62, 4  ;;  %v2940_v16 = vsel %vm7792_vm4, %v2935_v52, %v2939_v5  ;;  %v5285_v43 = vsel %vm7864_vm7, %v6420_v7, %v5284_v62 }
 0x193   : > { %6775 = vmatmul.mubr.msk.bf16.gmra.mrb[24].mxu1 %vm443_vm1, %v6098_v33  ;;  %v6100_v12 = vcombine.low %v2930_v57, %v2940_v16 }
 0x194   : > { %6778 = vmatprep.mubr.msk.bf16.mxu1 %vm443_vm1, %v6099_v63  ;;  %v5288_v11 = vsel %vm7864_vm7, %v5286_v44, %v5287_v38 }
 0x195   : > { %v6436_v17 = vcombine.low %v5285_v43, %v5288_v11 }
 0x197   : > { %6911 = vmatmul.mubr.msk.bf16.gmra.mrb[24].mxu0 %vm443_vm1, %v6434_v18 }
 0x198   : > { %6914 = vmatprep.mubr.msk.bf16.mxu0 %vm443_vm1, %v6435_v41 }
 0x19b   : > { %6779 = vmatmul.mubr.msk.bf16.gmra.mrb[28].mxu1 %vm443_vm1, %v6100_v12 }
 0x19f   : > { %6915 = vmatmul.mubr.msk.bf16.gmra.mrb[28].mxu0 %vm443_vm1, %v6436_v17 }
 0x216   : > { %v6718_v54 = vpop.f32.mrb[0].mxu1 }
 0x217   : > { %v2318_v46 = vpop.f32.mrb[1].mxu1  ;;  %v6920_v22 = vadd.f32 %v6718_v54, %v8980_v61 }
 0x218   : > { %v6719_v32 = vpop.f32.mrb[2].mxu1  ;;  %v6922_v23 = vadd.f32 %v8980_v61, %v2318_v46 }
 0x219   : > { %v2321_v25 = vpop.f32.mrb[3].mxu1  ;;  %v6924_v31 = vadd.f32 %v6719_v32, %v8980_v61 }
 0x21a   : > { %v6926_v19 = vadd.f32 %v8980_v61, %v2321_v25 }
 0x21e   : > { %v6722_v20 = vpop.f32.mrb[4].mxu1 }
 0x21f   : > { %v2334_v28 = vpop.f32.mrb[5].mxu1  ;;  %v6928_v14 = vadd.f32 %v6722_v20, %v8980_v61 }
 0x220   : > { %v6723_v49 = vpop.f32.mrb[6].mxu1  ;;  %v6930_v56 = vadd.f32 %v8980_v61, %v2334_v28 }
 0x221   : > { %v2337_v59 = vpop.f32.mrb[7].mxu1  ;;  %v6932_v13 = vadd.f32 %v6723_v49, %v8980_v61 }
 0x222   : > { %v6934_v51 = vadd.f32 %v8980_v61, %v2337_v59 }
 0x226   : > { %v6726_v26 = vpop.f32.mrb[8].mxu1 }
 0x227   : > { %v2350_v8 = vpop.f32.mrb[9].mxu1  ;;  %v6936_v36 = vadd.f32 %v6726_v26, %v8980_v61 }
 0x228   : > { %v6727_v37 = vpop.f32.mrb[10].mxu1  ;;  %v6938_v55 = vadd.f32 %v8980_v61, %v2350_v8 }
 0x229   : > { %v2353_v39 = vpop.f32.mrb[11].mxu1  ;;  %v6940_v29 = vadd.f32 %v6727_v37, %v8980_v61 }
 0x22a   : > { %v6942_v34 = vadd.f32 %v8980_v61, %v2353_v39 }
 0x22e   : > { %v6730_v45 = vpop.f32.mrb[12].mxu1 }
 0x22f   : > { %v2366_v2 = vpop.f32.mrb[13].mxu1  ;;  %v6944_v18 = vadd.f32 %v6730_v45, %v8980_v61 }
 0x230   : > { %v6731_v9 = vpop.f32.mrb[14].mxu1  ;;  %v6946_v41 = vadd.f32 %v8980_v61, %v2366_v2 }
 0x231   : > { %v2369_v10 = vpop.f32.mrb[15].mxu1  ;;  %v6948_v44 = vadd.f32 %v6731_v9, %v8980_v61 }
 0x232   : > { %v6950_v16 = vadd.f32 %v8980_v61, %v2369_v10 }
 0x23a   : > { %v6888_v6 = vpop.f32.mrb[0].mxu0 }
 0x23b   : > { %v6921_v15 = vadd.f32 %v6920_v22, %v6888_v6  ;;  %v5456_v42 = vpop.f32.mrb[1].mxu0 }
 0x23c   : > { %v6923_v35 = vadd.f32 %v6922_v23, %v5456_v42  ;;  %v6889_v0 = vpop.f32.mrb[2].mxu0 }
 0x23d   : > { %5681 = vst [vmem:[%s8987_s22 + $0x10] sm:$0xff] %v6921_v15  ;;  %v6925_v24 = vadd.f32 %v6924_v31, %v6889_v0  ;;  %v5459_v21 = vpop.f32.mrb[3].mxu0 }
 0x23e   : > { %5679 = vst [vmem:[%s8987_s22] sm:$0xff] %v6923_v35  ;;  %v6927_v58 = vadd.f32 %v6926_v19, %v5459_v21 }
 0x23f   : > { %5682 = vst [vmem:[%s8987_s22 + $0x18] sm:$0xff] %v6925_v24 }
 0x240   : > { %5680 = vst [vmem:[%s8987_s22 + $0x8] sm:$0xff] %v6927_v58 }
 0x242   : > { %v6892_v4 = vpop.f32.mrb[4].mxu0 }
 0x243   : > { %v6929_v40 = vadd.f32 %v6928_v14, %v6892_v4  ;;  %v5472_v50 = vpop.f32.mrb[5].mxu0 }
 0x244   : > { %v6931_v30 = vadd.f32 %v6930_v56, %v5472_v50  ;;  %v6893_v1 = vpop.f32.mrb[6].mxu0 }
 0x245   : > { %5685 = vst [vmem:[%s8987_s22 + $0x30] sm:$0xff] %v6929_v40  ;;  %v6933_v33 = vadd.f32 %v6932_v13, %v6893_v1  ;;  %v5475_v63 = vpop.f32.mrb[7].mxu0 }
 0x246   : > { %5683 = vst [vmem:[%s8987_s22 + $0x20] sm:$0xff] %v6931_v30  ;;  %v6935_v53 = vadd.f32 %v6934_v51, %v5475_v63 }
 0x247   : > { %5686 = vst [vmem:[%s8987_s22 + $0x38] sm:$0xff] %v6933_v33 }
 0x248   : > { %5684 = vst [vmem:[%s8987_s22 + $0x28] sm:$0xff] %v6935_v53 }
 0x24a   : > { %v6896_v5 = vpop.f32.mrb[8].mxu0 }
 0x24b   : > { %v6937_v47 = vadd.f32 %v6936_v36, %v6896_v5  ;;  %v5488_v52 = vpop.f32.mrb[9].mxu0 }
 0x24c   : > { %v6939_v27 = vadd.f32 %v6938_v55, %v5488_v52  ;;  %v6897_v48 = vpop.f32.mrb[10].mxu0 }
 0x24d   : > { %5689 = vst [vmem:[%s8987_s22 + $0x50] sm:$0xff] %v6937_v47  ;;  %v6941_v60 = vadd.f32 %v6940_v29, %v6897_v48  ;;  %v5491_v62 = vpop.f32.mrb[11].mxu0 }
 0x24e   : > { %5687 = vst [vmem:[%s8987_s22 + $0x40] sm:$0xff] %v6939_v27  ;;  %v6943_v3 = vadd.f32 %v6942_v34, %v5491_v62 }
 0x24f   : > { %5690 = vst [vmem:[%s8987_s22 + $0x58] sm:$0xff] %v6941_v60 }
 0x250   : > { %5688 = vst [vmem:[%s8987_s22 + $0x48] sm:$0xff] %v6943_v3 }
 0x252   : > { %v6900_v7 = vpop.f32.mrb[12].mxu0 }
 0x253   : > { %v6945_v38 = vadd.f32 %v6944_v18, %v6900_v7  ;;  %v5504_v57 = vpop.f32.mrb[13].mxu0 }
 0x254   : > { %v6947_v12 = vadd.f32 %v6946_v41, %v5504_v57  ;;  %v6901_v43 = vpop.f32.mrb[14].mxu0 }
 0x255   : > { %5693 = vst [vmem:[%s8987_s22 + $0x70] sm:$0xff] %v6945_v38  ;;  %v6949_v11 = vadd.f32 %v6948_v44, %v6901_v43  ;;  %v5507_v17 = vpop.f32.mrb[15].mxu0 }
 0x256   : > { %5691 = vst [vmem:[%s8987_s22 + $0x60] sm:$0xff] %v6947_v12  ;;  %v6951_v54 = vadd.f32 %v6950_v16, %v5507_v17  ;;  %v6768_v46 = vpop.f32.mrb[16].mxu1 }
 0x257   : > { %5694 = vst [vmem:[%s8987_s22 + $0x78] sm:$0xff] %v6949_v11  ;;  %v3172_v32 = vpop.f32.mrb[17].mxu1  ;;  %v6952_v25 = vadd.f32 %v6768_v46, %v8980_v61 }
 0x258   : > { %5692 = vst [vmem:[%s8987_s22 + $0x68] sm:$0xff] %v6951_v54  ;;  %v6769_v20 = vpop.f32.mrb[18].mxu1  ;;  %v6954_v28 = vadd.f32 %v8980_v61, %v3172_v32 }
 0x259   : > { %v3175_v49 = vpop.f32.mrb[19].mxu1  ;;  %v6956_v26 = vadd.f32 %v6769_v20, %v8980_v61 }
 0x25a   : > { %v6904_v59 = vpop.f32.mrb[16].mxu0  ;;  %v6958_v39 = vadd.f32 %v8980_v61, %v3175_v49 }
 0x25b   : > { %v6953_v8 = vadd.f32 %v6952_v25, %v6904_v59  ;;  %v5520_v37 = vpop.f32.mrb[17].mxu0 }
 0x25c   : > { %v6955_v45 = vadd.f32 %v6954_v28, %v5520_v37  ;;  %v6905_v2 = vpop.f32.mrb[18].mxu0 }
 0x25d   : > { %5697 = vst [vmem:[%s8987_s22 + $0x90] sm:$0xff] %v6953_v8  ;;  %v6957_v9 = vadd.f32 %v6956_v26, %v6905_v2  ;;  %v5523_v10 = vpop.f32.mrb[19].mxu0 }
 0x25e   : > { %5695 = vst [vmem:[%s8987_s22 + $0x80] sm:$0xff] %v6955_v45  ;;  %v6959_v22 = vadd.f32 %v6958_v39, %v5523_v10  ;;  %v6772_v23 = vpop.f32.mrb[20].mxu1 }
 0x25f   : > { %5698 = vst [vmem:[%s8987_s22 + $0x98] sm:$0xff] %v6957_v9  ;;  %v3188_v6 = vpop.f32.mrb[21].mxu1  ;;  %v6960_v31 = vadd.f32 %v6772_v23, %v8980_v61 }
 0x260   : > { %5696 = vst [vmem:[%s8987_s22 + $0x88] sm:$0xff] %v6959_v22  ;;  %v6773_v15 = vpop.f32.mrb[22].mxu1  ;;  %v6962_v42 = vadd.f32 %v8980_v61, %v3188_v6 }
 0x261   : > { %v3191_v19 = vpop.f32.mrb[23].mxu1  ;;  %v6964_v0 = vadd.f32 %v6773_v15, %v8980_v61 }
 0x262   : > { %v6908_v35 = vpop.f32.mrb[20].mxu0  ;;  %v6966_v58 = vadd.f32 %v8980_v61, %v3191_v19 }
 0x263   : > { %v6961_v24 = vadd.f32 %v6960_v31, %v6908_v35  ;;  %v5536_v21 = vpop.f32.mrb[21].mxu0 }
 0x264   : > { %v6963_v14 = vadd.f32 %v6962_v42, %v5536_v21  ;;  %v6909_v56 = vpop.f32.mrb[22].mxu0 }
 0x265   : > { %5701 = vst [vmem:[%s8987_s22 + $0xb0] sm:$0xff] %v6961_v24  ;;  %v6965_v4 = vadd.f32 %v6964_v0, %v6909_v56  ;;  %v5539_v13 = vpop.f32.mrb[23].mxu0 }
 0x266   : > { %5699 = vst [vmem:[%s8987_s22 + $0xa0] sm:$0xff] %v6963_v14  ;;  %v6967_v40 = vadd.f32 %v6966_v58, %v5539_v13  ;;  %v6776_v50 = vpop.f32.mrb[24].mxu1 }
 0x267   : > { %5702 = vst [vmem:[%s8987_s22 + $0xb8] sm:$0xff] %v6965_v4  ;;  %v3204_v51 = vpop.f32.mrb[25].mxu1  ;;  %v6968_v30 = vadd.f32 %v6776_v50, %v8980_v61 }
 0x268   : > { %5700 = vst [vmem:[%s8987_s22 + $0xa8] sm:$0xff] %v6967_v40  ;;  %v6777_v1 = vpop.f32.mrb[26].mxu1  ;;  %v6970_v33 = vadd.f32 %v8980_v61, %v3204_v51 }
 0x269   : > { %v3207_v63 = vpop.f32.mrb[27].mxu1  ;;  %v6972_v36 = vadd.f32 %v6777_v1, %v8980_v61 }
 0x26a   : > { %v6912_v53 = vpop.f32.mrb[24].mxu0  ;;  %v6974_v29 = vadd.f32 %v8980_v61, %v3207_v63 }
 0x26b   : > { %v6969_v55 = vadd.f32 %v6968_v30, %v6912_v53  ;;  %v5552_v5 = vpop.f32.mrb[25].mxu0 }
 0x26c   : > { %v6971_v47 = vadd.f32 %v6970_v33, %v5552_v5  ;;  %v6913_v52 = vpop.f32.mrb[26].mxu0 }
 0x26d   : > { %5705 = vst [vmem:[%s8987_s22 + $0xd0] sm:$0xff] %v6969_v55  ;;  %v6973_v34 = vadd.f32 %v6972_v36, %v6913_v52  ;;  %v5555_v27 = vpop.f32.mrb[27].mxu0 }
 0x26e   : > { %5703 = vst [vmem:[%s8987_s22 + $0xc0] sm:$0xff] %v6971_v47  ;;  %v6975_v48 = vadd.f32 %v6974_v29, %v5555_v27  ;;  %v6780_v60 = vpop.f32.mrb[28].mxu1 }
 0x26f   : > { %5706 = vst [vmem:[%s8987_s22 + $0xd8] sm:$0xff] %v6973_v34  ;;  %v3220_v62 = vpop.f32.mrb[29].mxu1  ;;  %v6976_v3 = vadd.f32 %v6780_v60, %v8980_v61 }
 0x270   : > { %5704 = vst [vmem:[%s8987_s22 + $0xc8] sm:$0xff] %v6975_v48  ;;  %v6781_v18 = vpop.f32.mrb[30].mxu1  ;;  %v6978_v41 = vadd.f32 %v8980_v61, %v3220_v62 }
 0x271   : > { %v3223_v7 = vpop.f32.mrb[31].mxu1  ;;  %v6980_v38 = vadd.f32 %v6781_v18, %v8980_v61 }
 0x272   : > { %v6916_v44 = vpop.f32.mrb[28].mxu0  ;;  %v6982_v12 = vadd.f32 %v8980_v61, %v3223_v7 }
 0x273   : > { %v6977_v57 = vadd.f32 %v6976_v3, %v6916_v44  ;;  %v5568_v16 = vpop.f32.mrb[29].mxu0 }
 0x274   : > { %v6979_v43 = vadd.f32 %v6978_v41, %v5568_v16  ;;  %v6917_v11 = vpop.f32.mrb[30].mxu0 }
 0x275   : > { %5709 = vst [vmem:[%s8987_s22 + $0xf0] sm:$0xff] %v6977_v57  ;;  %v6981_v17 = vadd.f32 %v6980_v38, %v6917_v11  ;;  %v5571_v54 = vpop.f32.mrb[31].mxu0 }
 0x276   : > { %5707 = vst [vmem:[%s8987_s22 + $0xe0] sm:$0xff] %v6979_v43  ;;  %v6983_v46 = vadd.f32 %v6982_v12, %v5571_v54 }
 0x277   : > { %5710 = vst [vmem:[%s8987_s22 + $0xf8] sm:$0xff] %v6981_v17 }
 0x278   : > { %5708 = vst [vmem:[%s8987_s22 + $0xe8] sm:$0xff] %v6983_v46 }
 0x279   : > { %7458 = shalt.err (!%p7455_p2)
}
 0x27a   : > { %s7459_s10 = scalar_lea.hbm %s9051_s9, 4096  ;;  %s7463_s29 = scalar_lea.hbm %s9108_s3, 8192 }
 0x27b   : > { %p7460_p0 = scmp.ne.s32.totalorder %s9051_s9, %s7459_s10  ;;  %p7464_p6 = scmp.lt.u32.totalorder %s9051_s9, %s9108_s3 }
 0x27c   : > { %p7465_p7 = scmp.lt.u32.totalorder %s7463_s29, %s7459_s10  ;;  %p7467_p8 = scmp.lt.u32.totalorder %s7459_s10, %s9051_s9 }
 0x27d   : > { %p7461_p4 = pnand %p7460_p0, %p9127_p12 }
 0x27e   : > { %p7466_p11 = por %p7465_p7, %p7464_p6 }
 0x27f   : > { %p7462_p13 = pneg %p7461_p4 }
 0x280   : > { %p7468_p1 = por %p7467_p8, %p7466_p11 }
 0x282   : > { %p7469_p10 = pnand %p7468_p1, %p7462_p13 }
 0x284   : > { %7472 = shalt.err (!%p7469_p10)
}
 0x285   : > { %s7541_s22 = smov 128   ;;  %s7542_s24 = smov 8  }
 0x286   : > { %7231 = dma.vmem_to_hbm [thread:$0]  (%p9127_p12), %s9053_s30, 4096, %s9051_s9, %s5712_s15, %s7541_s22, %s7541_s22, %s7542_s24  }
 0x287 PF: > { %s5743_s7 = sand.u32 1, %s7511_s12   ;;  %p9128_p3 = scmp.ne.s32.totalorder %s9116_s23, 0 }
 0x288   : > { %p9129_p5 = scmp.ge.s32.totalorder %s7531_s17, 2  ;;  %s5744_s26 = scalar_lea.sflag [#allocation5], %s5743_s7 }
 0x28a   : > { %p7245_p9 = pnand %p9129_p5, %p9128_p3 }
 0x28c   : > { %7506 = dma.done.wait (!%p7245_p9), %s5744_s26, 4096  }
 0x28d   : > { %7508 = vsyncadd (!%p7245_p9), %s5744_s26, 4294963200  ;;  %s20_s17 = sadd.s32 1, %s7531_s17   ;;  %s9130_s12 = smov %s7515_s13 }
 0x28e   : > { %p17_p2 = scmp.ge.s32.totalorder %s20_s17, 4   ;;  %s9131_s13 = smov %s7519_s14 }
 0x28f   : > { %s9132_s14 = smov %s7709_s4  ;;  %s9133_s15 = smov %s7527_s16 }
 0x290   : > { %s9134_s16 = smov %s9136_s18  ;;  %19 = sbr.rel (!%p17_p2) target bundleno = 7 (0x7), region = 98 }
 0x297   :  { %5749 = vsyncpa [#allocation4], 1 }
 0x298   :  { %5751 = vsyncpa [#allocation4 + $0x1], 1 }
 0x299   :  { %5752 = vsyncpa [#allocation7], 1 }
 0x29a   :  { %5753 = vsyncpa [#allocation5], 1 }
 0x29b   :  { %5755 = vsyncpa [#allocation5 + $0x1], 1 }

</bundles_post_ra>
